<compile_context>
chip_gen: v6e
topology: v6e:2x2x1
jax: 0.10.0
libtpu: 0.0.40
codegen_flags: <defaults>
</compile_context>

<pallas_src>
import functools

import jax
import jax.numpy as jnp
from jax.experimental import pallas as pl
from jax.experimental.pallas import tpu as pltpu


# ----------------------------------------------------------------------------
# Fused kernel
# ----------------------------------------------------------------------------
def _fused_net1_kernel(x_ref, wb1_ref, b1_ref, wb2_ref, b2_ref, wbf_ref, bf_ref,
                       o_ref, slab_s, slab_h, *, H):
    """One batch image per grid step; the whole net is computed in VMEM.

    x_ref  : (1, H, W*Cin)   f32   input image, channels packed on lanes
    wb*_ref: (3, W*Ci, W*Co) bf16  banded weight matrices (one per dy)
    b*_ref : (1, W*Co)       f32   biases pre-tiled across W
    o_ref  : (1, H, W*Cout)  f32   output image
    slab_s : VMEM (H+2, W*Cin)  f32  small-channel activation slab
    slab_h : VMEM (H+2, W*Chid) f32  hidden (64-channel) activation slab
    """
    # Zero ONLY the two padding border rows (rows 0 and H+1), every step.
    # Rows 1..H are always fully overwritten before they are read, and the
    # per-step cost is ~8.7 KiB of stores (vs ~78 KiB for full-slab zeroing).
    zs = jnp.zeros((1, slab_s.shape[1]), slab_s.dtype)
    zh = jnp.zeros((1, slab_h.shape[1]), slab_h.dtype)
    slab_s[0:1, :] = zs
    slab_s[H + 1:H + 2, :] = zs
    slab_h[0:1, :] = zh
    slab_h[H + 1:H + 2, :] = zh

    xv = x_ref[0]                                        # (H, W*Cin), f32

    def conv(slab, wb_ref, b_ref, relu):
        # 3x3 "same" conv == 3 MXU matmuls (one per kernel row dy) against
        # banded bf16 weights; f32 accumulation; bias/ReLU on the VPU in f32.
        acc = jnp.dot(slab[0:H, :].astype(jnp.bfloat16), wb_ref[0],
                      preferred_element_type=jnp.float32)
        for dy in (1, 2):
            acc = acc + jnp.dot(slab[dy:dy + H, :].astype(jnp.bfloat16),
                                wb_ref[dy],
                                preferred_element_type=jnp.float32)
        acc = acc + b_ref[...]                           # (1, W*Co) broadcast
        return jnp.maximum(acc, 0.0) if relu else acc

    def convv_block(xin):                                # shared Convv block
        slab_s[1:H + 1, :] = xin
        slab_h[1:H + 1, :] = conv(slab_s, wb1_ref, b1_ref, True)
        return conv(slab_h, wb2_ref, b2_ref, True)

    x1 = convv_block(xv) + xv                            # Convv(x)  + x
    x2 = convv_block(x1) + xv                            # Convv(x1) + x
    slab_s[1:H + 1, :] = x2
    o_ref[0] = conv(slab_s, wbf_ref, bf_ref, False).astype(o_ref.dtype)


# ----------------------------------------------------------------------------
# One-time parameter preprocessing (OUTSIDE the per-call hot path)
# ----------------------------------------------------------------------------
def _build_banded_weights(wt, W):
    """(3, 3, Cin, Cout) conv weights -> (3, W*Cin, W*Cout) banded matrices.

    wb[ky][wp*Cin+ci, w*Cout+co] = wt[ky, wp-w+1, ci, co] when wp-w+1 in {0,1,2},
    else 0.  Folds kx taps, channel mixing and width zero-padding into one MXU
    contraction per kernel row.
    """
    KH, KW, Cin, Cout = wt.shape
    mats = []
    for ky in range(KH):
        acc = jnp.zeros((W, Cin, W, Cout), wt.dtype)
        for kx in range(KW):
            band = jnp.eye(W, W, k=1 - kx, dtype=wt.dtype)      # [wp, w]
            acc = acc + band[:, None, :, None] * wt[ky, kx][None, :, None, :]
        mats.append(acc.reshape(W * Cin, W * Cout))
    return jnp.stack(mats, axis=0)


def prepare_net1_params(p, W):
    """Build the kernel-ready weights ONCE (call this outside the hot loop).

    Weights are stored banded in bf16 (zeros stay exactly zero; nonzero taps
    get bf16 rounding only).  Biases are W-tiled and kept in f32.
    """
    return {
        "wb1": _build_banded_weights(p["w1"], W).astype(jnp.bfloat16),
        "wb2": _build_banded_weights(p["w2"], W).astype(jnp.bfloat16),
        "wbf": _build_banded_weights(p["wf"], W).astype(jnp.bfloat16),
        "b1": jnp.tile(p["b1"], W)[None, :].astype(jnp.float32),
        "b2": jnp.tile(p["b2"], W)[None, :].astype(jnp.float32),
        "bf": jnp.tile(p["bf"], W)[None, :].astype(jnp.float32),
    }


# ----------------------------------------------------------------------------
# Forward pass (single fused pallas_call)
# ----------------------------------------------------------------------------
@jax.jit
def net1_forward(x_nchw, pp):
    """Matches net1.forward: NCHW in, NCHW out."""
    N, Cin, H, W = x_nchw.shape
    Chid = pp["wb1"].shape[2] // W
    Cout = pp["wbf"].shape[2] // W

    # NCHW -> (N, H, W*Cin): channels packed with W along the lane axis.
    x = jnp.transpose(x_nchw, (0, 2, 3, 1)).reshape(N, H, W * Cin)

    # Advisory cost estimate (tiny kernel; keeps XLA scheduling sane).
    flops = N * 2 * 3 * H * (2 * (W * Cin) * (W * Chid)
                             + 2 * (W * Chid) * (W * Cin)
                             + (W * Cin) * (W * Cout))
    bytes_accessed = (
        (pp["wb1"].size + pp["wb2"].size + pp["wbf"].size) * 2   # bf16 weights
        + (pp["b1"].size + pp["b2"].size + pp["bf"].size) * 4
        + x.size * 4 + N * H * W * Cout * 4)

    kernel = functools.partial(_fused_net1_kernel, H=H)
    out = pl.pallas_call(
        kernel,
        out_shape=jax.ShapeDtypeStruct((N, H, W * Cout), jnp.float32),
        grid_spec=pltpu.PrefetchScalarGridSpec(
            num_scalar_prefetch=0,
            grid=(N,),
            in_specs=[
                pl.BlockSpec((1, H, W * Cin), lambda n: (n, 0, 0)),
                # Constant index_maps: weights/biases are DMA'd once per core.
                pl.BlockSpec((3, W * Cin, W * Chid), lambda n: (0, 0, 0)),
                pl.BlockSpec((1, W * Chid), lambda n: (0, 0)),
                pl.BlockSpec((3, W * Chid, W * Cin), lambda n: (0, 0, 0)),
                pl.BlockSpec((1, W * Cin), lambda n: (0, 0)),
                pl.BlockSpec((3, W * Cin, W * Cout), lambda n: (0, 0, 0)),
                pl.BlockSpec((1, W * Cout), lambda n: (0, 0)),
            ],
            out_specs=pl.BlockSpec((1, H, W * Cout), lambda n: (n, 0, 0)),
            scratch_shapes=[
                pltpu.VMEM((H + 2, W * Cin), jnp.float32),    # small-C slab
                pltpu.VMEM((H + 2, W * Chid), jnp.float32),   # hidden slab
            ],
        ),
        compiler_params=pltpu.CompilerParams(
            dimension_semantics=("parallel",),      # v7x: one image per TC
            vmem_limit_bytes=64 * 1024 * 1024),
        cost_estimate=pl.CostEstimate(
            flops=flops, transcendentals=0, bytes_accessed=bytes_accessed),
    )(x, pp["wb1"], pp["b1"], pp["wb2"], pp["b2"], pp["wbf"], pp["bf"])

    return jnp.transpose(out.reshape(N, H, W, Cout), (0, 3, 1, 2))


# ----------------------------------------------------------------------------
# Parameters & pure-JAX reference
# ----------------------------------------------------------------------------
def init_params(key, in_channels, out_channels):
    """Deterministic synthetic parameters (shapes match the nn.Conv2d layers),
    stored directly in HWIO layout (kh, kw, cin, cout)."""
    ks = jax.random.split(key, 6)

    def winit(k, kh, kw, cin, cout):
        scale = 1.0 / jnp.sqrt(jnp.float32(cin * kh * kw))
        return jax.random.uniform(k, (kh, kw, cin, cout), jnp.float32,
                                  -scale, scale)

    return {
        # Convv[0]: Conv2d(in_channels, 64, 3, pad=1)
        "w1": winit(ks[0], 3, 3, in_channels, 64),
        "b1": jax.random.uniform(ks[1], (64,), jnp.float32, -0.05, 0.05),
        # Convv[2]: Conv2d(64, in_channels, 3, pad=1)
        "w2": winit(ks[2], 3, 3, 64, in_channels),
        "b2": jax.random.uniform(ks[3], (in_channels,), jnp.float32, -0.05, 0.05),
        # final: Conv2d(in_channels, out_channels, 3, pad=1)
        "wf": winit(ks[4], 3, 3, in_channels, out_channels),
        "bf": jax.random.uniform(ks[5], (out_channels,), jnp.float32, -0.05, 0.05),
    }


def _reference_conv(x_nhwc, w, b, relu):
    y = jax.lax.conv_general_dilated(
        x_nhwc, w, window_strides=(1, 1), padding="SAME",
        dimension_numbers=("NHWC", "HWIO", "NHWC"))
    y = y + b[None, None, None, :]
    return jnp.maximum(y, 0.0) if relu else y


def _reference_forward(x_nchw, p):
    x = jnp.transpose(x_nchw, (0, 2, 3, 1))
    h = _reference_conv(_reference_conv(x, p["w1"], p["b1"], True),
                        p["w2"], p["b2"], True)
    h = h + x
    h = _reference_conv(_reference_conv(h, p["w1"], p["b1"], True),
                        p["w2"], p["b2"], True)
    h = h + x
    out = _reference_conv(h, p["wf"], p["bf"], False)
    return jnp.transpose(out, (0, 3, 1, 2))


if __name__ == "__main__":
    key = jax.random.PRNGKey(0)
    k_x, k_p = jax.random.split(key)

    in_channels, out_channels = 4, 4
    N, H, W = 2, 16, 16
    x = jax.random.normal(k_x, (N, in_channels, H, W), jnp.float32)  # NCHW
    params = init_params(k_p, in_channels, out_channels)

    # One-time preprocessing (hoisted out of the per-call forward path).
    prepped = jax.tree_util.tree_map(jax.block_until_ready,
                                     prepare_net1_params(params, W))

    out = jax.block_until_ready(net1_forward(x, prepped))
    ref = jax.block_until_ready(_reference_forward(x, params))

    assert out.shape == (N, out_channels, H, W)
    # bf16 matmul operands with f32 accumulation: tolerance set accordingly
    # (measured error is ~5e-3 max at these shapes).
    assert jnp.allclose(out, ref, atol=2e-2, rtol=2e-2), \
        float(jnp.max(jnp.abs(out - ref)))

    print("KERNEL_OK")
</pallas_src>

<mosaic_0001>
module attributes {stable_mosaic.version = 11 : i64} {
  func.func @_fused_net1_kernel(%arg0: i32, %arg1: memref<1x16x64xf32, #tpu.memory_space<vmem>>, %arg2: memref<3x64x1024xbf16, #tpu.memory_space<vmem>>, %arg3: memref<1x1024xf32, #tpu.memory_space<vmem>>, %arg4: memref<3x1024x64xbf16, #tpu.memory_space<vmem>>, %arg5: memref<1x64xf32, #tpu.memory_space<vmem>>, %arg6: memref<3x64x64xbf16, #tpu.memory_space<vmem>>, %arg7: memref<1x64xf32, #tpu.memory_space<vmem>>, %arg8: memref<1x16x64xf32, #tpu.memory_space<vmem>>, %arg9: memref<18x64xf32, #tpu.memory_space<vmem>>, %arg10: memref<18x1024xf32, #tpu.memory_space<vmem>>) attributes {dimension_semantics = [#tpu.dimension_semantics<parallel>], iteration_bounds = array<i64: 2>, scalar_prefetch = 0 : i64, scratch_operands = 2 : i64, tpu.core_type = #tpu.core_type<tc>, window_params = [{transform_indices = @transform_0, window_bounds = array<i64: 1, 16, 64>}, {pipeline_mode = #tpu.pipeline_mode<synchronous>, transform_indices = @transform_1, window_bounds = array<i64: 3, 64, 1024>}, {pipeline_mode = #tpu.pipeline_mode<synchronous>, transform_indices = @transform_2, window_bounds = array<i64: 1, 1024>}, {pipeline_mode = #tpu.pipeline_mode<synchronous>, transform_indices = @transform_3, window_bounds = array<i64: 3, 1024, 64>}, {pipeline_mode = #tpu.pipeline_mode<synchronous>, transform_indices = @transform_4, window_bounds = array<i64: 1, 64>}, {pipeline_mode = #tpu.pipeline_mode<synchronous>, transform_indices = @transform_5, window_bounds = array<i64: 3, 64, 64>}, {pipeline_mode = #tpu.pipeline_mode<synchronous>, transform_indices = @transform_6, window_bounds = array<i64: 1, 64>}, {transform_indices = @transform_7, window_bounds = array<i64: 1, 16, 64>}]} {
    %cst = arith.constant 0.000000e+00 : f32
    %0 = vector.broadcast %cst : f32 to vector<1x64xf32>
    %cst_0 = arith.constant 0.000000e+00 : f32
    %1 = vector.broadcast %cst_0 : f32 to vector<1x1024xf32>
    %c0 = arith.constant 0 : index
    %c0_1 = arith.constant 0 : index
    %2 = vector.load %arg9[%c0, %c0_1] : memref<18x64xf32, #tpu.memory_space<vmem>>, vector<1x64xf32>
    tpu.vector_store %arg9[%c0, %c0_1], %0 {strides = array<i32>} : memref<18x64xf32, #tpu.memory_space<vmem>>, vector<1x64xf32>,
    %c17 = arith.constant 17 : index
    %c0_2 = arith.constant 0 : index
    %3 = vector.load %arg9[%c17, %c0_2] : memref<18x64xf32, #tpu.memory_space<vmem>>, vector<1x64xf32>
    tpu.vector_store %arg9[%c17, %c0_2], %0 {strides = array<i32>} : memref<18x64xf32, #tpu.memory_space<vmem>>, vector<1x64xf32>,
    %c0_3 = arith.constant 0 : index
    %c0_4 = arith.constant 0 : index
    %4 = vector.load %arg10[%c0_3, %c0_4] : memref<18x1024xf32, #tpu.memory_space<vmem>>, vector<1x1024xf32>
    tpu.vector_store %arg10[%c0_3, %c0_4], %1 {strides = array<i32>} : memref<18x1024xf32, #tpu.memory_space<vmem>>, vector<1x1024xf32>,
    %c17_5 = arith.constant 17 : index
    %c0_6 = arith.constant 0 : index
    %5 = vector.load %arg10[%c17_5, %c0_6] : memref<18x1024xf32, #tpu.memory_space<vmem>>, vector<1x1024xf32>
    tpu.vector_store %arg10[%c17_5, %c0_6], %1 {strides = array<i32>} : memref<18x1024xf32, #tpu.memory_space<vmem>>, vector<1x1024xf32>,
    %c0_7 = arith.constant 0 : index
    %c0_8 = arith.constant 0 : index
    %c0_9 = arith.constant 0 : index
    %6 = vector.load %arg1[%c0_7, %c0_8, %c0_9] : memref<1x16x64xf32, #tpu.memory_space<vmem>>, vector<1x16x64xf32>
    %7 = vector.shape_cast %6 : vector<1x16x64xf32> to vector<16x64xf32>
    %c1 = arith.constant 1 : index
    %c0_10 = arith.constant 0 : index
    %8 = vector.load %arg9[%c1, %c0_10] : memref<18x64xf32, #tpu.memory_space<vmem>>, vector<16x64xf32>
    tpu.vector_store %arg9[%c1, %c0_10], %7 {strides = array<i32>} : memref<18x64xf32, #tpu.memory_space<vmem>>, vector<16x64xf32>,
    %c0_11 = arith.constant 0 : index
    %c0_12 = arith.constant 0 : index
    %9 = vector.load %arg9[%c0_11, %c0_12] : memref<18x64xf32, #tpu.memory_space<vmem>>, vector<16x64xf32>
    %10 = arith.truncf %9 : vector<16x64xf32> to vector<16x64xbf16>
    %c0_13 = arith.constant 0 : index
    %c0_14 = arith.constant 0 : index
    %c0_15 = arith.constant 0 : index
    %11 = vector.load %arg2[%c0_13, %c0_14, %c0_15] : memref<3x64x1024xbf16, #tpu.memory_space<vmem>>, vector<1x64x1024xbf16>
    %12 = vector.shape_cast %11 : vector<1x64x1024xbf16> to vector<64x1024xbf16>
    %cst_16 = arith.constant dense<0.000000e+00> : vector<16x1024xf32>
    %13 = tpu.matmul %10, %12, %cst_16 {dimension_numbers = #tpu.dot_dimension_numbers<[1], [0], [0], [1], [0, 0, 1, 1], [], []>} : vector<16x64xbf16>, vector<64x1024xbf16>, vector<16x1024xf32> -> vector<16x1024xf32>
    %c1_17 = arith.constant 1 : index
    %c0_18 = arith.constant 0 : index
    %14 = vector.load %arg9[%c1_17, %c0_18] : memref<18x64xf32, #tpu.memory_space<vmem>>, vector<16x64xf32>
    %15 = arith.truncf %14 : vector<16x64xf32> to vector<16x64xbf16>
    %c1_19 = arith.constant 1 : index
    %c0_20 = arith.constant 0 : index
    %c0_21 = arith.constant 0 : index
    %16 = vector.load %arg2[%c1_19, %c0_20, %c0_21] : memref<3x64x1024xbf16, #tpu.memory_space<vmem>>, vector<1x64x1024xbf16>
    %17 = vector.shape_cast %16 : vector<1x64x1024xbf16> to vector<64x1024xbf16>
    %cst_22 = arith.constant dense<0.000000e+00> : vector<16x1024xf32>
    %18 = tpu.matmul %15, %17, %cst_22 {dimension_numbers = #tpu.dot_dimension_numbers<[1], [0], [0], [1], [0, 0, 1, 1], [], []>} : vector<16x64xbf16>, vector<64x1024xbf16>, vector<16x1024xf32> -> vector<16x1024xf32>
    %19 = arith.addf %13, %18 : vector<16x1024xf32>
    %c2 = arith.constant 2 : index
    %c0_23 = arith.constant 0 : index
    %20 = vector.load %arg9[%c2, %c0_23] : memref<18x64xf32, #tpu.memory_space<vmem>>, vector<16x64xf32>
    %21 = arith.truncf %20 : vector<16x64xf32> to vector<16x64xbf16>
    %c2_24 = arith.constant 2 : index
    %c0_25 = arith.constant 0 : index
    %c0_26 = arith.constant 0 : index
    %22 = vector.load %arg2[%c2_24, %c0_25, %c0_26] : memref<3x64x1024xbf16, #tpu.memory_space<vmem>>, vector<1x64x1024xbf16>
    %23 = vector.shape_cast %22 : vector<1x64x1024xbf16> to vector<64x1024xbf16>
    %cst_27 = arith.constant dense<0.000000e+00> : vector<16x1024xf32>
    %24 = tpu.matmul %21, %23, %cst_27 {dimension_numbers = #tpu.dot_dimension_numbers<[1], [0], [0], [1], [0, 0, 1, 1], [], []>} : vector<16x64xbf16>, vector<64x1024xbf16>, vector<16x1024xf32> -> vector<16x1024xf32>
    %25 = arith.addf %19, %24 : vector<16x1024xf32>
    %c0_28 = arith.constant 0 : index
    %c0_29 = arith.constant 0 : index
    %26 = vector.load %arg3[%c0_28, %c0_29] : memref<1x1024xf32, #tpu.memory_space<vmem>>, vector<1x1024xf32>
    %27 = vector.broadcast %26 : vector<1x1024xf32> to vector<16x1024xf32>
    %28 = arith.addf %25, %27 : vector<16x1024xf32>
    %cst_30 = arith.constant 0.000000e+00 : f32
    %29 = vector.broadcast %cst_30 : f32 to vector<16x1024xf32>
    %30 = arith.maximumf %28, %29 : vector<16x1024xf32>
    %c1_31 = arith.constant 1 : index
    %c0_32 = arith.constant 0 : index
    %31 = vector.load %arg10[%c1_31, %c0_32] : memref<18x1024xf32, #tpu.memory_space<vmem>>, vector<16x1024xf32>
    tpu.vector_store %arg10[%c1_31, %c0_32], %30 {strides = array<i32>} : memref<18x1024xf32, #tpu.memory_space<vmem>>, vector<16x1024xf32>,
    %c0_33 = arith.constant 0 : index
    %c0_34 = arith.constant 0 : index
    %32 = vector.load %arg10[%c0_33, %c0_34] : memref<18x1024xf32, #tpu.memory_space<vmem>>, vector<16x1024xf32>
    %33 = arith.truncf %32 : vector<16x1024xf32> to vector<16x1024xbf16>
    %c0_35 = arith.constant 0 : index
    %c0_36 = arith.constant 0 : index
    %c0_37 = arith.constant 0 : index
    %34 = vector.load %arg4[%c0_35, %c0_36, %c0_37] : memref<3x1024x64xbf16, #tpu.memory_space<vmem>>, vector<1x1024x64xbf16>
    %35 = vector.shape_cast %34 : vector<1x1024x64xbf16> to vector<1024x64xbf16>
    %cst_38 = arith.constant dense<0.000000e+00> : vector<16x64xf32>
    %36 = tpu.matmul %33, %35, %cst_38 {dimension_numbers = #tpu.dot_dimension_numbers<[1], [0], [0], [1], [0, 0, 1, 1], [], []>} : vector<16x1024xbf16>, vector<1024x64xbf16>, vector<16x64xf32> -> vector<16x64xf32>
    %c1_39 = arith.constant 1 : index
    %c0_40 = arith.constant 0 : index
    %37 = vector.load %arg10[%c1_39, %c0_40] : memref<18x1024xf32, #tpu.memory_space<vmem>>, vector<16x1024xf32>
    %38 = arith.truncf %37 : vector<16x1024xf32> to vector<16x1024xbf16>
    %c1_41 = arith.constant 1 : index
    %c0_42 = arith.constant 0 : index
    %c0_43 = arith.constant 0 : index
    %39 = vector.load %arg4[%c1_41, %c0_42, %c0_43] : memref<3x1024x64xbf16, #tpu.memory_space<vmem>>, vector<1x1024x64xbf16>
    %40 = vector.shape_cast %39 : vector<1x1024x64xbf16> to vector<1024x64xbf16>
    %cst_44 = arith.constant dense<0.000000e+00> : vector<16x64xf32>
    %41 = tpu.matmul %38, %40, %cst_44 {dimension_numbers = #tpu.dot_dimension_numbers<[1], [0], [0], [1], [0, 0, 1, 1], [], []>} : vector<16x1024xbf16>, vector<1024x64xbf16>, vector<16x64xf32> -> vector<16x64xf32>
    %42 = arith.addf %36, %41 : vector<16x64xf32>
    %c2_45 = arith.constant 2 : index
    %c0_46 = arith.constant 0 : index
    %43 = vector.load %arg10[%c2_45, %c0_46] : memref<18x1024xf32, #tpu.memory_space<vmem>>, vector<16x1024xf32>
    %44 = arith.truncf %43 : vector<16x1024xf32> to vector<16x1024xbf16>
    %c2_47 = arith.constant 2 : index
    %c0_48 = arith.constant 0 : index
    %c0_49 = arith.constant 0 : index
    %45 = vector.load %arg4[%c2_47, %c0_48, %c0_49] : memref<3x1024x64xbf16, #tpu.memory_space<vmem>>, vector<1x1024x64xbf16>
    %46 = vector.shape_cast %45 : vector<1x1024x64xbf16> to vector<1024x64xbf16>
    %cst_50 = arith.constant dense<0.000000e+00> : vector<16x64xf32>
    %47 = tpu.matmul %44, %46, %cst_50 {dimension_numbers = #tpu.dot_dimension_numbers<[1], [0], [0], [1], [0, 0, 1, 1], [], []>} : vector<16x1024xbf16>, vector<1024x64xbf16>, vector<16x64xf32> -> vector<16x64xf32>
    %48 = arith.addf %42, %47 : vector<16x64xf32>
    %c0_51 = arith.constant 0 : index
    %c0_52 = arith.constant 0 : index
    %49 = vector.load %arg5[%c0_51, %c0_52] : memref<1x64xf32, #tpu.memory_space<vmem>>, vector<1x64xf32>
    %50 = vector.broadcast %49 : vector<1x64xf32> to vector<16x64xf32>
    %51 = arith.addf %48, %50 : vector<16x64xf32>
    %cst_53 = arith.constant 0.000000e+00 : f32
    %52 = vector.broadcast %cst_53 : f32 to vector<16x64xf32>
    %53 = arith.maximumf %51, %52 : vector<16x64xf32>
    %54 = arith.addf %53, %7 : vector<16x64xf32>
    %c1_54 = arith.constant 1 : index
    %c0_55 = arith.constant 0 : index
    %55 = vector.load %arg9[%c1_54, %c0_55] : memref<18x64xf32, #tpu.memory_space<vmem>>, vector<16x64xf32>
    tpu.vector_store %arg9[%c1_54, %c0_55], %54 {strides = array<i32>} : memref<18x64xf32, #tpu.memory_space<vmem>>, vector<16x64xf32>,
    %c0_56 = arith.constant 0 : index
    %c0_57 = arith.constant 0 : index
    %56 = vector.load %arg9[%c0_56, %c0_57] : memref<18x64xf32, #tpu.memory_space<vmem>>, vector<16x64xf32>
    %57 = arith.truncf %56 : vector<16x64xf32> to vector<16x64xbf16>
    %c0_58 = arith.constant 0 : index
    %c0_59 = arith.constant 0 : index
    %c0_60 = arith.constant 0 : index
    %58 = vector.load %arg2[%c0_58, %c0_59, %c0_60] : memref<3x64x1024xbf16, #tpu.memory_space<vmem>>, vector<1x64x1024xbf16>
    %59 = vector.shape_cast %58 : vector<1x64x1024xbf16> to vector<64x1024xbf16>
    %cst_61 = arith.constant dense<0.000000e+00> : vector<16x1024xf32>
    %60 = tpu.matmul %57, %59, %cst_61 {dimension_numbers = #tpu.dot_dimension_numbers<[1], [0], [0], [1], [0, 0, 1, 1], [], []>} : vector<16x64xbf16>, vector<64x1024xbf16>, vector<16x1024xf32> -> vector<16x1024xf32>
    %c1_62 = arith.constant 1 : index
    %c0_63 = arith.constant 0 : index
    %61 = vector.load %arg9[%c1_62, %c0_63] : memref<18x64xf32, #tpu.memory_space<vmem>>, vector<16x64xf32>
    %62 = arith.truncf %61 : vector<16x64xf32> to vector<16x64xbf16>
    %c1_64 = arith.constant 1 : index
    %c0_65 = arith.constant 0 : index
    %c0_66 = arith.constant 0 : index
    %63 = vector.load %arg2[%c1_64, %c0_65, %c0_66] : memref<3x64x1024xbf16, #tpu.memory_space<vmem>>, vector<1x64x1024xbf16>
    %64 = vector.shape_cast %63 : vector<1x64x1024xbf16> to vector<64x1024xbf16>
    %cst_67 = arith.constant dense<0.000000e+00> : vector<16x1024xf32>
    %65 = tpu.matmul %62, %64, %cst_67 {dimension_numbers = #tpu.dot_dimension_numbers<[1], [0], [0], [1], [0, 0, 1, 1], [], []>} : vector<16x64xbf16>, vector<64x1024xbf16>, vector<16x1024xf32> -> vector<16x1024xf32>
    %66 = arith.addf %60, %65 : vector<16x1024xf32>
    %c2_68 = arith.constant 2 : index
    %c0_69 = arith.constant 0 : index
    %67 = vector.load %arg9[%c2_68, %c0_69] : memref<18x64xf32, #tpu.memory_space<vmem>>, vector<16x64xf32>
    %68 = arith.truncf %67 : vector<16x64xf32> to vector<16x64xbf16>
    %c2_70 = arith.constant 2 : index
    %c0_71 = arith.constant 0 : index
    %c0_72 = arith.constant 0 : index
    %69 = vector.load %arg2[%c2_70, %c0_71, %c0_72] : memref<3x64x1024xbf16, #tpu.memory_space<vmem>>, vector<1x64x1024xbf16>
    %70 = vector.shape_cast %69 : vector<1x64x1024xbf16> to vector<64x1024xbf16>
    %cst_73 = arith.constant dense<0.000000e+00> : vector<16x1024xf32>
    %71 = tpu.matmul %68, %70, %cst_73 {dimension_numbers = #tpu.dot_dimension_numbers<[1], [0], [0], [1], [0, 0, 1, 1], [], []>} : vector<16x64xbf16>, vector<64x1024xbf16>, vector<16x1024xf32> -> vector<16x1024xf32>
    %72 = arith.addf %66, %71 : vector<16x1024xf32>
    %c0_74 = arith.constant 0 : index
    %c0_75 = arith.constant 0 : index
    %73 = vector.load %arg3[%c0_74, %c0_75] : memref<1x1024xf32, #tpu.memory_space<vmem>>, vector<1x1024xf32>
    %74 = vector.broadcast %73 : vector<1x1024xf32> to vector<16x1024xf32>
    %75 = arith.addf %72, %74 : vector<16x1024xf32>
    %cst_76 = arith.constant 0.000000e+00 : f32
    %76 = vector.broadcast %cst_76 : f32 to vector<16x1024xf32>
    %77 = arith.maximumf %75, %76 : vector<16x1024xf32>
    %c1_77 = arith.constant 1 : index
    %c0_78 = arith.constant 0 : index
    %78 = vector.load %arg10[%c1_77, %c0_78] : memref<18x1024xf32, #tpu.memory_space<vmem>>, vector<16x1024xf32>
    tpu.vector_store %arg10[%c1_77, %c0_78], %77 {strides = array<i32>} : memref<18x1024xf32, #tpu.memory_space<vmem>>, vector<16x1024xf32>,
    %c0_79 = arith.constant 0 : index
    %c0_80 = arith.constant 0 : index
    %79 = vector.load %arg10[%c0_79, %c0_80] : memref<18x1024xf32, #tpu.memory_space<vmem>>, vector<16x1024xf32>
    %80 = arith.truncf %79 : vector<16x1024xf32> to vector<16x1024xbf16>
    %c0_81 = arith.constant 0 : index
    %c0_82 = arith.constant 0 : index
    %c0_83 = arith.constant 0 : index
    %81 = vector.load %arg4[%c0_81, %c0_82, %c0_83] : memref<3x1024x64xbf16, #tpu.memory_space<vmem>>, vector<1x1024x64xbf16>
    %82 = vector.shape_cast %81 : vector<1x1024x64xbf16> to vector<1024x64xbf16>
    %cst_84 = arith.constant dense<0.000000e+00> : vector<16x64xf32>
    %83 = tpu.matmul %80, %82, %cst_84 {dimension_numbers = #tpu.dot_dimension_numbers<[1], [0], [0], [1], [0, 0, 1, 1], [], []>} : vector<16x1024xbf16>, vector<1024x64xbf16>, vector<16x64xf32> -> vector<16x64xf32>
    %c1_85 = arith.constant 1 : index
    %c0_86 = arith.constant 0 : index
    %84 = vector.load %arg10[%c1_85, %c0_86] : memref<18x1024xf32, #tpu.memory_space<vmem>>, vector<16x1024xf32>
    %85 = arith.truncf %84 : vector<16x1024xf32> to vector<16x1024xbf16>
    %c1_87 = arith.constant 1 : index
    %c0_88 = arith.constant 0 : index
    %c0_89 = arith.constant 0 : index
    %86 = vector.load %arg4[%c1_87, %c0_88, %c0_89] : memref<3x1024x64xbf16, #tpu.memory_space<vmem>>, vector<1x1024x64xbf16>
    %87 = vector.shape_cast %86 : vector<1x1024x64xbf16> to vector<1024x64xbf16>
    %cst_90 = arith.constant dense<0.000000e+00> : vector<16x64xf32>
    %88 = tpu.matmul %85, %87, %cst_90 {dimension_numbers = #tpu.dot_dimension_numbers<[1], [0], [0], [1], [0, 0, 1, 1], [], []>} : vector<16x1024xbf16>, vector<1024x64xbf16>, vector<16x64xf32> -> vector<16x64xf32>
    %89 = arith.addf %83, %88 : vector<16x64xf32>
    %c2_91 = arith.constant 2 : index
    %c0_92 = arith.constant 0 : index
    %90 = vector.load %arg10[%c2_91, %c0_92] : memref<18x1024xf32, #tpu.memory_space<vmem>>, vector<16x1024xf32>
    %91 = arith.truncf %90 : vector<16x1024xf32> to vector<16x1024xbf16>
    %c2_93 = arith.constant 2 : index
    %c0_94 = arith.constant 0 : index
    %c0_95 = arith.constant 0 : index
    %92 = vector.load %arg4[%c2_93, %c0_94, %c0_95] : memref<3x1024x64xbf16, #tpu.memory_space<vmem>>, vector<1x1024x64xbf16>
    %93 = vector.shape_cast %92 : vector<1x1024x64xbf16> to vector<1024x64xbf16>
    %cst_96 = arith.constant dense<0.000000e+00> : vector<16x64xf32>
    %94 = tpu.matmul %91, %93, %cst_96 {dimension_numbers = #tpu.dot_dimension_numbers<[1], [0], [0], [1], [0, 0, 1, 1], [], []>} : vector<16x1024xbf16>, vector<1024x64xbf16>, vector<16x64xf32> -> vector<16x64xf32>
    %95 = arith.addf %89, %94 : vector<16x64xf32>
    %c0_97 = arith.constant 0 : index
    %c0_98 = arith.constant 0 : index
    %96 = vector.load %arg5[%c0_97, %c0_98] : memref<1x64xf32, #tpu.memory_space<vmem>>, vector<1x64xf32>
    %97 = vector.broadcast %96 : vector<1x64xf32> to vector<16x64xf32>
    %98 = arith.addf %95, %97 : vector<16x64xf32>
    %cst_99 = arith.constant 0.000000e+00 : f32
    %99 = vector.broadcast %cst_99 : f32 to vector<16x64xf32>
    %100 = arith.maximumf %98, %99 : vector<16x64xf32>
    %101 = arith.addf %100, %7 : vector<16x64xf32>
    %c1_100 = arith.constant 1 : index
    %c0_101 = arith.constant 0 : index
    %102 = vector.load %arg9[%c1_100, %c0_101] : memref<18x64xf32, #tpu.memory_space<vmem>>, vector<16x64xf32>
    tpu.vector_store %arg9[%c1_100, %c0_101], %101 {strides = array<i32>} : memref<18x64xf32, #tpu.memory_space<vmem>>, vector<16x64xf32>,
    %c0_102 = arith.constant 0 : index
    %c0_103 = arith.constant 0 : index
    %103 = vector.load %arg9[%c0_102, %c0_103] : memref<18x64xf32, #tpu.memory_space<vmem>>, vector<16x64xf32>
    %104 = arith.truncf %103 : vector<16x64xf32> to vector<16x64xbf16>
    %c0_104 = arith.constant 0 : index
    %c0_105 = arith.constant 0 : index
    %c0_106 = arith.constant 0 : index
    %105 = vector.load %arg6[%c0_104, %c0_105, %c0_106] : memref<3x64x64xbf16, #tpu.memory_space<vmem>>, vector<1x64x64xbf16>
    %106 = vector.shape_cast %105 : vector<1x64x64xbf16> to vector<64x64xbf16>
    %cst_107 = arith.constant dense<0.000000e+00> : vector<16x64xf32>
    %107 = tpu.matmul %104, %106, %cst_107 {dimension_numbers = #tpu.dot_dimension_numbers<[1], [0], [0], [1], [0, 0, 1, 1], [], []>} : vector<16x64xbf16>, vector<64x64xbf16>, vector<16x64xf32> -> vector<16x64xf32>
    %c1_108 = arith.constant 1 : index
    %c0_109 = arith.constant 0 : index
    %108 = vector.load %arg9[%c1_108, %c0_109] : memref<18x64xf32, #tpu.memory_space<vmem>>, vector<16x64xf32>
    %109 = arith.truncf %108 : vector<16x64xf32> to vector<16x64xbf16>
    %c1_110 = arith.constant 1 : index
    %c0_111 = arith.constant 0 : index
    %c0_112 = arith.constant 0 : index
    %110 = vector.load %arg6[%c1_110, %c0_111, %c0_112] : memref<3x64x64xbf16, #tpu.memory_space<vmem>>, vector<1x64x64xbf16>
    %111 = vector.shape_cast %110 : vector<1x64x64xbf16> to vector<64x64xbf16>
    %cst_113 = arith.constant dense<0.000000e+00> : vector<16x64xf32>
    %112 = tpu.matmul %109, %111, %cst_113 {dimension_numbers = #tpu.dot_dimension_numbers<[1], [0], [0], [1], [0, 0, 1, 1], [], []>} : vector<16x64xbf16>, vector<64x64xbf16>, vector<16x64xf32> -> vector<16x64xf32>
    %113 = arith.addf %107, %112 : vector<16x64xf32>
    %c2_114 = arith.constant 2 : index
    %c0_115 = arith.constant 0 : index
    %114 = vector.load %arg9[%c2_114, %c0_115] : memref<18x64xf32, #tpu.memory_space<vmem>>, vector<16x64xf32>
    %115 = arith.truncf %114 : vector<16x64xf32> to vector<16x64xbf16>
    %c2_116 = arith.constant 2 : index
    %c0_117 = arith.constant 0 : index
    %c0_118 = arith.constant 0 : index
    %116 = vector.load %arg6[%c2_116, %c0_117, %c0_118] : memref<3x64x64xbf16, #tpu.memory_space<vmem>>, vector<1x64x64xbf16>
    %117 = vector.shape_cast %116 : vector<1x64x64xbf16> to vector<64x64xbf16>
    %cst_119 = arith.constant dense<0.000000e+00> : vector<16x64xf32>
    %118 = tpu.matmul %115, %117, %cst_119 {dimension_numbers = #tpu.dot_dimension_numbers<[1], [0], [0], [1], [0, 0, 1, 1], [], []>} : vector<16x64xbf16>, vector<64x64xbf16>, vector<16x64xf32> -> vector<16x64xf32>
    %119 = arith.addf %113, %118 : vector<16x64xf32>
    %c0_120 = arith.constant 0 : index
    %c0_121 = arith.constant 0 : index
    %120 = vector.load %arg7[%c0_120, %c0_121] : memref<1x64xf32, #tpu.memory_space<vmem>>, vector<1x64xf32>
    %121 = vector.broadcast %120 : vector<1x64xf32> to vector<16x64xf32>
    %122 = arith.addf %119, %121 : vector<16x64xf32>
    %c0_122 = arith.constant 0 : index
    %c0_123 = arith.constant 0 : index
    %c0_124 = arith.constant 0 : index
    %123 = vector.load %arg8[%c0_122, %c0_123, %c0_124] : memref<1x16x64xf32, #tpu.memory_space<vmem>>, vector<1x16x64xf32>
    %124 = vector.shape_cast %123 : vector<1x16x64xf32> to vector<16x64xf32>
    %125 = vector.shape_cast %122 : vector<16x64xf32> to vector<1x16x64xf32>
    tpu.vector_store %arg8[%c0_122, %c0_123, %c0_124], %125 {strides = array<i32>} : memref<1x16x64xf32, #tpu.memory_space<vmem>>, vector<1x16x64xf32>,
    return
  }
  func.func @transform_0(%arg0: i32) -> (i32, i32, i32) {
    %c0_i32 = arith.constant 0 : i32
    %c0_i32_0 = arith.constant 0 : i32
    %c0_i32_1 = arith.constant 0 : i32
    return %arg0, %c0_i32, %c0_i32_0 : i32, i32, i32
  }
  func.func @transform_1(%arg0: i32) -> (i32, i32, i32) {
    %c0_i32 = arith.constant 0 : i32
    %c0_i32_0 = arith.constant 0 : i32
    %c0_i32_1 = arith.constant 0 : i32
    %c0_i32_2 = arith.constant 0 : i32
    return %c0_i32, %c0_i32_0, %c0_i32_1 : i32, i32, i32
  }
  func.func @transform_2(%arg0: i32) -> (i32, i32) {
    %c0_i32 = arith.constant 0 : i32
    %c0_i32_0 = arith.constant 0 : i32
    %c0_i32_1 = arith.constant 0 : i32
    return %c0_i32, %c0_i32_0 : i32, i32
  }
  func.func @transform_3(%arg0: i32) -> (i32, i32, i32) {
    %c0_i32 = arith.constant 0 : i32
    %c0_i32_0 = arith.constant 0 : i32
    %c0_i32_1 = arith.constant 0 : i32
    %c0_i32_2 = arith.constant 0 : i32
    return %c0_i32, %c0_i32_0, %c0_i32_1 : i32, i32, i32
  }
  func.func @transform_4(%arg0: i32) -> (i32, i32) {
    %c0_i32 = arith.constant 0 : i32
    %c0_i32_0 = arith.constant 0 : i32
    %c0_i32_1 = arith.constant 0 : i32
    return %c0_i32, %c0_i32_0 : i32, i32
  }
  func.func @transform_5(%arg0: i32) -> (i32, i32, i32) {
    %c0_i32 = arith.constant 0 : i32
    %c0_i32_0 = arith.constant 0 : i32
    %c0_i32_1 = arith.constant 0 : i32
    %c0_i32_2 = arith.constant 0 : i32
    return %c0_i32, %c0_i32_0, %c0_i32_1 : i32, i32, i32
  }
  func.func @transform_6(%arg0: i32) -> (i32, i32) {
    %c0_i32 = arith.constant 0 : i32
    %c0_i32_0 = arith.constant 0 : i32
    %c0_i32_1 = arith.constant 0 : i32
    return %c0_i32, %c0_i32_0 : i32, i32
  }
  func.func @transform_7(%arg0: i32) -> (i32, i32, i32) {
    %c0_i32 = arith.constant 0 : i32
    %c0_i32_0 = arith.constant 0 : i32
    %c0_i32_1 = arith.constant 0 : i32
    return %arg0, %c0_i32, %c0_i32_0 : i32, i32, i32
  }
}

</mosaic_0001>

<bundles_post_ra>
// kernel: net1_forward.1
= control target key start
LH: loop header
LB: loop body
LE: loop exit
PB: predicated region body
PF: predicated region fallthrough
CT: control target
= control target key end

     0   :  { %s10077_s24 = smov 0   ;;  %s12337_s0 = inlined_call_operand.vmem [shape: f32[2,16,64], index: 0, kind: input, shape index: {}]   ;;  %s12338_s1 = inlined_call_operand.vmem [shape: bf16[3,64,1024], index: 1, kind: input, shape index: {}]   ;;  %s12339_s2 = inlined_call_operand.vmem [shape: f32[1,1024], index: 2, kind: input, shape index: {}]   ;;  %s12340_s3 = inlined_call_operand.vmem [shape: bf16[3,1024,64], index: 3, kind: input, shape index: {}]   ;;  %s12341_s4 = inlined_call_operand.vmem [shape: f32[1,64], index: 4, kind: input, shape index: {}]   ;;  %s12342_s5 = inlined_call_operand.vmem [shape: bf16[3,64,64], index: 5, kind: input, shape index: {}]   ;;  %s12343_s6 = inlined_call_operand.vmem [shape: f32[1,64], index: 6, kind: input, shape index: {}]   ;;  %s12344_s7 = inlined_call_operand.vmem [shape: f32[2,16,64], index: 7, kind: output, shape index: {}]  }
   0x1 LB: > { %s7753_s25 = sadd.s32 4294967295, %s10032_s24   ;;  %p7757_p0 = scmp.ge.s32.totalorder %s10032_s24, 1  ;;  %s10032_s24 = sphi %s10077_s24, %s17_s24  }
   0x2   : > { %p237_p1 = scmp.lt.s32.totalorder %s10032_s24, 3 }
   0x4   : > { %p238_p2 = pnand %p7757_p0, %p237_p1 }
   0x5   : > { %p10094_p3 = scmp.lt.s32.totalorder (!%p238_p2), %s7753_s25, 1 }
   0x6   : > { %241 = sbr.rel (%p238_p2) target bundleno = 1602 (0x642), region = 48 }
   0xb   : > { %v7786_v0 = vld [vmem:[%s12338_s1 + $0x1c0] sm:$0xff]  ;;  %v7787_v2 = vld [vmem:[%s12338_s1 + $0x1c8] sm:$0xff]  ;;  %v10034_v8 = vmov 0   ;;  %vm280_vm0 = vcmask 516096   ;;  %s12360_s25 = smov (!%p10094_p3, %s7753_s25), 1  ;;  %v12345_v15 = vmov 0.0  }
   0xc   : > { %v7790_v1 = vld [vmem:[%s12338_s1 + $0x1e0] sm:$0xff]  ;;  %v7791_v4 = vld [vmem:[%s12338_s1 + $0x1e8] sm:$0xff]  ;;  %559 = vmatprep.mubr.bf16.mxu0 %v10034_v8  ;;  %602 = vmatprep.mubr.bf16.mxu1 %v10034_v8  ;;  %281 = vst.msk [vmem:[#allocation2] sm:$0x1] %vm280_vm0, %v12345_v15  ;;  %282 = vst.msk [vmem:[#allocation2 + $0x11] sm:$0x1] %vm280_vm0, %v12345_v15 }
   0xd   : > { %v7819_v3 = vcombine.high %v7786_v0, %v7790_v1  ;;  %v7818_v5 = vcombine.low %v7786_v0, %v7790_v1  ;;  %v7778_v6 = vld [vmem:[%s12338_s1 + $0x180] sm:$0xff]  ;;  %v7821_v9 = vcombine.high %v7787_v2, %v7791_v4  ;;  %v7820_v10 = vcombine.low %v7787_v2, %v7791_v4  ;;  %v7779_v12 = vld [vmem:[%s12338_s1 + $0x188] sm:$0xff]  ;;  %283 = vst [vmem:[#allocation3] ss:$8 sm:$0xf] %v12345_v15  ;;  %s9038_s30 = sshll.u32 %s12360_s25, 4 }
   0xe   : > { %v7782_v7 = vld [vmem:[%s12338_s1 + $0x1a0] sm:$0xff]  ;;  %v7783_v13 = vld [vmem:[%s12338_s1 + $0x1a8] sm:$0xff]  ;;  %284 = vst [vmem:[#allocation3] ss:$8 sm:$0xf0] %v12345_v15  ;;  %vm290_vm1 = vcmask 523264   ;;  %s273_s12 = scalar_lea.vmem %s12337_s0, %s9038_s30  ;;  %s278_s15 = scalar_lea.vmem %s12344_s7, %s9038_s30 }
   0xf   : > { %v7811_v11 = vcombine.high %v7778_v6, %v7782_v7  ;;  %v7770_v14 = vld [vmem:[%s12338_s1 + $0x140] sm:$0xff]  ;;  %286 = vst [vmem:[#allocation3 + $0x81] ss:$8 sm:$0xf] %v12345_v15  ;;  %535 = vmatprep.subr.bf16.mxu0 %v7819_v3  ;;  %v7813_v16 = vcombine.high %v7779_v12, %v7783_v13  ;;  %v7771_v18 = vld [vmem:[%s12338_s1 + $0x148] sm:$0xff]  ;;  %578 = vmatprep.subr.bf16.mxu1 %v7821_v9  ;;  %v7788_v34 = vld [vmem:[%s12338_s1 + $0x1d0] sm:$0xff] }
  0x10   : > { %287 = vst [vmem:[#allocation3 + $0x81] ss:$8 sm:$0xf0] %v12345_v15  ;;  %v7774_v17 = vld [vmem:[%s12338_s1 + $0x160] sm:$0xff]  ;;  %v7775_v19 = vld [vmem:[%s12338_s1 + $0x168] sm:$0xff]  ;;  %536 = vmatpush1.bf16.msra.mxu0 %v7818_v5  ;;  %v7810_v20 = vcombine.low %v7778_v6, %v7782_v7  ;;  %579 = vmatpush1.bf16.msra.mxu1 %v7820_v10  ;;  %v7812_v21 = vcombine.low %v7779_v12, %v7783_v13  ;;  %v7792_v35 = vld [vmem:[%s12338_s1 + $0x1f0] sm:$0xff] }
  0x11   : > { %537 = vmatprep.subr.bf16.mxu0 %v7811_v11  ;;  %v7803_v22 = vcombine.high %v7770_v14, %v7774_v17  ;;  %v7762_v23 = vld [vmem:[%s12338_s1 + $0x100] sm:$0xff]  ;;  %580 = vmatprep.subr.bf16.mxu1 %v7813_v16  ;;  %v7805_v24 = vcombine.high %v7771_v18, %v7775_v19  ;;  %v10151_v27 = vld [vmem:[%s273_s12 + $0x8] sm:$0xff]  ;;  %v7802_v30 = vcombine.low %v7770_v14, %v7774_v17  ;;  %v7789_v36 = vld [vmem:[%s12338_s1 + $0x1d8] sm:$0xff]  ;;  %vm1511_vm2 = vcmask 1040384  }
  0x12   : > { %v7766_v25 = vld [vmem:[%s12338_s1 + $0x120] sm:$0xff]  ;;  %v7763_v28 = vld [vmem:[%s12338_s1 + $0x108] sm:$0xff]  ;;  %292 = vst.msk [vmem:[#allocation2 + $0x9] sm:$0xff] %vm290_vm1, %v10151_v27  ;;  %v7804_v31 = vcombine.low %v7771_v18, %v7775_v19  ;;  %v7793_v37 = vld [vmem:[%s12338_s1 + $0x1f8] sm:$0xff]  ;;  %v7823_v40 = vcombine.high %v7788_v34, %v7792_v35  ;;  %v7822_v49 = vcombine.low %v7788_v34, %v7792_v35  ;;  %vm1897_vm3 = vsmask.f32 7424 }
  0x13   : > { %v10149_v26 = vld [vmem:[%s273_s12] sm:$0xff]  ;;  %v7767_v29 = vld [vmem:[%s12338_s1 + $0x128] sm:$0xff]  ;;  %v7795_v32 = vcombine.high %v7762_v23, %v7766_v25  ;;  %v7794_v38 = vcombine.low %v7762_v23, %v7766_v25  ;;  %v7780_v41 = vld [vmem:[%s12338_s1 + $0x190] sm:$0xff]  ;;  %v7825_v44 = vcombine.high %v7789_v36, %v7793_v37  ;;  %v7824_v50 = vcombine.low %v7789_v36, %v7793_v37 }
  0x14   : > { %291 = vst.msk [vmem:[#allocation2 + $0x1] sm:$0xff] %vm290_vm1, %v10149_v26  ;;  %538 = vmatpush1.bf16.msra.mxu0 %v7810_v20  ;;  %581 = vmatpush1.bf16.msra.mxu1 %v7812_v21  ;;  %v7797_v33 = vcombine.high %v7763_v28, %v7767_v29  ;;  %v7796_v39 = vcombine.low %v7763_v28, %v7767_v29  ;;  %v7784_v45 = vld [vmem:[%s12338_s1 + $0x1b0] sm:$0xff]  ;;  %v7781_v47 = vld [vmem:[%s12338_s1 + $0x198] sm:$0xff]  ;;  %v320_v5 = vld [vmem:[%s12338_s1 + $0xc0] sm:$0xff]  ;;  %vm3275_vm4 = vcmask 1046528   ;;  %vm10036_vm5 = vmmov 0  }
  0x15   : > { %539 = vmatprep.subr.bf16.mxu0 %v7803_v22  ;;  %582 = vmatprep.subr.bf16.mxu1 %v7805_v24  ;;  %v7785_v48 = vld [vmem:[%s12338_s1 + $0x1b8] sm:$0xff]  ;;  %v7815_v51 = vcombine.high %v7780_v41, %v7784_v45  ;;  %v7772_v53 = vld [vmem:[%s12338_s1 + $0x150] sm:$0xff]  ;;  %v7814_v57 = vcombine.low %v7780_v41, %v7784_v45  ;;  %v324_v6 = vld [vmem:[%s12338_s1 + $0xe0] sm:$0xff] }
  0x16   : > { %v7817_v52 = vcombine.high %v7781_v47, %v7785_v48  ;;  %v7776_v54 = vld [vmem:[%s12338_s1 + $0x170] sm:$0xff]  ;;  %v7773_v55 = vld [vmem:[%s12338_s1 + $0x158] sm:$0xff]  ;;  %v7816_v58 = vcombine.low %v7781_v47, %v7785_v48  ;;  %v321_v7 = vld [vmem:[%s12338_s1 + $0xc8] sm:$0xff]  ;;  %v7855_v12 = vcombine.high %v320_v5, %v324_v6  ;;  %v7854_v19 = vcombine.low %v320_v5, %v324_v6 }
  0x17   : > { %v7777_v56 = vld [vmem:[%s12338_s1 + $0x178] sm:$0xff]  ;;  %v7807_v59 = vcombine.high %v7772_v53, %v7776_v54  ;;  %v7764_v61 = vld [vmem:[%s12338_s1 + $0x110] sm:$0xff]  ;;  %v7806_v1 = vcombine.low %v7772_v53, %v7776_v54  ;;  %v325_v9 = vld [vmem:[%s12338_s1 + $0xe8] sm:$0xff] }
  0x18   : > { %540 = vmatpush1.bf16.msra.mxu0 %v7802_v30  ;;  %583 = vmatpush1.bf16.msra.mxu1 %v7804_v31  ;;  %v7809_v60 = vcombine.high %v7773_v55, %v7777_v56  ;;  %v7768_v62 = vld [vmem:[%s12338_s1 + $0x130] sm:$0xff]  ;;  %v7765_v63 = vld [vmem:[%s12338_s1 + $0x118] sm:$0xff]  ;;  %v7808_v2 = vcombine.low %v7773_v55, %v7777_v56  ;;  %v7857_v13 = vcombine.high %v321_v7, %v325_v9  ;;  %v312_v14 = vld [vmem:[%s12338_s1 + $0x80] sm:$0xff] }
  0x19   : > { %541 = vmatprep.subr.bf16.mxu0 %v7795_v32  ;;  %584 = vmatprep.subr.bf16.mxu1 %v7797_v33  ;;  %v329_v43 = vld [vmem:[#allocation2 + $0x9] sm:$0xff]  ;;  %v7769_v0 = vld [vmem:[%s12338_s1 + $0x138] sm:$0xff]  ;;  %v7799_v3 = vcombine.high %v7764_v61, %v7768_v62  ;;  %v7798_v10 = vcombine.low %v7764_v61, %v7768_v62  ;;  %v316_v16 = vld [vmem:[%s12338_s1 + $0xa0] sm:$0xff]  ;;  %v7856_v20 = vcombine.low %v321_v7, %v325_v9 }
  0x1a   : > { %v7801_v4 = vcombine.high %v7765_v63, %v7769_v0  ;;  %v7800_v11 = vcombine.low %v7765_v63, %v7769_v0  ;;  %v313_v17 = vld [vmem:[%s12338_s1 + $0x88] sm:$0xff]  ;;  %v7847_v21 = vcombine.high %v312_v14, %v316_v16  ;;  %v304_v22 = vld [vmem:[%s12338_s1 + $0x40] sm:$0xff]  ;;  %v7846_v29 = vcombine.low %v312_v14, %v316_v16  ;;  %v314_v48 = vld [vmem:[%s12338_s1 + $0x90] sm:$0xff] }
  0x1b   : > { %v328_v42 = vld [vmem:[#allocation2 + $0x1] sm:$0xff]  ;;  %v319_v53 = vld [vmem:[%s12338_s1 + $0xb8] sm:$0xff] }
  0x1c   : > { %v10181_v46 = vpack.c.bf16 %v329_v43, %v328_v42  ;;  %542 = vmatpush1.bf16.msra.mxu0 %v7794_v38  ;;  %585 = vmatpush1.bf16.msra.mxu1 %v7796_v39  ;;  %v317_v18 = vld [vmem:[%s12338_s1 + $0xa8] sm:$0xff]  ;;  %v308_v23 = vld [vmem:[%s12338_s1 + $0x60] sm:$0xff]  ;;  %v322_v38 = vld [vmem:[%s12338_s1 + $0xd0] sm:$0xff] }
  0x1d   : > { %621 = vmatprep.subr.bf16.mxu0 %v7823_v40  ;;  %664 = vmatprep.subr.bf16.mxu1 %v7825_v44  ;;  %v7849_v24 = vcombine.high %v313_v17, %v317_v18  ;;  %v305_v25 = vld [vmem:[%s12338_s1 + $0x48] sm:$0xff]  ;;  %v296_v30 = vld [vmem:[%s12338_s1] sm:$0xff]  ;;  %v7848_v32 = vcombine.low %v313_v17, %v317_v18  ;;  %v7839_v33 = vcombine.high %v304_v22, %v308_v23  ;;  %v326_v39 = vld [vmem:[%s12338_s1 + $0xf0] sm:$0xff] }
  0x1e   : > { %v309_v28 = vld [vmem:[%s12338_s1 + $0x68] sm:$0xff]  ;;  %v300_v31 = vld [vmem:[%s12338_s1 + $0x20] sm:$0xff]  ;;  %v7838_v37 = vcombine.low %v304_v22, %v308_v23  ;;  %v323_v42 = vld [vmem:[%s12338_s1 + $0xd8] sm:$0xff]  ;;  %v7858_v56 = vcombine.low %v322_v38, %v326_v39 }
  0x1f   : > { %7826 = vmatmul.mubr.msk.bf16.vlgmr.msra.gmra.mxu0 %vm290_vm1, %v10181_v46  ;;  %7827 = vmatmul.mubr.msk.bf16.vlgmr.msra.gmra.mxu1 %vm290_vm1, %v10181_v46  ;;  %v297_v34 = vld [vmem:[%s12338_s1 + $0x8] sm:$0xff]  ;;  %v7841_v36 = vcombine.high %v305_v25, %v309_v28  ;;  %v7840_v40 = vcombine.low %v305_v25, %v309_v28  ;;  %v7831_v41 = vcombine.high %v296_v30, %v300_v31  ;;  %v327_v43 = vld [vmem:[%s12338_s1 + $0xf8] sm:$0xff]  ;;  %v293_v45 = vld [vmem:[#allocation2] sm:$0xff] }
  0x20   : > { %622 = vmatpush1.bf16.msra.mxu0 %v7822_v49  ;;  %665 = vmatpush1.bf16.msra.mxu1 %v7824_v50  ;;  %v301_v35 = vld [vmem:[%s12338_s1 + $0x28] sm:$0xff]  ;;  %v7830_v47 = vcombine.low %v296_v30, %v300_v31  ;;  %v318_v49 = vld [vmem:[%s12338_s1 + $0xb0] sm:$0xff]  ;;  %v7861_v54 = vcombine.high %v323_v42, %v327_v43  ;;  %v307_v61 = vld [vmem:[%s12338_s1 + $0x58] sm:$0xff] }
  0x21   : > { %623 = vmatprep.subr.bf16.mxu0 %v7815_v51  ;;  %666 = vmatprep.subr.bf16.mxu1 %v7817_v52  ;;  %v7833_v44 = vcombine.high %v297_v34, %v301_v35  ;;  %v7832_v50 = vcombine.low %v297_v34, %v301_v35  ;;  %v7859_v51 = vcombine.high %v322_v38, %v326_v39  ;;  %v315_v52 = vld [vmem:[%s12338_s1 + $0x98] sm:$0xff]  ;;  %v7891_v14 = vld [vmem:[%s12338_s1 + $0x2c8] sm:$0xff]  ;;  %v7878_v30 = vld [vmem:[%s12338_s1 + $0x260] sm:$0xff] }
  0x22   : > { %645 = vmatprep.mubr.bf16.mxu0 %v10034_v8  ;;  %688 = vmatprep.mubr.bf16.mxu1 %v10034_v8  ;;  %v311_v62 = vld [vmem:[%s12338_s1 + $0x78] sm:$0xff]  ;;  %v7853_v63 = vcombine.high %v315_v52, %v319_v53  ;;  %v7850_v0 = vcombine.low %v314_v48, %v318_v49  ;;  %v7895_v16 = vld [vmem:[%s12338_s1 + $0x2e8] sm:$0xff]  ;;  %v7870_v38 = vld [vmem:[%s12338_s1 + $0x220] sm:$0xff] }
  0x23   : > { %v299_v5 = vld [vmem:[%s12338_s1 + $0x18] sm:$0xff]  ;;  %v7845_v7 = vcombine.high %v307_v61, %v311_v62  ;;  %v7883_v23 = vld [vmem:[%s12338_s1 + $0x288] sm:$0xff]  ;;  %v7925_v25 = vcombine.high %v7891_v14, %v7895_v16  ;;  %v7924_v31 = vcombine.low %v7891_v14, %v7895_v16 }
  0x24   : > { %624 = vmatpush1.bf16.msra.mxu0 %v7814_v57  ;;  %667 = vmatpush1.bf16.msra.mxu1 %v7816_v58  ;;  %v306_v57 = vld [vmem:[%s12338_s1 + $0x50] sm:$0xff]  ;;  %v303_v6 = vld [vmem:[%s12338_s1 + $0x38] sm:$0xff]  ;;  %v7879_v34 = vld [vmem:[%s12338_s1 + $0x268] sm:$0xff] }
  0x25   : > { %625 = vmatprep.subr.bf16.mxu0 %v7807_v59  ;;  %668 = vmatprep.subr.bf16.mxu1 %v7809_v60  ;;  %v310_v58 = vld [vmem:[%s12338_s1 + $0x70] sm:$0xff]  ;;  %v7860_v59 = vcombine.low %v323_v42, %v327_v43  ;;  %v7851_v60 = vcombine.high %v314_v48, %v318_v49  ;;  %v7837_v17 = vcombine.high %v299_v5, %v303_v6  ;;  %v7871_v42 = vld [vmem:[%s12338_s1 + $0x228] sm:$0xff]  ;;  %v7893_v49 = vld [vmem:[%s12338_s1 + $0x2d8] sm:$0xff] }
  0x26   : > { %v7842_v9 = vcombine.low %v306_v57, %v310_v58  ;;  %v7873_v14 = vld [vmem:[%s12338_s1 + $0x238] sm:$0xff] }
  0x28   : > { %626 = vmatpush1.bf16.msra.mxu0 %v7806_v1  ;;  %669 = vmatpush1.bf16.msra.mxu1 %v7808_v2  ;;  %v298_v1 = vld [vmem:[%s12338_s1 + $0x10] sm:$0xff] }
  0x29   : > { %627 = vmatprep.subr.bf16.mxu0 %v7799_v3  ;;  %670 = vmatprep.subr.bf16.mxu1 %v7801_v4  ;;  %v302_v2 = vld [vmem:[%s12338_s1 + $0x30] sm:$0xff]  ;;  %v7852_v3 = vcombine.low %v315_v52, %v319_v53  ;;  %v7843_v4 = vcombine.high %v306_v57, %v310_v58  ;;  %v1034_v52 = vld [vmem:[#allocation2 + $0x2] sm:$0xff] }
  0x2a   : > { %v7834_v18 = vcombine.low %v298_v1, %v302_v2  ;;  %v1035_v53 = vld [vmem:[#allocation2 + $0xa] sm:$0xff] }
  0x2c   : > { %628 = vmatpush1.bf16.msra.mxu0 %v7798_v10  ;;  %671 = vmatpush1.bf16.msra.mxu1 %v7800_v11  ;;  %v7890_v10 = vld [vmem:[%s12338_s1 + $0x2c0] sm:$0xff] }
  0x2d   : > { %870 = vmatprep.subr.bf16.mxu0 %v7855_v12  ;;  %913 = vmatprep.subr.bf16.mxu1 %v7857_v13  ;;  %v7894_v11 = vld [vmem:[%s12338_s1 + $0x2e0] sm:$0xff]  ;;  %v7844_v12 = vcombine.low %v307_v61, %v311_v62  ;;  %v7835_v13 = vcombine.high %v298_v1, %v302_v2  ;;  %v1036_v62 = vpack.c.bf16 %v1035_v53, %v1034_v52  ;;  %v7880_v1 = vld [vmem:[%s12338_s1 + $0x270] sm:$0xff]  ;;  %v9657_v52 = vld [vmem:[%s12340_s3 + $0x288] sm:$0xff]  }
  0x2e   : > { %v7923_v22 = vcombine.high %v7890_v10, %v7894_v11  ;;  %v7922_v28 = vcombine.low %v7890_v10, %v7894_v11  ;;  %v7872_v10 = vld [vmem:[%s12338_s1 + $0x230] sm:$0xff]  ;;  %v9658_v53 = vld [vmem:[%s12340_s3 + $0x240] sm:$0xff]  }
  0x2f   : > { %7828 = vmatmul.mubr.msk.bf16.vlgmr.msra.gmra.mxu0 %vm290_vm1, %v10181_v46  ;;  %7829 = vmatmul.mubr.msk.bf16.vlgmr.msra.gmra.mxu1 %vm290_vm1, %v10181_v46  ;;  %v294_v46 = vld [vmem:[#allocation2 + $0x8] sm:$0xff] }
  0x30   : > { %871 = vmatpush1.bf16.msra.mxu0 %v7854_v19  ;;  %914 = vmatpush1.bf16.msra.mxu1 %v7856_v20  ;;  %v10297_v55 = vpack.c.bf16 %v294_v46, %v293_v45  ;;  %v7882_v19 = vld [vmem:[%s12338_s1 + $0x280] sm:$0xff]  ;;  %v7892_v45 = vld [vmem:[%s12338_s1 + $0x2d0] sm:$0xff] }
  0x31   : > { %872 = vmatprep.subr.bf16.mxu0 %v7847_v21  ;;  %915 = vmatprep.subr.bf16.mxu1 %v7849_v24  ;;  %v7886_v20 = vld [vmem:[%s12338_s1 + $0x2a0] sm:$0xff]  ;;  %v7836_v21 = vcombine.low %v299_v5, %v303_v6  ;;  %v7887_v24 = vld [vmem:[%s12338_s1 + $0x2a8] sm:$0xff]  ;;  %v7896_v46 = vld [vmem:[%s12338_s1 + $0x2f0] sm:$0xff] }
  0x32   : > { %894 = vmatprep.mubr.bf16.mxu0 %v10034_v8  ;;  %937 = vmatprep.mubr.bf16.mxu1 %v10034_v8  ;;  %v7917_v35 = vcombine.high %v7883_v23, %v7887_v24  ;;  %v7916_v39 = vcombine.low %v7883_v23, %v7887_v24  ;;  %v7927_v58 = vcombine.high %v7892_v45, %v7896_v46  ;;  %v7881_v5 = vld [vmem:[%s12338_s1 + $0x278] sm:$0xff] }
  0x33   : > { %v9630_v23 = vld [vmem:[%s12340_s3 + $0x278] sm:$0xff]  }
  0x34   : > { %873 = vmatpush1.bf16.msra.mxu0 %v7846_v29  ;;  %916 = vmatpush1.bf16.msra.mxu1 %v7848_v32  ;;  %v7874_v29 = vld [vmem:[%s12338_s1 + $0x240] sm:$0xff]  ;;  %v7915_v32 = vcombine.high %v7882_v19, %v7886_v20  ;;  %v9631_v24 = vld [vmem:[%s12340_s3 + $0x2f8] sm:$0xff]  }
  0x35   : > { %874 = vmatprep.subr.bf16.mxu0 %v7839_v33  ;;  %917 = vmatprep.subr.bf16.mxu1 %v7841_v36  ;;  %v7875_v33 = vld [vmem:[%s12338_s1 + $0x248] sm:$0xff]  ;;  %v7914_v36 = vcombine.low %v7882_v19, %v7886_v20 }
  0x36   : > { %v7909_v43 = vcombine.high %v7875_v33, %v7879_v34 }
  0x38   : > { %875 = vmatpush1.bf16.msra.mxu0 %v7838_v37  ;;  %918 = vmatpush1.bf16.msra.mxu1 %v7840_v40  ;;  %v7866_v37 = vld [vmem:[%s12338_s1 + $0x200] sm:$0xff]  ;;  %v7907_v40 = vcombine.high %v7874_v29, %v7878_v30 }
  0x39   : > { %876 = vmatprep.subr.bf16.mxu0 %v7831_v41  ;;  %919 = vmatprep.subr.bf16.mxu1 %v7833_v44  ;;  %v7867_v41 = vld [vmem:[%s12338_s1 + $0x208] sm:$0xff]  ;;  %v7906_v44 = vcombine.low %v7874_v29, %v7878_v30  ;;  %v7899_v48 = vcombine.high %v7866_v37, %v7870_v38  ;;  %v9634_v29 = vld [vmem:[%s12340_s3 + $0x270] sm:$0xff]  }
  0x3a   : > { %v7900_v57 = vcombine.low %v7867_v41, %v7871_v42  ;;  %v9635_v30 = vld [vmem:[%s12340_s3 + $0x2f0] sm:$0xff]  }
  0x3c   : > { %877 = vmatpush1.bf16.msra.mxu0 %v7830_v47  ;;  %920 = vmatpush1.bf16.msra.mxu1 %v7832_v50  ;;  %v7908_v47 = vcombine.low %v7875_v33, %v7879_v34  ;;  %v7897_v50 = vld [vmem:[%s12338_s1 + $0x2f8] sm:$0xff]  ;;  %v9638_v33 = vld [vmem:[%s12340_s3 + $0x268] sm:$0xff]  }
  0x3d   : > { %956 = vmatprep.subr.bf16.mxu0 %v7859_v51  ;;  %999 = vmatprep.subr.bf16.mxu1 %v7861_v54  ;;  %v7901_v51 = vcombine.high %v7867_v41, %v7871_v42  ;;  %v7898_v54 = vcombine.low %v7866_v37, %v7870_v38  ;;  %v7929_v61 = vcombine.high %v7893_v49, %v7897_v50  ;;  %v9639_v34 = vld [vmem:[%s12340_s3 + $0x2e8] sm:$0xff]   ;;  %v9642_v37 = vld [vmem:[%s12340_s3 + $0x260] sm:$0xff]   ;;  %v9646_v41 = vld [vmem:[%s12340_s3 + $0x258] sm:$0xff]  }
  0x3e   : > { %v7928_v2 = vcombine.low %v7893_v49, %v7897_v50  ;;  %v9643_v38 = vld [vmem:[%s12340_s3 + $0x2e0] sm:$0xff]   ;;  %v9647_v42 = vld [vmem:[%s12340_s3 + $0x2d8] sm:$0xff]   ;;  %v9654_v49 = vld [vmem:[%s12340_s3 + $0x248] sm:$0xff]  }
  0x3f   : > { %7862 = vmatmul.mubr.msk.bf16.vlgmr.msra.gmra.mxu0 %vm290_vm1, %v10297_v55  ;;  %7863 = vmatmul.mubr.msk.bf16.vlgmr.msra.gmra.mxu1 %vm290_vm1, %v10297_v55  ;;  %v9655_v50 = vld [vmem:[%s12340_s3 + $0x2c8] sm:$0xff]  }
  0x40   : > { %957 = vmatpush1.bf16.msra.mxu0 %v7858_v56  ;;  %1000 = vmatpush1.bf16.msra.mxu1 %v7860_v59  ;;  %v7888_v56 = vld [vmem:[%s12338_s1 + $0x2b0] sm:$0xff]  ;;  %v7885_v59 = vld [vmem:[%s12338_s1 + $0x298] sm:$0xff] }
  0x41   : > { %958 = vmatprep.subr.bf16.mxu0 %v7851_v60  ;;  %1001 = vmatprep.subr.bf16.mxu1 %v7853_v63  ;;  %v7889_v60 = vld [vmem:[%s12338_s1 + $0x2b8] sm:$0xff]  ;;  %v7926_v63 = vcombine.low %v7892_v45, %v7896_v46  ;;  %v9650_v45 = vld [vmem:[%s12340_s3 + $0x250] sm:$0xff]  }
  0x42   : > { %980 = vmatprep.mubr.bf16.mxu0 %v10034_v8  ;;  %1023 = vmatprep.mubr.bf16.mxu1 %v10034_v8  ;;  %v7921_v6 = vcombine.high %v7885_v59, %v7889_v60  ;;  %v7920_v11 = vcombine.low %v7885_v59, %v7889_v60  ;;  %v9651_v46 = vld [vmem:[%s12340_s3 + $0x2d0] sm:$0xff]  }
  0x44   : > { %959 = vmatpush1.bf16.msra.mxu0 %v7850_v0  ;;  %1002 = vmatpush1.bf16.msra.mxu1 %v7852_v3  ;;  %v7876_v0 = vld [vmem:[%s12338_s1 + $0x250] sm:$0xff] }
  0x45   : > { %960 = vmatprep.subr.bf16.mxu0 %v7843_v4  ;;  %1003 = vmatprep.subr.bf16.mxu1 %v7845_v7  ;;  %v7877_v4 = vld [vmem:[%s12338_s1 + $0x258] sm:$0xff] }
  0x46   : > { %v7913_v16 = vcombine.high %v7877_v4, %v7881_v5 }
  0x48   : > { %961 = vmatpush1.bf16.msra.mxu0 %v7842_v9  ;;  %1004 = vmatpush1.bf16.msra.mxu1 %v7844_v12  ;;  %v7868_v9 = vld [vmem:[%s12338_s1 + $0x210] sm:$0xff]  ;;  %v7911_v12 = vcombine.high %v7876_v0, %v7880_v1 }
  0x49   : > { %962 = vmatprep.subr.bf16.mxu0 %v7835_v13  ;;  %1005 = vmatprep.subr.bf16.mxu1 %v7837_v17  ;;  %v7869_v13 = vld [vmem:[%s12338_s1 + $0x218] sm:$0xff]  ;;  %v7910_v17 = vcombine.low %v7876_v0, %v7880_v1  ;;  %v7903_v19 = vcombine.high %v7868_v9, %v7872_v10 }
  0x4a   : > { %v7905_v20 = vcombine.high %v7869_v13, %v7873_v14 }
  0x4c   : > { %963 = vmatpush1.bf16.msra.mxu0 %v7834_v18  ;;  %1006 = vmatpush1.bf16.msra.mxu1 %v7836_v21  ;;  %v7912_v18 = vcombine.low %v7877_v4, %v7881_v5  ;;  %v7902_v21 = vcombine.low %v7868_v9, %v7872_v10 }
  0x4d   : > { %1241 = vmatprep.subr.bf16.mxu0 %v7923_v22  ;;  %1284 = vmatprep.subr.bf16.mxu1 %v7925_v25  ;;  %v7904_v22 = vcombine.low %v7869_v13, %v7873_v14  ;;  %v9632_v25 = vld [vmem:[%s12340_s3 + $0x238] sm:$0xff]  }
  0x4f   : > { %7864 = vmatmul.mubr.msk.bf16.vlgmr.msra.gmra.mxu0 %vm290_vm1, %v10297_v55  ;;  %7865 = vmatmul.mubr.msk.bf16.vlgmr.msra.gmra.mxu1 %vm290_vm1, %v10297_v55  ;;  %v7884_v55 = vld [vmem:[%s12338_s1 + $0x290] sm:$0xff] }
  0x50   : > { %1242 = vmatpush1.bf16.msra.mxu0 %v7922_v28  ;;  %1285 = vmatpush1.bf16.msra.mxu1 %v7924_v31  ;;  %v7919_v3 = vcombine.high %v7884_v55, %v7888_v56  ;;  %v7918_v7 = vcombine.low %v7884_v55, %v7888_v56  ;;  %v9633_v28 = vld [vmem:[%s12340_s3 + $0x2b8] sm:$0xff]   ;;  %v9636_v31 = vld [vmem:[%s12340_s3 + $0x230] sm:$0xff]   ;;  %v9660_v55 = vld [vmem:[%s12340_s3 + $0x200] sm:$0xff]  }
  0x51   : > { %1243 = vmatprep.subr.bf16.mxu0 %v7915_v32  ;;  %1286 = vmatprep.subr.bf16.mxu1 %v7917_v35  ;;  %v9637_v32 = vld [vmem:[%s12340_s3 + $0x2b0] sm:$0xff]   ;;  %v9640_v35 = vld [vmem:[%s12340_s3 + $0x228] sm:$0xff]   ;;  %v9661_v56 = vld [vmem:[%s12340_s3 + $0x280] sm:$0xff]  }
  0x52   : > { %1265 = vmatprep.mubr.bf16.mxu0 %v10034_v8  ;;  %1308 = vmatprep.mubr.bf16.mxu1 %v10034_v8 }
  0x54   : > { %1244 = vmatpush1.bf16.msra.mxu0 %v7914_v36  ;;  %1287 = vmatpush1.bf16.msra.mxu1 %v7916_v39  ;;  %v9641_v36 = vld [vmem:[%s12340_s3 + $0x2a8] sm:$0xff]   ;;  %v9644_v39 = vld [vmem:[%s12340_s3 + $0x220] sm:$0xff]  }
  0x55   : > { %1245 = vmatprep.subr.bf16.mxu0 %v7907_v40  ;;  %1288 = vmatprep.subr.bf16.mxu1 %v7909_v43  ;;  %v9645_v40 = vld [vmem:[%s12340_s3 + $0x2a0] sm:$0xff]   ;;  %v9648_v43 = vld [vmem:[%s12340_s3 + $0x218] sm:$0xff]  }
  0x58   : > { %1246 = vmatpush1.bf16.msra.mxu0 %v7906_v44  ;;  %1289 = vmatpush1.bf16.msra.mxu1 %v7908_v47  ;;  %v9649_v44 = vld [vmem:[%s12340_s3 + $0x298] sm:$0xff]   ;;  %v9652_v47 = vld [vmem:[%s12340_s3 + $0x210] sm:$0xff]  }
  0x59   : > { %1247 = vmatprep.subr.bf16.mxu0 %v7899_v48  ;;  %1290 = vmatprep.subr.bf16.mxu1 %v7901_v51  ;;  %v9653_v48 = vld [vmem:[%s12340_s3 + $0x290] sm:$0xff]   ;;  %v9656_v51 = vld [vmem:[%s12340_s3 + $0x208] sm:$0xff]  }
  0x5c   : > { %1248 = vmatpush1.bf16.msra.mxu0 %v7898_v54  ;;  %1291 = vmatpush1.bf16.msra.mxu1 %v7900_v57  ;;  %v9659_v54 = vld [vmem:[%s12340_s3 + $0x2c0] sm:$0xff]   ;;  %v9662_v57 = vld [vmem:[%s12340_s3 + $0x378] sm:$0xff]  }
  0x5d   : > { %1327 = vmatprep.subr.bf16.mxu0 %v7927_v58  ;;  %1370 = vmatprep.subr.bf16.mxu1 %v7929_v61  ;;  %v9663_v58 = vld [vmem:[%s12340_s3 + $0x3f8] sm:$0xff]  }
  0x5f   : > { %7930 = vmatmul.mubr.msk.bf16.vlgmr.msra.gmra.mxu0 %vm290_vm1, %v1036_v62  ;;  %7931 = vmatmul.mubr.msk.bf16.vlgmr.msra.gmra.mxu1 %vm290_vm1, %v1036_v62 }
  0x60   : > { %1328 = vmatpush1.bf16.msra.mxu0 %v7926_v63  ;;  %1371 = vmatpush1.bf16.msra.mxu1 %v7928_v2 }
  0x61   : > { %1329 = vmatprep.subr.bf16.mxu0 %v7919_v3  ;;  %1372 = vmatprep.subr.bf16.mxu1 %v7921_v6 }
  0x62   : > { %1351 = vmatprep.mubr.bf16.mxu0 %v10034_v8  ;;  %1394 = vmatprep.mubr.bf16.mxu1 %v10034_v8 }
  0x64   : > { %1330 = vmatpush1.bf16.msra.mxu0 %v7918_v7  ;;  %1373 = vmatpush1.bf16.msra.mxu1 %v7920_v11 }
  0x65   : > { %1331 = vmatprep.subr.bf16.mxu0 %v7911_v12  ;;  %1374 = vmatprep.subr.bf16.mxu1 %v7913_v16 }
  0x68   : > { %1332 = vmatpush1.bf16.msra.mxu0 %v7910_v17  ;;  %1375 = vmatpush1.bf16.msra.mxu1 %v7912_v18 }
  0x69   : > { %1333 = vmatprep.subr.bf16.mxu0 %v7903_v19  ;;  %1376 = vmatprep.subr.bf16.mxu1 %v7905_v20 }
  0x6c   : > { %1334 = vmatpush1.bf16.msra.mxu0 %v7902_v21  ;;  %1377 = vmatpush1.bf16.msra.mxu1 %v7904_v22  ;;  %v1423_v22 = vlaneseq }
  0x6d   : > { %9040 = vmatprep.subr.bf16.mxu0 %v9630_v23  ;;  %9062 = vmatprep.subr.bf16.mxu1 %v9631_v24 }
  0x6f   : > { %7932 = vmatmul.mubr.msk.bf16.vlgmr.msra.gmra.mxu0 %vm290_vm1, %v1036_v62  ;;  %7933 = vmatmul.mubr.msk.bf16.vlgmr.msra.gmra.mxu1 %vm290_vm1, %v1036_v62 }
  0x70   : > { %9041 = vmatpush3.bf16.msra.mxu0 %v9632_v25  ;;  %9063 = vmatpush3.bf16.msra.mxu1 %v9633_v28  ;;  %v10561_v25 = vshrl.u32 %v1423_v22, 7 }
  0x71   : > { %9042 = vmatprep.subr.bf16.mxu0 %v9634_v29  ;;  %9064 = vmatprep.subr.bf16.mxu1 %v9635_v30  ;;  %v10570_v30 = vld [vmem:[%s12339_s2] sm:$0xff] }
  0x74   : > { %9043 = vmatpush3.bf16.msra.mxu0 %v9636_v31  ;;  %9065 = vmatpush3.bf16.msra.mxu1 %v9637_v32  ;;  %v1425_v31 = vsub.s32 0, %v10561_v25  ;;  %v1433_v32 = vsub.s32 2, %v10561_v25 }
  0x75   : > { %9044 = vmatprep.subr.bf16.mxu0 %v9638_v33  ;;  %9066 = vmatprep.subr.bf16.mxu1 %v9639_v34  ;;  %v1429_v34 = vsub.s32 1, %v10561_v25 }
  0x78   : > { %9045 = vmatpush3.bf16.msra.mxu0 %v9640_v35  ;;  %9067 = vmatpush3.bf16.msra.mxu1 %v9641_v36  ;;  %v12351_v35 = vsub.s32 3, %v10561_v25 }
  0x79   : > { %9046 = vmatprep.subr.bf16.mxu0 %v9642_v37  ;;  %9068 = vmatprep.subr.bf16.mxu1 %v9643_v38 }
  0x7c   : > { %9047 = vmatpush3.bf16.msra.mxu0 %v9644_v39  ;;  %9069 = vmatpush3.bf16.msra.mxu1 %v9645_v40  ;;  %v1426_v39 = vrot.slane %v10570_v30, %v1425_v31 }
  0x7d   : > { %9048 = vmatprep.subr.bf16.mxu0 %v9646_v41  ;;  %9070 = vmatprep.subr.bf16.mxu1 %v9647_v42  ;;  %v1434_v42 = vrot.slane %v10570_v30, %v1433_v32 }
  0x80   : > { %9049 = vmatpush3.bf16.msra.mxu0 %v9648_v43  ;;  %9071 = vmatpush3.bf16.msra.mxu1 %v9649_v44 }
  0x81   : > { %9050 = vmatprep.subr.bf16.mxu0 %v9650_v45  ;;  %9072 = vmatprep.subr.bf16.mxu1 %v9651_v46  ;;  %v1430_v46 = vrot.slane %v10570_v30, %v1429_v34 }
  0x84   : > { %9051 = vmatpush3.bf16.msra.mxu0 %v9652_v47  ;;  %9073 = vmatpush3.bf16.msra.mxu1 %v9653_v48  ;;  %v1438_v47 = vrot.slane %v10570_v30, %v12351_v35 }
  0x85   : > { %9052 = vmatprep.subr.bf16.mxu0 %v9654_v49  ;;  %9074 = vmatprep.subr.bf16.mxu1 %v9655_v50 }
  0x88   : > { %9053 = vmatpush3.bf16.msra.mxu0 %v9656_v51  ;;  %9075 = vmatpush3.bf16.msra.mxu1 %v9657_v52  ;;  %v12350_v51 = vsub.s32 4, %v10561_v25  ;;  %v12349_v52 = vsub.s32 6, %v10561_v25 }
  0x89   : > { %9054 = vmatprep.subr.bf16.mxu0 %v9658_v53  ;;  %9076 = vmatprep.subr.bf16.mxu1 %v9659_v54 }
  0x8c   : > { %9055 = vmatpush3.bf16.msra.mxu0 %v9660_v55  ;;  %9077 = vmatpush3.bf16.msra.mxu1 %v9661_v56 }
  0x8d   : > { %9084 = vmatprep.subr.bf16.mxu0 %v9662_v57  ;;  %9106 = vmatprep.subr.bf16.mxu1 %v9663_v58 }
  0xdf   : > { %v561_v59 = vpop.f32.mrf.mxu0  ;;  %v604_v60 = vpop.f32.mrf.mxu1 }
  0xe1   : > { %v563_v61 = vpop.f32.mrf.mxu0  ;;  %v606_v62 = vpop.f32.mrf.mxu1 }
  0xe3   : > { %v565_v63 = vpop.f32.mrf.mxu0  ;;  %v608_v0 = vpop.f32.mrf.mxu1 }
  0xe5   : > { %v567_v1 = vpop.f32.mrf.mxu0  ;;  %v610_v2 = vpop.f32.mrf.mxu1 }
  0xef   : > { %v10539_v3 = vpop.f32.mrf.mxu0  ;;  %v10541_v4 = vpop.f32.mrf.mxu1 }
  0xf1   : > { %v10543_v5 = vpop.f32.mrf.mxu0  ;;  %v10545_v6 = vpop.f32.mrf.mxu1 }
  0xf3   : > { %v10547_v7 = vpop.f32.mrf.mxu0  ;;  %v10549_v9 = vpop.f32.mrf.mxu1 }
  0xf5   : > { %v10551_v10 = vpop.f32.mrf.mxu0  ;;  %v10553_v11 = vpop.f32.mrf.mxu1 }
  0xff   : > { %v896_v12 = vpop.f32.mrf.mxu0  ;;  %v939_v13 = vpop.f32.mrf.mxu1 }
 0x100   : > { %v897_v37 = vadd.f32 %v896_v12, %v561_v59  ;;  %v940_v40 = vadd.f32 %v939_v13, %v604_v60 }
 0x101   : > { %v898_v14 = vpop.f32.mrf.mxu0  ;;  %v941_v16 = vpop.f32.mrf.mxu1 }
 0x102   : > { %v899_v43 = vadd.f32 %v898_v14, %v563_v61  ;;  %v942_v48 = vadd.f32 %v941_v16, %v606_v62 }
 0x103   : > { %v900_v17 = vpop.f32.mrf.mxu0  ;;  %v943_v18 = vpop.f32.mrf.mxu1 }
 0x104   : > { %v901_v53 = vadd.f32 %v900_v17, %v565_v63  ;;  %v944_v57 = vadd.f32 %v943_v18, %v608_v0 }
 0x105   : > { %v902_v19 = vpop.f32.mrf.mxu0  ;;  %v945_v20 = vpop.f32.mrf.mxu1 }
 0x106   : > { %v903_v61 = vadd.f32 %v902_v19, %v567_v1  ;;  %v946_v62 = vadd.f32 %v945_v20, %v610_v2 }
 0x10f   : > { %v10555_v21 = vpop.f32.mrf.mxu0  ;;  %v10557_v23 = vpop.f32.mrf.mxu1 }
 0x111   : > { %v10559_v24 = vpop.f32.mrf.mxu0  ;;  %v10563_v28 = vpop.f32.mrf.mxu1 }
 0x113   : > { %v10565_v29 = vpop.f32.mrf.mxu0  ;;  %v10574_v33 = vpop.f32.mrf.mxu1 }
 0x115   : > { %v10578_v36 = vpop.f32.mrf.mxu0  ;;  %v10580_v38 = vpop.f32.mrf.mxu1 }
 0x11f   : > { %v1267_v41 = vpop.f32.mrf.mxu0  ;;  %v1310_v45 = vpop.f32.mrf.mxu1 }
 0x120   : > { %v1405_v44 = vadd.f32 %v1267_v41, %v897_v37  ;;  %v1407_v49 = vadd.f32 %v1310_v45, %v940_v40 }
 0x121   : > { %v1269_v50 = vpop.f32.mrf.mxu0  ;;  %v1312_v56 = vpop.f32.mrf.mxu1 }
 0x122   : > { %v1463_v54 = vadd.f32 %v1426_v39, %v1405_v44  ;;  %v1406_v55 = vadd.f32 %v1269_v50, %v899_v43  ;;  %v1465_v58 = vadd.f32 %v1434_v42, %v1407_v49  ;;  %v1408_v59 = vadd.f32 %v1312_v56, %v942_v48 }
 0x123   : > { %v1271_v60 = vpop.f32.mrf.mxu0  ;;  %v1314_v22 = vpop.f32.mrf.mxu1  ;;  %v12348_v50 = vsub.s32 5, %v10561_v25 }
 0x124   : > { %v1479_v12 = vmax.f32 %v1463_v54, 0.0  ;;  %v1464_v13 = vadd.f32 %v1430_v46, %v1406_v55  ;;  %v1413_v14 = vadd.f32 %v1271_v60, %v901_v53  ;;  %v1481_v16 = vmax.f32 %v1465_v58, 0.0 }
 0x125   : > { %v1466_v37 = vadd.f32 %v1438_v47, %v1408_v59  ;;  %v1415_v40 = vadd.f32 %v1314_v22, %v944_v57  ;;  %v1273_v41 = vpop.f32.mrf.mxu0  ;;  %v1316_v43 = vpop.f32.mrf.mxu1  ;;  %v12347_v54 = vsub.s32 7, %v10561_v25  ;;  %v983_v58 = vadd.f32 %v10555_v21, %v10539_v3 }
 0x126   : > { %v1512_v45 = vrot.slane %v1479_v12, 7  ;;  %v1480_v15 = vmax.f32 %v1464_v13, 0.0  ;;  %v1471_v63 = vadd.f32 %v1426_v39, %v1413_v14  ;;  %v1414_v17 = vadd.f32 %v1273_v41, %v903_v61 }
 0x127   : > { %v1514_v44 = vrot.slane %v1481_v16, 7  ;;  %v1482_v0 = vmax.f32 %v1466_v37, 0.0  ;;  %v1473_v18 = vadd.f32 %v1434_v42, %v1415_v40  ;;  %v1416_v48 = vadd.f32 %v1316_v43, %v946_v62 }
 0x128   : > { %1560 = vst [vmem:[#allocation3] sm:$0xfe] %v1512_v45  ;;  %v1513_v1 = vrot.slane %v1480_v15, 7  ;;  %v1487_v19 = vmax.f32 %v1471_v63, 0.0  ;;  %v1472_v49 = vadd.f32 %v1430_v46, %v1414_v17  ;;  %v1442_v46 = vrot.slane %v10570_v30, %v12350_v51 }
 0x129   : > { %1562 = vst [vmem:[#allocation3 + $0x10] sm:$0xfe] %v1514_v44  ;;  %v1515_v2 = vrot.slane %v1482_v0, 7  ;;  %v1489_v20 = vmax.f32 %v1473_v18, 0.0  ;;  %v1474_v53 = vadd.f32 %v1438_v47, %v1416_v48  ;;  %v1450_v47 = vrot.slane %v10570_v30, %v12349_v52 }
 0x12a   : > { %1561 = vst [vmem:[#allocation3 + $0x8] sm:$0xfe] %v1513_v1  ;;  %v1520_v39 = vrot.slane %v1487_v19, 7  ;;  %v1488_v55 = vmax.f32 %v1472_v49, 0.0  ;;  %v1026_v59 = vadd.f32 %v10557_v23, %v10541_v4  ;;  %v1446_v60 = vrot.slane %v10570_v30, %v12348_v50 }
 0x12b   : > { %1563 = vst [vmem:[#allocation3 + $0x18] sm:$0xfe] %v1515_v2  ;;  %v1524_v56 = vrot.slane %v1489_v20, 7  ;;  %v1490_v57 = vmax.f32 %v1474_v53, 0.0  ;;  %v1454_v61 = vrot.slane %v10570_v30, %v12347_v54  ;;  %v985_v12 = vadd.f32 %v10559_v24, %v10543_v5 }
 0x12c   : > { %1576 = vst [vmem:[#allocation3 + $0x80] sm:$0x1] %v1520_v39  ;;  %v1522_v42 = vrot.slane %v1488_v55, 7  ;;  %v1028_v13 = vadd.f32 %v10563_v28, %v10545_v6  ;;  %v987_v3 = vadd.f32 %v10565_v29, %v10547_v7  ;;  %v10621_v4 = vsel %vm1511_vm2, %v1512_v45, %v1520_v39 }
 0x12d   : > { %1578 = vst [vmem:[#allocation3 + $0x90] sm:$0x1] %v1524_v56  ;;  %v1526_v15 = vrot.slane %v1490_v57, 7  ;;  %v1030_v14 = vadd.f32 %v10574_v33, %v10549_v9  ;;  %v989_v30 = vadd.f32 %v10578_v36, %v10551_v10  ;;  %v1032_v6 = vadd.f32 %v10580_v38, %v10553_v11 }
 0x12e   : > { %1577 = vst [vmem:[#allocation3 + $0x88] sm:$0x1] %v1522_v42  ;;  %v10633_v7 = vsel %vm1511_vm2, %v1514_v44, %v1524_v56  ;;  %v10636_v28 = vsel %vm1511_vm2, %v1513_v1, %v1522_v42 }
 0x12f   : > { %1579 = vst [vmem:[#allocation3 + $0x98] sm:$0x1] %v1526_v15  ;;  %v1353_v21 = vpop.f32.mrf.mxu0  ;;  %v1736_v23 = vld [vmem:[#allocation3] sm:$0xfe]  ;;  %v1396_v5 = vpop.f32.mrf.mxu1  ;;  %v10639_v33 = vsel %vm1511_vm2, %v1515_v2, %v1526_v15 }
 0x130   : > { %v1409_v22 = vadd.f32 %v1353_v21, %v983_v58  ;;  %v10628_v24 = vpack.c.bf16 %v10621_v4, %v1736_v23  ;;  %v1411_v29 = vadd.f32 %v1396_v5, %v1026_v59 }
 0x131   : > { %v1355_v62 = vpop.f32.mrf.mxu0  ;;  %v1737_v9 = vld [vmem:[#allocation3 + $0x8] sm:$0xfe]  ;;  %v1398_v16 = vpop.f32.mrf.mxu1 }
 0x132   : > { %v1467_v10 = vadd.f32 %v1442_v46, %v1409_v22  ;;  %v1410_v36 = vadd.f32 %v1355_v62, %v985_v12  ;;  %v1753_v37 = vpack.c.bf16 %v10636_v28, %v1737_v9  ;;  %v1739_v40 = vld [vmem:[#allocation3 + $0x18] sm:$0xfe]  ;;  %v1469_v41 = vadd.f32 %v1450_v47, %v1411_v29 }
 0x133   : > { %v1412_v11 = vadd.f32 %v1398_v16, %v1028_v13  ;;  %v1357_v38 = vpop.f32.mrf.mxu0  ;;  %v10643_v45 = vpack.c.bf16 %v10639_v33, %v1739_v40  ;;  %v1901_v63 = vshll.u32 %v10628_v24, 16  ;;  %v1400_v0 = vpop.f32.mrf.mxu1  ;;  %v1744_v9 = vld [vmem:[#allocation3 + $0x80] sm:$0x1] }
 0x134   : > { %v1483_v17 = vmax.f32 %v1467_v10, 0.0  ;;  %v1468_v43 = vadd.f32 %v1446_v60, %v1410_v36  ;;  %v1417_v44 = vadd.f32 %v1357_v38, %v987_v3  ;;  %v1911_v18 = vshrl.u32 %v1753_v37, 16 }
 0x135   : > { %v1485_v48 = vmax.f32 %v1469_v41, 0.0  ;;  %v1470_v1 = vadd.f32 %v1454_v61, %v1412_v11  ;;  %v1419_v19 = vadd.f32 %v1400_v0, %v1030_v14  ;;  %v1359_v49 = vpop.f32.mrf.mxu0  ;;  %v1745_v2 = vld [vmem:[#allocation3 + $0x88] sm:$0x1]  ;;  %v1913_v20 = vshll.u32 %v1753_v37, 16  ;;  %v1402_v57 = vpop.f32.mrf.mxu1  ;;  %v1738_v14 = vld [vmem:[#allocation3 + $0x10] sm:$0xfe] }
 0x136   : > { %v10646_v53 = vrot.slane %v1483_v17, 7  ;;  %v1484_v39 = vmax.f32 %v1468_v43, 0.0  ;;  %v1475_v55 = vadd.f32 %v1442_v46, %v1417_v44  ;;  %v1418_v56 = vadd.f32 %v1359_v49, %v989_v30  ;;  %v1747_v12 = vld [vmem:[#allocation3 + $0x98] sm:$0x1]  ;;  %v1746_v41 = vld [vmem:[#allocation3 + $0x90] sm:$0x1] }
 0x137   : > { %v10648_v42 = vrot.slane %v1485_v48, 7  ;;  %v1486_v15 = vmax.f32 %v1470_v1, 0.0  ;;  %v1477_v58 = vadd.f32 %v1450_v47, %v1419_v19  ;;  %v1420_v59 = vadd.f32 %v1402_v57, %v1032_v6 }
 0x138   : > { %1564 = vst [vmem:[#allocation3 + $0x20] sm:$0xfe] %v10646_v53  ;;  %v1517_v13 = vrot.slane %v1484_v39, 7  ;;  %v1491_v3 = vmax.f32 %v1475_v55, 0.0  ;;  %v1476_v21 = vadd.f32 %v1446_v60, %v1418_v56  ;;  %v1761_v23 = vpack.c.bf16 %v1745_v2, %v1745_v2 }
 0x139   : > { %1566 = vst [vmem:[#allocation3 + $0x30] sm:$0xfe] %v10648_v42  ;;  %v1519_v22 = vrot.slane %v1486_v15, 7  ;;  %v1493_v5 = vmax.f32 %v1477_v58, 0.0  ;;  %v1478_v46 = vadd.f32 %v1454_v61, %v1420_v59  ;;  %v1915_v30 = vrot.slane %v1913_v20, 1 }
 0x13a   : > { %1565 = vst [vmem:[#allocation3 + $0x28] sm:$0xfe] %v1517_v13  ;;  %v10652_v29 = vrot.slane %v1491_v3, 7  ;;  %v1492_v62 = vmax.f32 %v1476_v21, 0.0  ;;  %v1918_v47 = vshll.u32 %v1761_v23, 16  ;;  %v1763_v6 = vpack.c.bf16 %v1747_v12, %v1747_v12  ;;  %v9666_v12 = vld [vmem:[%s12340_s3 + $0x370] sm:$0xff]  }
 0x13b   : > { %1567 = vst [vmem:[#allocation3 + $0x38] sm:$0xfe] %v1519_v22  ;;  %v10654_v10 = vrot.slane %v1493_v5, 7  ;;  %v1494_v36 = vmax.f32 %v1478_v46, 0.0  ;;  %v1754_v60 = vpack.c.bf16 %v10633_v7, %v1738_v14  ;;  %v1916_v37 = vor.u32 %v1915_v30, %v1911_v18  ;;  %v9665_v5 = vld [vmem:[%s12340_s3 + $0x3b8] sm:$0xff]   ;;  %v9667_v30 = vld [vmem:[%s12340_s3 + $0x3f0] sm:$0xff]  }
 0x13c   : > { %1580 = vst [vmem:[#allocation3 + $0xa0] sm:$0x1] %v10652_v29  ;;  %v1530_v16 = vrot.slane %v1492_v62, 7  ;;  %v1920_v61 = vrot.slane %v1918_v47, 1  ;;  %v1937_v40 = vshll.u32 %v10643_v45, 16  ;;  %v1935_v38 = vshrl.u32 %v10643_v45, 16 }
 0x13d   : > { %1582 = vst [vmem:[#allocation3 + $0xb0] sm:$0x1] %v10654_v10  ;;  %v1534_v11 = vrot.slane %v1494_v36, 7  ;;  %v1942_v17 = vshll.u32 %v1763_v6, 16  ;;  %v1760_v43 = vpack.c.bf16 %v1744_v9, %v1744_v9  ;;  %v1903_v48 = vrot.slane %v1901_v63, 1  ;;  %v9664_v63 = vld [vmem:[%s12340_s3 + $0x338] sm:$0xff]  }
 0x13e   : > { %1581 = vst [vmem:[#allocation3 + $0xa8] sm:$0x1] %v1530_v16  ;;  %v1921_v44 = vsel %vm1897_vm3, %v1916_v37, %v1920_v61  ;;  %v1939_v0 = vrot.slane %v1937_v40, 1  ;;  %v1899_v18 = vshrl.u32 %v10628_v24, 16  ;;  %v1762_v49 = vpack.c.bf16 %v1746_v41, %v1746_v41  ;;  %v9668_v62 = vld [vmem:[%s12340_s3 + $0x330] sm:$0xff]   ;;  %v9670_v36 = vld [vmem:[%s12340_s3 + $0x368] sm:$0xff]  }
 0x13f   : > { %1583 = vst [vmem:[#allocation3 + $0xb8] sm:$0x1] %v1534_v11  ;;  %2418 = vmatprep.mubr.bf16.mxu0 %v1921_v44  ;;  %v1944_v1 = vrot.slane %v1942_v17, 1  ;;  %v1906_v19 = vshll.u32 %v1760_v43, 16  ;;  %v10664_v2 = vsel %vm1511_vm2, %v1517_v13, %v1530_v16  ;;  %v1925_v39 = vshll.u32 %v1754_v60, 16  ;;  %v9669_v41 = vld [vmem:[%s12340_s3 + $0x3b0] sm:$0xff]  }
 0x140   : > { %v1940_v20 = vor.u32 %v1939_v0, %v1935_v38  ;;  %v10667_v45 = vsel %vm1511_vm2, %v1519_v22, %v1534_v11  ;;  %v1904_v55 = vor.u32 %v1903_v48, %v1899_v18  ;;  %v1930_v57 = vshll.u32 %v1762_v49, 16  ;;  %v9671_v17 = vld [vmem:[%s12340_s3 + $0x3e8] sm:$0xff]   ;;  %v9674_v48 = vld [vmem:[%s12340_s3 + $0x360] sm:$0xff]  }
 0x141   : > { %v1908_v56 = vrot.slane %v1906_v19, 1  ;;  %v1741_v15 = vld [vmem:[#allocation3 + $0x28] sm:$0xfe]  ;;  %v1923_v58 = vshrl.u32 %v1754_v60, 16  ;;  %v1927_v59 = vrot.slane %v1925_v39, 1  ;;  %v9672_v43 = vld [vmem:[%s12340_s3 + $0x328] sm:$0xff]  }
 0x142   : > { %v1945_v24 = vsel %vm1897_vm3, %v1940_v20, %v1944_v1  ;;  %v1757_v13 = vpack.c.bf16 %v10664_v2, %v1741_v15  ;;  %v1743_v3 = vld [vmem:[#allocation3 + $0x38] sm:$0xfe]  ;;  %v1932_v23 = vrot.slane %v1930_v57, 1  ;;  %v9673_v20 = vld [vmem:[%s12340_s3 + $0x3a8] sm:$0xff]   ;;  %v9675_v39 = vld [vmem:[%s12340_s3 + $0x3e0] sm:$0xff]  }
 0x143   : > { %2459 = vmatprep.mubr.bf16.mxu1 %v1945_v24  ;;  %v1909_v21 = vsel %vm1897_vm3, %v1904_v55, %v1908_v56  ;;  %v1759_v14 = vpack.c.bf16 %v10667_v45, %v1743_v3  ;;  %v1928_v22 = vor.u32 %v1927_v59, %v1923_v58  ;;  %v9676_v56 = vld [vmem:[%s12340_s3 + $0x320] sm:$0xff]   ;;  %v9678_v57 = vld [vmem:[%s12340_s3 + $0x358] sm:$0xff]   ;;  %v9682_v59 = vld [vmem:[%s12340_s3 + $0x350] sm:$0xff]  }
 0x144   : > { %2419 = vmatmul.mubr.bf16.vlgmr.msra.gmra.mxu0 %v1909_v21  ;;  %v1961_v46 = vshll.u32 %v1757_v13, 16  ;;  %v1959_v11 = vshrl.u32 %v1757_v13, 16  ;;  %v9677_v15 = vld [vmem:[%s12340_s3 + $0x3a0] sm:$0xff]   ;;  %v9679_v24 = vld [vmem:[%s12340_s3 + $0x3d8] sm:$0xff]   ;;  %v10736_v21 = vsel %vm1511_vm2, %v10646_v53, %v10652_v29  ;;  %v1742_v53 = vld [vmem:[#allocation3 + $0x30] sm:$0xfe] }
 0x145   : > { %9085 = vmatpush3.bf16.msra.mxu0 %v9664_v63  ;;  %v1749_v47 = vld [vmem:[#allocation3 + $0xa8] sm:$0x1]  ;;  %v1985_v6 = vshll.u32 %v1759_v14, 16  ;;  %v1933_v9 = vsel %vm1897_vm3, %v1928_v22, %v1932_v23  ;;  %v1983_v44 = vshrl.u32 %v1759_v14, 16  ;;  %v9680_v58 = vld [vmem:[%s12340_s3 + $0x318] sm:$0xff]   ;;  %v9683_v23 = vld [vmem:[%s12340_s3 + $0x3d0] sm:$0xff]  }
 0x146   : > { %9086 = vmatprep.subr.bf16.mxu0 %v9666_v12  ;;  %v1765_v60 = vpack.c.bf16 %v1749_v47, %v1749_v47  ;;  %v1963_v16 = vrot.slane %v1961_v46, 1  ;;  %v1751_v37 = vld [vmem:[#allocation3 + $0xb8] sm:$0x1]  ;;  %2460 = vmatmul.mubr.bf16.vlgmr.msra.gmra.mxu1 %v1933_v9  ;;  %v1740_v12 = vld [vmem:[#allocation3 + $0x20] sm:$0xfe]  ;;  %v9686_v22 = vld [vmem:[%s12340_s3 + $0x348] sm:$0xff]  }
 0x147   : > { %v1767_v61 = vpack.c.bf16 %v1751_v37, %v1751_v37  ;;  %v1987_v40 = vrot.slane %v1985_v6, 1  ;;  %9107 = vmatpush3.bf16.msra.mxu1 %v9665_v5  ;;  %v1748_v13 = vld [vmem:[#allocation3 + $0xa0] sm:$0x1]  ;;  %v9684_v14 = vld [vmem:[%s12340_s3 + $0x310] sm:$0xff]   ;;  %v1756_v5 = vpack.c.bf16 %v10736_v21, %v1740_v12  ;;  %v1750_v29 = vld [vmem:[#allocation3 + $0xb0] sm:$0x1] }
 0x148   : > { %v1966_v38 = vshll.u32 %v1765_v60, 16  ;;  %9108 = vmatprep.subr.bf16.mxu1 %v9667_v30  ;;  %v1964_v1 = vor.u32 %v1963_v16, %v1959_v11  ;;  %v9681_v3 = vld [vmem:[%s12340_s3 + $0x398] sm:$0xff]   ;;  %v1764_v46 = vpack.c.bf16 %v1748_v13, %v1748_v13  ;;  %v10751_v30 = vsel %vm1511_vm2, %v10648_v42, %v10654_v10  ;;  %v9687_v47 = vld [vmem:[%s12340_s3 + $0x3c8] sm:$0xff]   ;;  %v9690_v42 = vld [vmem:[%s12340_s3 + $0x340] sm:$0xff]  }
 0x149   : > { %9087 = vmatpush3.bf16.msra.mxu0 %v9668_v62  ;;  %v1990_v0 = vshll.u32 %v1767_v61, 16  ;;  %v1988_v19 = vor.u32 %v1987_v40, %v1983_v44  ;;  %v9685_v62 = vld [vmem:[%s12340_s3 + $0x390] sm:$0xff]   ;;  %v1758_v6 = vpack.c.bf16 %v10751_v30, %v1742_v53  ;;  %v9688_v9 = vld [vmem:[%s12340_s3 + $0x308] sm:$0xff]   ;;  %v1949_v10 = vshll.u32 %v1756_v5, 16  ;;  %v9691_v37 = vld [vmem:[%s12340_s3 + $0x3c0] sm:$0xff]  }
 0x14a   : > { %9088 = vmatprep.subr.bf16.mxu0 %v9670_v36  ;;  %v1968_v18 = vrot.slane %v1966_v38, 1  ;;  %v1954_v36 = vshll.u32 %v1764_v46, 16  ;;  %v1766_v60 = vpack.c.bf16 %v1750_v29, %v1750_v29  ;;  %v9689_v16 = vld [vmem:[%s12340_s3 + $0x388] sm:$0xff]   ;;  %v9692_v61 = vld [vmem:[%s12340_s3 + $0x300] sm:$0xff]   ;;  %v1947_v11 = vshrl.u32 %v1756_v5, 16  ;;  %v9710_v29 = vld [vmem:[%s12340_s3 + $0x58] sm:$0xff]  }
 0x14b   : > { %v1992_v49 = vrot.slane %v1990_v0, 1  ;;  %9109 = vmatpush3.bf16.msra.mxu1 %v9669_v41  ;;  %v1973_v40 = vshll.u32 %v1758_v6, 16  ;;  %v9694_v41 = vld [vmem:[%s12340_s3 + $0x78] sm:$0xff]   ;;  %v1951_v38 = vrot.slane %v1949_v10, 1  ;;  %v9693_v44 = vld [vmem:[%s12340_s3 + $0x380] sm:$0xff]   ;;  %v9705_v5 = vld [vmem:[%s12340_s3 + $0xa8] sm:$0xff]  }
 0x14c   : > { %v1969_v55 = vsel %vm1897_vm3, %v1964_v1, %v1968_v18  ;;  %9110 = vmatprep.subr.bf16.mxu1 %v9671_v17  ;;  %v1956_v17 = vrot.slane %v1954_v36, 1  ;;  %v9695_v0 = vld [vmem:[%s12340_s3 + $0xf8] sm:$0xff]   ;;  %v9698_v18 = vld [vmem:[%s12340_s3 + $0x70] sm:$0xff]   ;;  %v9707_v46 = vld [vmem:[%s12340_s3 + $0xe0] sm:$0xff]  }
 0x14d   : > { %9089 = vmatpush3.bf16.msra.mxu0 %v9672_v43  ;;  %v1993_v63 = vsel %vm1897_vm3, %v1988_v19, %v1992_v49  ;;  %2500 = vmatprep.mubr.bf16.mxu0 %v1969_v55  ;;  %v1978_v43 = vshll.u32 %v1766_v60, 16  ;;  %v9696_v1 = vld [vmem:[%s12340_s3 + $0x38] sm:$0xff]   ;;  %v1952_v19 = vor.u32 %v1951_v38, %v1947_v11  ;;  %v1971_v49 = vshrl.u32 %v1758_v6, 16  ;;  %v1587_v55 = vld [vmem:[#allocation3 + $0x18] sm:$0xff]  ;;  %v9708_v53 = vld [vmem:[%s12340_s3 + $0x20] sm:$0xff]  }
 0x14e   : > { %9090 = vmatprep.subr.bf16.mxu0 %v9674_v48  ;;  %2541 = vmatprep.mubr.bf16.mxu1 %v1993_v63  ;;  %v1975_v48 = vrot.slane %v1973_v40, 1  ;;  %v9699_v63 = vld [vmem:[%s12340_s3 + $0xf0] sm:$0xff]   ;;  %v1603_v13 = vpack.c.bf16 %v10639_v33, %v1587_v55  ;;  %v9712_v6 = vld [vmem:[%s12340_s3 + $0x18] sm:$0xff]   ;;  %v9718_v60 = vld [vmem:[%s12340_s3 + $0x48] sm:$0xff]  }
 0x14f   : > { %9111 = vmatpush3.bf16.msra.mxu1 %v9673_v20  ;;  %v1980_v20 = vrot.slane %v1978_v43, 1  ;;  %v9715_v10 = vld [vmem:[%s12340_s3 + $0xd0] sm:$0xff]   ;;  %v9722_v40 = vld [vmem:[%s12340_s3 + $0x40] sm:$0xff]   ;;  %v1584_v43 = vld [vmem:[#allocation3] sm:$0xff] }
 0x150   : > { %9112 = vmatprep.subr.bf16.mxu1 %v9675_v39  ;;  %v1585_v39 = vld [vmem:[#allocation3 + $0x8] sm:$0xff]  ;;  %v9716_v36 = vld [vmem:[%s12340_s3 + $0x10] sm:$0xff]  }
 0x151   : > { %9091 = vmatpush3.bf16.msra.mxu0 %v9676_v56  ;;  %v9697_v56 = vld [vmem:[%s12340_s3 + $0xb8] sm:$0xff]   ;;  %v9723_v11 = vld [vmem:[%s12340_s3 + $0xc0] sm:$0xff]   ;;  %v9731_v55 = vld [vmem:[%s12340_s3 + $0x1f0] sm:$0xff]  }
 0x152   : > { %9092 = vmatprep.subr.bf16.mxu0 %v9678_v57  ;;  %v1957_v57 = vsel %vm1897_vm3, %v1952_v19, %v1956_v17  ;;  %v9724_v38 = vld [vmem:[%s12340_s3] sm:$0xff]   ;;  %v9726_v17 = vld [vmem:[%s12340_s3 + $0x178] sm:$0xff]   ;;  %v9730_v19 = vld [vmem:[%s12340_s3 + $0x170] sm:$0xff]  }
 0x153   : > { %9113 = vmatpush3.bf16.msra.mxu1 %v9677_v15  ;;  %v9700_v15 = vld [vmem:[%s12340_s3 + $0x30] sm:$0xff]  }
 0x154   : > { %9114 = vmatprep.subr.bf16.mxu1 %v9679_v24  ;;  %v1976_v24 = vor.u32 %v1975_v48, %v1971_v49  ;;  %v9728_v48 = vld [vmem:[%s12340_s3 + $0x138] sm:$0xff]   ;;  %v1591_v49 = vld [vmem:[#allocation3 + $0x38] sm:$0xff] }
 0x155   : > { %9093 = vmatpush3.bf16.msra.mxu0 %v9680_v58  ;;  %v1601_v58 = vpack.c.bf16 %v10636_v28, %v1585_v39  ;;  %v9729_v39 = vld [vmem:[%s12340_s3 + $0x1b8] sm:$0xff]  }
 0x156   : > { %9094 = vmatprep.subr.bf16.mxu0 %v9682_v59  ;;  %v9702_v59 = vld [vmem:[%s12340_s3 + $0x68] sm:$0xff]   ;;  %v1981_v12 = vsel %vm1897_vm3, %v1976_v24, %v1980_v20  ;;  %v1600_v20 = vpack.c.bf16 %v10621_v4, %v1584_v43  ;;  %v1607_v24 = vpack.c.bf16 %v10667_v45, %v1591_v49  ;;  %v3101_v43 = vld [vmem:[#allocation3 + $0x18] sm:$0xfc] }
 0x157   : > { %9115 = vmatpush3.bf16.msra.mxu1 %v9681_v3  ;;  %v9701_v3 = vld [vmem:[%s12340_s3 + $0xb0] sm:$0xff]  }
 0x158   : > { %9116 = vmatprep.subr.bf16.mxu1 %v9683_v23  ;;  %v9703_v23 = vld [vmem:[%s12340_s3 + $0xe8] sm:$0xff]  }
 0x159   : > { %9095 = vmatpush3.bf16.msra.mxu0 %v9684_v14  ;;  %v9704_v14 = vld [vmem:[%s12340_s3 + $0x28] sm:$0xff]  }
 0x15a   : > { %9096 = vmatprep.subr.bf16.mxu0 %v9686_v22  ;;  %v9706_v22 = vld [vmem:[%s12340_s3 + $0x60] sm:$0xff]  }
 0x15b   : > { %9117 = vmatpush3.bf16.msra.mxu1 %v9685_v62  ;;  %v9709_v62 = vld [vmem:[%s12340_s3 + $0xa0] sm:$0xff]  }
 0x15c   : > { %9118 = vmatprep.subr.bf16.mxu1 %v9687_v47  ;;  %v9711_v47 = vld [vmem:[%s12340_s3 + $0xd8] sm:$0xff]  }
 0x15d   : > { %9097 = vmatpush3.bf16.msra.mxu0 %v9688_v9  ;;  %v9714_v9 = vld [vmem:[%s12340_s3 + $0x50] sm:$0xff]  }
 0x15e   : > { %9098 = vmatprep.subr.bf16.mxu0 %v9690_v42  ;;  %v9713_v42 = vld [vmem:[%s12340_s3 + $0x98] sm:$0xff]  }
 0x15f   : > { %9119 = vmatpush3.bf16.msra.mxu1 %v9689_v16  ;;  %v9717_v16 = vld [vmem:[%s12340_s3 + $0x90] sm:$0xff]  }
 0x160   : > { %9120 = vmatprep.subr.bf16.mxu1 %v9691_v37  ;;  %v9719_v37 = vld [vmem:[%s12340_s3 + $0xc8] sm:$0xff]  }
 0x161   : > { %9099 = vmatpush3.bf16.msra.mxu0 %v9692_v61  ;;  %v9720_v61 = vld [vmem:[%s12340_s3 + $0x8] sm:$0xff]  }
 0x162   : > { %9128 = vmatprep.subr.bf16.mxu0 %v9694_v41  ;;  %v9721_v41 = vld [vmem:[%s12340_s3 + $0x88] sm:$0xff]  }
 0x163   : > { %9121 = vmatpush3.bf16.msra.mxu1 %v9693_v44  ;;  %v9725_v44 = vld [vmem:[%s12340_s3 + $0x80] sm:$0xff]  }
 0x164   : > { %2501 = vmatmul.mubr.bf16.vlgmr.msra.gmra.mxu0 %v1957_v57  ;;  %9150 = vmatprep.subr.bf16.mxu1 %v9695_v0  ;;  %v9727_v0 = vld [vmem:[%s12340_s3 + $0x1f8] sm:$0xff]  }
 0x165   : > { %9129 = vmatpush3.bf16.msra.mxu0 %v9696_v1  ;;  %2966 = vmatprep.mubr.bf16.mxu0 %v1601_v58  ;;  %v1589_v1 = vld [vmem:[#allocation3 + $0x28] sm:$0xff]  ;;  %v9733_v58 = vld [vmem:[%s12340_s3 + $0x1b0] sm:$0xff]  }
 0x166   : > { %9130 = vmatprep.subr.bf16.mxu0 %v9698_v18  ;;  %2542 = vmatmul.mubr.bf16.vlgmr.msra.gmra.mxu1 %v1981_v12  ;;  %v1586_v18 = vld [vmem:[#allocation3 + $0x10] sm:$0xff]  ;;  %v1605_v57 = vpack.c.bf16 %v10664_v2, %v1589_v1  ;;  %v9757_v1 = vld [vmem:[%s12340_s3 + $0x180] sm:$0xff]  }
 0x167   : > { %9151 = vmatpush3.bf16.msra.mxu1 %v9697_v56  ;;  %3007 = vmatprep.mubr.bf16.mxu1 %v1603_v13  ;;  %v9732_v56 = vld [vmem:[%s12340_s3 + $0x130] sm:$0xff]   ;;  %v9736_v12 = vld [vmem:[%s12340_s3 + $0x128] sm:$0xff]   ;;  %v9738_v13 = vld [vmem:[%s12340_s3 + $0x160] sm:$0xff]  }
 0x168   : > { %9152 = vmatprep.subr.bf16.mxu1 %v9699_v63  ;;  %v9734_v63 = vld [vmem:[%s12340_s3 + $0x168] sm:$0xff]  }
 0x169   : > { %9131 = vmatpush3.bf16.msra.mxu0 %v9700_v15  ;;  %v1602_v15 = vpack.c.bf16 %v10633_v7, %v1586_v18  ;;  %v9759_v18 = vld [vmem:[%s12340_s3 + $0x4f8] sm:$0xff]  }
 0x16a   : > { %9132 = vmatprep.subr.bf16.mxu0 %v9702_v59  ;;  %v9735_v59 = vld [vmem:[%s12340_s3 + $0x1e8] sm:$0xff]  }
 0x16b   : > { %9153 = vmatpush3.bf16.msra.mxu1 %v9701_v3  ;;  %v9737_v3 = vld [vmem:[%s12340_s3 + $0x1a8] sm:$0xff]  }
 0x16c   : > { %9154 = vmatprep.subr.bf16.mxu1 %v9703_v23  ;;  %v9739_v23 = vld [vmem:[%s12340_s3 + $0x1e0] sm:$0xff]  }
 0x16d   : > { %9133 = vmatpush3.bf16.msra.mxu0 %v9704_v14  ;;  %v9740_v14 = vld [vmem:[%s12340_s3 + $0x120] sm:$0xff]  }
 0x16e   : > { %9134 = vmatprep.subr.bf16.mxu0 %v9706_v22  ;;  %v9742_v22 = vld [vmem:[%s12340_s3 + $0x158] sm:$0xff]  }
 0x16f   : > { %9155 = vmatpush3.bf16.msra.mxu1 %v9705_v5  ;;  %v9741_v5 = vld [vmem:[%s12340_s3 + $0x1a0] sm:$0xff]  }
 0x170   : > { %9156 = vmatprep.subr.bf16.mxu1 %v9707_v46  ;;  %v9743_v46 = vld [vmem:[%s12340_s3 + $0x1d8] sm:$0xff]  }
 0x171   : > { %9135 = vmatpush3.bf16.msra.mxu0 %v9708_v53  ;;  %v9744_v53 = vld [vmem:[%s12340_s3 + $0x118] sm:$0xff]  }
 0x172   : > { %9136 = vmatprep.subr.bf16.mxu0 %v9710_v29  ;;  %v9746_v29 = vld [vmem:[%s12340_s3 + $0x150] sm:$0xff]  }
 0x173   : > { %9157 = vmatpush3.bf16.msra.mxu1 %v9709_v62  ;;  %v9745_v62 = vld [vmem:[%s12340_s3 + $0x198] sm:$0xff]  }
 0x174   : > { %9158 = vmatprep.subr.bf16.mxu1 %v9711_v47  ;;  %v9747_v47 = vld [vmem:[%s12340_s3 + $0x1d0] sm:$0xff]  }
 0x175   : > { %9137 = vmatpush3.bf16.msra.mxu0 %v9712_v6  ;;  %v9748_v6 = vld [vmem:[%s12340_s3 + $0x110] sm:$0xff]  }
 0x176   : > { %9138 = vmatprep.subr.bf16.mxu0 %v9714_v9  ;;  %v9750_v9 = vld [vmem:[%s12340_s3 + $0x148] sm:$0xff]  }
 0x177   : > { %9159 = vmatpush3.bf16.msra.mxu1 %v9713_v42  ;;  %v9749_v42 = vld [vmem:[%s12340_s3 + $0x190] sm:$0xff]  }
 0x178   : > { %9160 = vmatprep.subr.bf16.mxu1 %v9715_v10  ;;  %v9751_v10 = vld [vmem:[%s12340_s3 + $0x1c8] sm:$0xff]  }
 0x179   : > { %9139 = vmatpush3.bf16.msra.mxu0 %v9716_v36  ;;  %v9752_v36 = vld [vmem:[%s12340_s3 + $0x108] sm:$0xff]  }
 0x17a   : > { %9140 = vmatprep.subr.bf16.mxu0 %v9718_v60  ;;  %v9754_v60 = vld [vmem:[%s12340_s3 + $0x140] sm:$0xff]  }
 0x17b   : > { %9161 = vmatpush3.bf16.msra.mxu1 %v9717_v16  ;;  %v3107_v16 = vld [vmem:[#allocation3 + $0x88] sm:$0x3] }
 0x17c   : > { %9162 = vmatprep.subr.bf16.mxu1 %v9719_v37  ;;  %v9753_v37 = vld [vmem:[%s12340_s3 + $0x188] sm:$0xff]  }
 0x17d   : > { %9141 = vmatpush3.bf16.msra.mxu0 %v9720_v61  ;;  %v3099_v61 = vld [vmem:[#allocation3 + $0x8] sm:$0xfc] }
 0x17e   : > { %9142 = vmatprep.subr.bf16.mxu0 %v9722_v40  ;;  %v3109_v40 = vld [vmem:[#allocation3 + $0x98] sm:$0x3] }
 0x17f   : > { %9163 = vmatpush3.bf16.msra.mxu1 %v9721_v41  ;;  %v9755_v41 = vld [vmem:[%s12340_s3 + $0x1c0] sm:$0xff]  }
 0x180   : > { %9164 = vmatprep.subr.bf16.mxu1 %v9723_v11  ;;  %v9756_v11 = vld [vmem:[%s12340_s3 + $0x100] sm:$0xff]  }
 0x181   : > { %9143 = vmatpush3.bf16.msra.mxu0 %v9724_v38  ;;  %v3123_v38 = vpack.c.bf16 %v3107_v16, %v3107_v16  ;;  %v9781_v16 = vld [vmem:[%s12340_s3 + $0x490] sm:$0xff]  }
 0x182   : > { %9172 = vmatprep.subr.bf16.mxu0 %v9726_v17  ;;  %v9758_v17 = vld [vmem:[%s12340_s3 + $0x478] sm:$0xff]  }
 0x183   : > { %9165 = vmatpush3.bf16.msra.mxu1 %v9725_v44  ;;  %v1588_v44 = vld [vmem:[#allocation3 + $0x20] sm:$0xff]  ;;  %v3280_v49 = vrot.slane %v3123_v38, 1  ;;  %v3111_v38 = vld [vmem:[#allocation3 + $0xa8] sm:$0x3] }
 0x184   : > { %2967 = vmatmul.mubr.bf16.vlgmr.msra.gmra.mxu0 %v1600_v20  ;;  %9194 = vmatprep.subr.bf16.mxu1 %v9727_v0  ;;  %v3115_v0 = vpack.c.bf16 %v10636_v28, %v3099_v61  ;;  %v3117_v20 = vpack.c.bf16 %v10639_v33, %v3101_v43  ;;  %v1604_v28 = vpack.c.bf16 %v10736_v21, %v1588_v44  ;;  %v9783_v61 = vld [vmem:[%s12340_s3 + $0x4c8] sm:$0xff]  }
 0x185   : > { %9173 = vmatpush3.bf16.msra.mxu0 %v9728_v48  ;;  %3048 = vmatprep.mubr.bf16.mxu0 %v1605_v57  ;;  %v3125_v48 = vpack.c.bf16 %v3109_v40, %v3109_v40  ;;  %v9784_v40 = vld [vmem:[%s12340_s3 + $0x408] sm:$0xff]  }
 0x186   : > { %9174 = vmatprep.subr.bf16.mxu0 %v9730_v19  ;;  %3008 = vmatmul.mubr.bf16.vlgmr.msra.gmra.mxu1 %v1602_v15  ;;  %v9760_v19 = vld [vmem:[%s12340_s3 + $0x438] sm:$0xff]   ;;  %v3108_v43 = vld [vmem:[#allocation3 + $0x90] sm:$0x3] }
 0x187   : > { %9195 = vmatpush3.bf16.msra.mxu1 %v9729_v39  ;;  %3089 = vmatprep.mubr.bf16.mxu1 %v1607_v24  ;;  %v1590_v39 = vld [vmem:[#allocation3 + $0x30] sm:$0xff]  ;;  %v3286_v57 = vrot.slane %v3125_v48, 1  ;;  %v3285_v24 = vrot.slane %v3117_v20, 1  ;;  %v3113_v48 = vld [vmem:[#allocation3 + $0xb8] sm:$0x3]  ;;  %v3127_v20 = vpack.c.bf16 %v3111_v38, %v3111_v38  ;;  %v9809_v38 = vld [vmem:[%s12340_s3 + $0x598] sm:$0xff]  }
 0x188   : > { %9196 = vmatprep.subr.bf16.mxu1 %v9731_v55  ;;  %v9762_v55 = vld [vmem:[%s12340_s3 + $0x470] sm:$0xff]   ;;  %v1606_v15 = vpack.c.bf16 %v10751_v30, %v1590_v39  ;;  %v9785_v44 = vld [vmem:[%s12340_s3 + $0x488] sm:$0xff]   ;;  %v9790_v39 = vld [vmem:[%s12340_s3 + $0x578] sm:$0xff]  }
 0x189   : > { %9175 = vmatpush3.bf16.msra.mxu0 %v9732_v56  ;;  %v3279_v56 = vrot.slane %v3115_v0, 1  ;;  %v3103_v0 = vld [vmem:[#allocation3 + $0x28] sm:$0xfc] }
 0x18a   : > { %9176 = vmatprep.subr.bf16.mxu0 %v9734_v63  ;;  %v9761_v63 = vld [vmem:[%s12340_s3 + $0x4b8] sm:$0xff]  }
 0x18b   : > { %9197 = vmatpush3.bf16.msra.mxu1 %v9733_v58  ;;  %v3281_v33 = vsel %vm3275_vm4, %v3279_v56, %v3280_v49  ;;  %v9763_v58 = vld [vmem:[%s12340_s3 + $0x4f0] sm:$0xff]   ;;  %v3100_v49 = vld [vmem:[#allocation3 + $0x10] sm:$0xfc] }
 0x18c   : > { %9198 = vmatprep.subr.bf16.mxu1 %v9735_v59  ;;  %v9764_v59 = vld [vmem:[%s12340_s3 + $0x430] sm:$0xff]  }
 0x18d   : > { %9177 = vmatpush3.bf16.msra.mxu0 %v9736_v12  ;;  %v9766_v12 = vld [vmem:[%s12340_s3 + $0x468] sm:$0xff]  }
 0x18e   : > { %9178 = vmatprep.subr.bf16.mxu0 %v9738_v13  ;;  %v3287_v13 = vsel %vm3275_vm4, %v3285_v24, %v3286_v57  ;;  %v3119_v57 = vpack.c.bf16 %v10664_v2, %v3103_v0  ;;  %v9791_v24 = vld [vmem:[%s12340_s3 + $0x5f8] sm:$0xff]   ;;  %v3292_v2 = vrot.slane %v3127_v20, 1  ;;  %v9813_v0 = vld [vmem:[%s12340_s3 + $0x590] sm:$0xff]  }
 0x18f   : > { %9199 = vmatpush3.bf16.msra.mxu1 %v9737_v3  ;;  %v9765_v3 = vld [vmem:[%s12340_s3 + $0x4b0] sm:$0xff]  }
 0x190   : > { %9200 = vmatprep.subr.bf16.mxu1 %v9739_v23  ;;  %v9767_v23 = vld [vmem:[%s12340_s3 + $0x4e8] sm:$0xff]  }
 0x191   : > { %9179 = vmatpush3.bf16.msra.mxu0 %v9740_v14  ;;  %v9768_v14 = vld [vmem:[%s12340_s3 + $0x428] sm:$0xff]  }
 0x192   : > { %9180 = vmatprep.subr.bf16.mxu0 %v9742_v22  ;;  %v9770_v22 = vld [vmem:[%s12340_s3 + $0x460] sm:$0xff]  }
 0x193   : > { %9201 = vmatpush3.bf16.msra.mxu1 %v9741_v5  ;;  %v9769_v5 = vld [vmem:[%s12340_s3 + $0x4a8] sm:$0xff]  }
 0x194   : > { %9202 = vmatprep.subr.bf16.mxu1 %v9743_v46  ;;  %v9771_v46 = vld [vmem:[%s12340_s3 + $0x4e0] sm:$0xff]  }
 0x195   : > { %9181 = vmatpush3.bf16.msra.mxu0 %v9744_v53  ;;  %v9772_v53 = vld [vmem:[%s12340_s3 + $0x420] sm:$0xff]  }
 0x196   : > { %9182 = vmatprep.subr.bf16.mxu0 %v9746_v29  ;;  %v9774_v29 = vld [vmem:[%s12340_s3 + $0x458] sm:$0xff]  }
 0x197   : > { %9203 = vmatpush3.bf16.msra.mxu1 %v9745_v62  ;;  %v9773_v62 = vld [vmem:[%s12340_s3 + $0x4a0] sm:$0xff]  }
 0x198   : > { %9204 = vmatprep.subr.bf16.mxu1 %v9747_v47  ;;  %v9775_v47 = vld [vmem:[%s12340_s3 + $0x4d8] sm:$0xff]  }
 0x199   : > { %9183 = vmatpush3.bf16.msra.mxu0 %v9748_v6  ;;  %v9776_v6 = vld [vmem:[%s12340_s3 + $0x418] sm:$0xff]  }
 0x19a   : > { %9184 = vmatprep.subr.bf16.mxu0 %v9750_v9  ;;  %v9778_v9 = vld [vmem:[%s12340_s3 + $0x450] sm:$0xff]  }
 0x19b   : > { %9205 = vmatpush3.bf16.msra.mxu1 %v9749_v42  ;;  %v9777_v42 = vld [vmem:[%s12340_s3 + $0x498] sm:$0xff]  }
 0x19c   : > { %9206 = vmatprep.subr.bf16.mxu1 %v9751_v10  ;;  %v9779_v10 = vld [vmem:[%s12340_s3 + $0x4d0] sm:$0xff]  }
 0x19d   : > { %9185 = vmatpush3.bf16.msra.mxu0 %v9752_v36  ;;  %v9780_v36 = vld [vmem:[%s12340_s3 + $0x410] sm:$0xff]  }
 0x19e   : > { %9186 = vmatprep.subr.bf16.mxu0 %v9754_v60  ;;  %v9782_v60 = vld [vmem:[%s12340_s3 + $0x448] sm:$0xff]  }
 0x19f   : > { %9207 = vmatpush3.bf16.msra.mxu1 %v9753_v37  ;;  %v3106_v37 = vld [vmem:[#allocation3 + $0x80] sm:$0x3] }
 0x1a0   : > { %9208 = vmatprep.subr.bf16.mxu1 %v9755_v41  ;;  %v9786_v41 = vld [vmem:[%s12340_s3 + $0x440] sm:$0xff]  }
 0x1a1   : > { %9187 = vmatpush3.bf16.msra.mxu0 %v9756_v11  ;;  %v3098_v11 = vld [vmem:[#allocation3] sm:$0xfc] }
 0x1a2   : > { %9216 = vmatprep.subr.bf16.mxu0 %v9758_v17  ;;  %v3122_v17 = vpack.c.bf16 %v3106_v37, %v3106_v37  ;;  %v9806_v37 = vld [vmem:[%s12340_s3 + $0x558] sm:$0xff]  }
 0x1a3   : > { %9209 = vmatpush3.bf16.msra.mxu1 %v9757_v1  ;;  %v9787_v1 = vld [vmem:[%s12340_s3 + $0x4c0] sm:$0xff]  }
 0x1a4   : > { %3049 = vmatmul.mubr.bf16.vlgmr.msra.gmra.mxu0 %v1604_v28  ;;  %9238 = vmatprep.subr.bf16.mxu1 %v9759_v18  ;;  %v9788_v18 = vld [vmem:[%s12340_s3 + $0x400] sm:$0xff]   ;;  %v3124_v28 = vpack.c.bf16 %v3108_v43, %v3108_v43  ;;  %v3277_v56 = vrot.slane %v3122_v17, 1  ;;  %v9811_v17 = vld [vmem:[%s12340_s3 + $0x5d0] sm:$0xff]  }
 0x1a5   : > { %9217 = vmatpush3.bf16.msra.mxu0 %v9760_v19  ;;  %3724 = vmatprep.mubr.bf16.mxu0 %v3281_v33  ;;  %v3114_v19 = vpack.c.bf16 %v10621_v4, %v3098_v11  ;;  %v3116_v4 = vpack.c.bf16 %v10633_v7, %v3100_v49  ;;  %v9794_v7 = vld [vmem:[%s12340_s3 + $0x570] sm:$0xff]   ;;  %v3102_v49 = vld [vmem:[#allocation3 + $0x20] sm:$0xfc] }
 0x1a6   : > { %9218 = vmatprep.subr.bf16.mxu0 %v9762_v55  ;;  %3090 = vmatmul.mubr.bf16.vlgmr.msra.gmra.mxu1 %v1606_v15  ;;  %v3105_v55 = vld [vmem:[#allocation3 + $0x38] sm:$0xfc]  ;;  %v9789_v15 = vld [vmem:[%s12340_s3 + $0x480] sm:$0xff]  }
 0x1a7   : > { %9239 = vmatpush3.bf16.msra.mxu1 %v9761_v63  ;;  %3765 = vmatprep.mubr.bf16.mxu1 %v3287_v13  ;;  %v3129_v63 = vpack.c.bf16 %v3113_v48, %v3113_v48  ;;  %v3276_v33 = vrot.slane %v3114_v19, 1  ;;  %v9810_v11 = vld [vmem:[%s12340_s3 + $0x550] sm:$0xff]   ;;  %v3110_v48 = vld [vmem:[#allocation3 + $0xa0] sm:$0x3]  ;;  %v9818_v19 = vld [vmem:[%s12340_s3 + $0x540] sm:$0xff]  }
 0x1a8   : > { %9240 = vmatprep.subr.bf16.mxu1 %v9763_v58  ;;  %v9792_v58 = vld [vmem:[%s12340_s3 + $0x538] sm:$0xff]   ;;  %v9812_v43 = vld [vmem:[%s12340_s3 + $0x510] sm:$0xff]   ;;  %v3126_v20 = vpack.c.bf16 %v3110_v48, %v3110_v48 }
 0x1a9   : > { %9219 = vmatpush3.bf16.msra.mxu0 %v9764_v59  ;;  %v3121_v59 = vpack.c.bf16 %v10667_v45, %v3105_v55  ;;  %v3278_v13 = vsel %vm3275_vm4, %v3276_v33, %v3277_v56  ;;  %v9819_v55 = vld [vmem:[%s12340_s3 + $0x5c0] sm:$0xff]  }
 0x1aa   : > { %9220 = vmatprep.subr.bf16.mxu0 %v9766_v12  ;;  %v3283_v12 = vrot.slane %v3124_v28, 1  ;;  %v3112_v28 = vld [vmem:[#allocation3 + $0xb0] sm:$0x3]  ;;  %v9820_v56 = vld [vmem:[%s12340_s3 + $0x500] sm:$0xff]  }
 0x1ab   : > { %9241 = vmatpush3.bf16.msra.mxu1 %v9765_v3  ;;  %v3291_v3 = vrot.slane %v3119_v57, 1  ;;  %v3118_v57 = vpack.c.bf16 %v10736_v21, %v3102_v49  ;;  %v9821_v33 = vld [vmem:[%s12340_s3 + $0x580] sm:$0xff]  }
 0x1ac   : > { %9242 = vmatprep.subr.bf16.mxu1 %v9767_v23  ;;  %v3298_v23 = vrot.slane %v3129_v63, 1  ;;  %v3104_v63 = vld [vmem:[#allocation3 + $0x30] sm:$0xfc] }
 0x1ad   : > { %9221 = vmatpush3.bf16.msra.mxu0 %v9768_v14  ;;  %v3282_v14 = vrot.slane %v3116_v4, 1  ;;  %v3293_v45 = vsel %vm3275_vm4, %v3291_v3, %v3292_v2  ;;  %v3289_v4 = vrot.slane %v3126_v20, 1 }
 0x1ae   : > { %9222 = vmatprep.subr.bf16.mxu0 %v9770_v22  ;;  %v9793_v22 = vld [vmem:[%s12340_s3 + $0x5b8] sm:$0xff]  }
 0x1af   : > { %9243 = vmatpush3.bf16.msra.mxu1 %v9769_v5  ;;  %v3297_v5 = vrot.slane %v3121_v59, 1 }
 0x1b0   : > { %9244 = vmatprep.subr.bf16.mxu1 %v9771_v46  ;;  %v9795_v46 = vld [vmem:[%s12340_s3 + $0x5f0] sm:$0xff]  }
 0x1b1   : > { %9223 = vmatpush3.bf16.msra.mxu0 %v9772_v53  ;;  %v9796_v53 = vld [vmem:[%s12340_s3 + $0x530] sm:$0xff]  }
 0x1b2   : > { %9224 = vmatprep.subr.bf16.mxu0 %v9774_v29  ;;  %v3284_v29 = vsel %vm3275_vm4, %v3282_v14, %v3283_v12  ;;  %v8412_v14 = vld [vmem:[%s12338_s1 + $0x1e8] sm:$0xff] }
 0x1b3   : > { %9245 = vmatpush3.bf16.msra.mxu1 %v9773_v62  ;;  %v9798_v62 = vld [vmem:[%s12340_s3 + $0x568] sm:$0xff]  }
 0x1b4   : > { %9246 = vmatprep.subr.bf16.mxu1 %v9775_v47  ;;  %v3299_v47 = vsel %vm3275_vm4, %v3297_v5, %v3298_v23 }
 0x1b5   : > { %9225 = vmatpush3.bf16.msra.mxu0 %v9776_v6  ;;  %v9797_v6 = vld [vmem:[%s12340_s3 + $0x5b0] sm:$0xff]  }
 0x1b6   : > { %9226 = vmatprep.subr.bf16.mxu0 %v9778_v9  ;;  %v9799_v9 = vld [vmem:[%s12340_s3 + $0x5e8] sm:$0xff]  }
 0x1b7   : > { %9247 = vmatpush3.bf16.msra.mxu1 %v9777_v42  ;;  %v9800_v42 = vld [vmem:[%s12340_s3 + $0x528] sm:$0xff]  }
 0x1b8   : > { %9248 = vmatprep.subr.bf16.mxu1 %v9779_v10  ;;  %v9802_v10 = vld [vmem:[%s12340_s3 + $0x560] sm:$0xff]  }
 0x1b9   : > { %9227 = vmatpush3.bf16.msra.mxu0 %v9780_v36  ;;  %v9801_v36 = vld [vmem:[%s12340_s3 + $0x5a8] sm:$0xff]  }
 0x1ba   : > { %9228 = vmatprep.subr.bf16.mxu0 %v9782_v60  ;;  %v9803_v60 = vld [vmem:[%s12340_s3 + $0x5e0] sm:$0xff]  }
 0x1bb   : > { %9249 = vmatpush3.bf16.msra.mxu1 %v9781_v16  ;;  %v9804_v16 = vld [vmem:[%s12340_s3 + $0x520] sm:$0xff]  }
 0x1bc   : > { %9250 = vmatprep.subr.bf16.mxu1 %v9783_v61  ;;  %v9805_v61 = vld [vmem:[%s12340_s3 + $0x5a0] sm:$0xff]  }
 0x1bd   : > { %9229 = vmatpush3.bf16.msra.mxu0 %v9784_v40  ;;  %v9807_v40 = vld [vmem:[%s12340_s3 + $0x5d8] sm:$0xff]  }
 0x1be   : > { %9230 = vmatprep.subr.bf16.mxu0 %v9786_v41  ;;  %v9808_v41 = vld [vmem:[%s12340_s3 + $0x518] sm:$0xff]  }
 0x1bf   : > { %9251 = vmatpush3.bf16.msra.mxu1 %v9785_v44  ;;  %v9814_v44 = vld [vmem:[%s12340_s3 + $0x548] sm:$0xff]  }
 0x1c0   : > { %9252 = vmatprep.subr.bf16.mxu1 %v9787_v1  ;;  %v9815_v1 = vld [vmem:[%s12340_s3 + $0x5c8] sm:$0xff]  }
 0x1c1   : > { %9231 = vmatpush3.bf16.msra.mxu0 %v9788_v18  ;;  %v9816_v18 = vld [vmem:[%s12340_s3 + $0x508] sm:$0xff]  }
 0x1c2   : > { %9260 = vmatprep.subr.bf16.mxu0 %v9790_v39  ;;  %v9817_v39 = vld [vmem:[%s12340_s3 + $0x588] sm:$0xff]  }
 0x1c3   : > { %9253 = vmatpush3.bf16.msra.mxu1 %v9789_v15  ;;  %v3128_v15 = vpack.c.bf16 %v3112_v28, %v3112_v28 }
 0x1c4   : > { %3725 = vmatmul.mubr.bf16.vlgmr.msra.gmra.mxu0 %v3278_v13  ;;  %9282 = vmatprep.subr.bf16.mxu1 %v9791_v24  ;;  %v3120_v24 = vpack.c.bf16 %v10751_v30, %v3104_v63  ;;  %v8407_v30 = vld [vmem:[%s12338_s1 + $0x1c0] sm:$0xff]  ;;  %v8408_v13 = vld [vmem:[%s12338_s1 + $0x1c8] sm:$0xff] }
 0x1c5   : > { %9261 = vmatpush3.bf16.msra.mxu0 %v9792_v58  ;;  %3806 = vmatprep.mubr.bf16.mxu0 %v3293_v45  ;;  %v3288_v58 = vrot.slane %v3118_v57, 1  ;;  %v3295_v2 = vrot.slane %v3128_v15, 1  ;;  %v8403_v45 = vld [vmem:[%s12338_s1 + $0x1a0] sm:$0xff]  ;;  %v8441_v5 = vcombine.low %v8408_v13, %v8412_v14 }
 0x1c6   : > { %9262 = vmatprep.subr.bf16.mxu0 %v9794_v7  ;;  %3766 = vmatmul.mubr.bf16.vlgmr.msra.gmra.mxu1 %v3284_v29  ;;  %v3294_v21 = vrot.slane %v3120_v24, 1  ;;  %v8411_v7 = vld [vmem:[%s12338_s1 + $0x1e0] sm:$0xff]  ;;  %v8400_v29 = vld [vmem:[%s12338_s1 + $0x188] sm:$0xff] }
 0x1c7   : > { %9283 = vmatpush3.bf16.msra.mxu1 %v9793_v22  ;;  %3847 = vmatprep.mubr.bf16.mxu1 %v3299_v47  ;;  %v3290_v59 = vsel %vm3275_vm4, %v3288_v58, %v3289_v4  ;;  %v8439_v3 = vcombine.low %v8407_v30, %v8411_v7  ;;  %v8440_v23 = vcombine.high %v8407_v30, %v8411_v7  ;;  %v8399_v22 = vld [vmem:[%s12338_s1 + $0x180] sm:$0xff] }
 0x1c8   : > { %9284 = vmatprep.subr.bf16.mxu1 %v9795_v46  ;;  %v3296_v12 = vsel %vm3275_vm4, %v3294_v21, %v3295_v2  ;;  %v8442_v46 = vcombine.high %v8408_v13, %v8412_v14  ;;  %v8391_v47 = vld [vmem:[%s12338_s1 + $0x140] sm:$0xff] }
 0x1c9   : > { %9263 = vmatpush3.bf16.msra.mxu0 %v9796_v53  ;;  %v8432_v53 = vcombine.high %v8399_v22, %v8403_v45 }
 0x1ca   : > { %9264 = vmatprep.subr.bf16.mxu0 %v9798_v62  ;;  %v8404_v62 = vld [vmem:[%s12338_s1 + $0x1a8] sm:$0xff] }
 0x1cb   : > { %9285 = vmatpush3.bf16.msra.mxu1 %v9797_v6  ;;  %v8434_v6 = vcombine.high %v8400_v29, %v8404_v62 }
 0x1cc   : > { %9286 = vmatprep.subr.bf16.mxu1 %v9799_v9  ;;  %v8395_v9 = vld [vmem:[%s12338_s1 + $0x160] sm:$0xff] }
 0x1cd   : > { %9265 = vmatpush3.bf16.msra.mxu0 %v9800_v42  ;;  %v8392_v42 = vld [vmem:[%s12338_s1 + $0x148] sm:$0xff] }
 0x1ce   : > { %9266 = vmatprep.subr.bf16.mxu0 %v9802_v10  ;;  %v8396_v10 = vld [vmem:[%s12338_s1 + $0x168] sm:$0xff] }
 0x1cf   : > { %9287 = vmatpush3.bf16.msra.mxu1 %v9801_v36  ;;  %v8431_v36 = vcombine.low %v8399_v22, %v8403_v45 }
 0x1d0   : > { %9288 = vmatprep.subr.bf16.mxu1 %v9803_v60  ;;  %v8433_v60 = vcombine.low %v8400_v29, %v8404_v62 }
 0x1d1   : > { %9267 = vmatpush3.bf16.msra.mxu0 %v9804_v16  ;;  %v8424_v16 = vcombine.high %v8391_v47, %v8395_v9 }
 0x1d2   : > { %9268 = vmatprep.subr.bf16.mxu0 %v9806_v37  ;;  %v8383_v37 = vld [vmem:[%s12338_s1 + $0x100] sm:$0xff] }
 0x1d3   : > { %9289 = vmatpush3.bf16.msra.mxu1 %v9805_v61  ;;  %v11232_v61 = vld [vmem:[%s12338_s1 + $0x1d0] sm:$0xff] }
 0x1d4   : > { %9290 = vmatprep.subr.bf16.mxu1 %v9807_v40  ;;  %v11237_v40 = vld [vmem:[%s12338_s1 + $0x1f0] sm:$0xff] }
 0x1d5   : > { %9269 = vmatpush3.bf16.msra.mxu0 %v9808_v41  ;;  %v8426_v41 = vcombine.high %v8392_v42, %v8396_v10 }
 0x1d6   : > { %9270 = vmatprep.subr.bf16.mxu0 %v9810_v11  ;;  %v8387_v11 = vld [vmem:[%s12338_s1 + $0x120] sm:$0xff] }
 0x1d7   : > { %9291 = vmatpush3.bf16.msra.mxu1 %v9809_v38  ;;  %v8443_v38 = vcombine.low %v11232_v61, %v11237_v40  ;;  %v8415_v20 = vcombine.low %v8383_v37, %v8387_v11 }
 0x1d8   : > { %9292 = vmatprep.subr.bf16.mxu1 %v9811_v17  ;;  %v11247_v17 = vld [vmem:[%s12338_s1 + $0x1d8] sm:$0xff] }
 0x1d9   : > { %9271 = vmatpush3.bf16.msra.mxu0 %v9812_v43  ;;  %v11252_v43 = vld [vmem:[%s12338_s1 + $0x1f8] sm:$0xff] }
 0x1da   : > { %9272 = vmatprep.subr.bf16.mxu0 %v9814_v44  ;;  %v8384_v44 = vld [vmem:[%s12338_s1 + $0x108] sm:$0xff]  ;;  %v8445_v48 = vcombine.low %v11247_v17, %v11252_v43 }
 0x1db   : > { %9293 = vmatpush3.bf16.msra.mxu1 %v9813_v0  ;;  %v8388_v0 = vld [vmem:[%s12338_s1 + $0x128] sm:$0xff] }
 0x1dc   : > { %9294 = vmatprep.subr.bf16.mxu1 %v9815_v1  ;;  %v8423_v1 = vcombine.low %v8391_v47, %v8395_v9  ;;  %v8418_v49 = vcombine.high %v8384_v44, %v8388_v0  ;;  %v8417_v28 = vcombine.low %v8384_v44, %v8388_v0 }
 0x1dd   : > { %9273 = vmatpush3.bf16.msra.mxu0 %v9816_v18  ;;  %v8425_v18 = vcombine.low %v8392_v42, %v8396_v10 }
 0x1de   : > { %9274 = vmatprep.subr.bf16.mxu0 %v9818_v19  ;;  %v8416_v19 = vcombine.high %v8383_v37, %v8387_v11 }
 0x1df   : > { %9295 = vmatpush3.bf16.msra.mxu1 %v9817_v39  ;;  %v8444_v39 = vcombine.high %v11232_v61, %v11237_v40  ;;  %v8386_v61 = vld [vmem:[%s12338_s1 + $0x118] sm:$0xff] }
 0x1e0   : > { %9296 = vmatprep.subr.bf16.mxu1 %v9819_v55  ;;  %v8446_v55 = vcombine.high %v11247_v17, %v11252_v43  ;;  %v8390_v40 = vld [vmem:[%s12338_s1 + $0x138] sm:$0xff] }
 0x1e1   : > { %9275 = vmatpush3.bf16.msra.mxu0 %v9820_v56 }
 0x1e2   : > { %4114 = vmatprep.subr.bf16.mxu0 %v8440_v23 }
 0x1e3   : > { %9297 = vmatpush3.bf16.msra.mxu1 %v9821_v33 }
 0x1e4   : > { %3807 = vmatmul.mubr.bf16.vlgmr.msra.gmra.mxu0 %v3290_v59  ;;  %4157 = vmatprep.subr.bf16.mxu1 %v8442_v46 }
 0x1e5   : > { %4138 = vmatprep.mubr.bf16.mxu0 %v10034_v8  ;;  %4115 = vmatpush1.bf16.msra.mxu0 %v8439_v3 }
 0x1e6   : > { %3848 = vmatmul.mubr.bf16.vlgmr.msra.gmra.mxu1 %v3296_v12  ;;  %4116 = vmatprep.subr.bf16.mxu0 %v8432_v53 }
 0x1e7   : > { %4181 = vmatprep.mubr.bf16.mxu1 %v10034_v8  ;;  %4158 = vmatpush1.bf16.msra.mxu1 %v8441_v5 }
 0x1e8   : > { %4159 = vmatprep.subr.bf16.mxu1 %v8434_v6 }
 0x1e9   : > { %4117 = vmatpush1.bf16.msra.mxu0 %v8431_v36 }
 0x1ea   : > { %4118 = vmatprep.subr.bf16.mxu0 %v8424_v16 }
 0x1eb   : > { %4160 = vmatpush1.bf16.msra.mxu1 %v8433_v60 }
 0x1ec   : > { %4161 = vmatprep.subr.bf16.mxu1 %v8426_v41 }
 0x1ed   : > { %4119 = vmatpush1.bf16.msra.mxu0 %v8423_v1 }
 0x1ee   : > { %4120 = vmatprep.subr.bf16.mxu0 %v8416_v19 }
 0x1ef   : > { %4162 = vmatpush1.bf16.msra.mxu1 %v8425_v18 }
 0x1f0   : > { %4163 = vmatprep.subr.bf16.mxu1 %v8418_v49 }
 0x1f1   : > { %4121 = vmatpush1.bf16.msra.mxu0 %v8415_v20 }
 0x1f2   : > { %4200 = vmatprep.subr.bf16.mxu0 %v8444_v39 }
 0x1f3   : > { %4164 = vmatpush1.bf16.msra.mxu1 %v8417_v28 }
 0x1f4   : > { %4243 = vmatprep.subr.bf16.mxu1 %v8446_v55 }
 0x204   : > { %v9056_v56 = vpop.f32.mrf.mxu0 }
 0x206   : > { %v9078_v57 = vpop.f32.mrf.mxu1  ;;  %v9057_v63 = vpop.f32.mrf.mxu0 }
 0x207   : > { %v9058_v60 = vadd.f32 %v9057_v63, %v9056_v56 }
 0x208   : > { %v9079_v15 = vpop.f32.mrf.mxu1  ;;  %v9059_v4 = vpop.f32.mrf.mxu0 }
 0x209   : > { %v9080_v16 = vadd.f32 %v9079_v15, %v9078_v57 }
 0x20a   : > { %v9081_v33 = vpop.f32.mrf.mxu1  ;;  %v9060_v24 = vpop.f32.mrf.mxu0 }
 0x20b   : > { %v2462_v0 = vadd.f32 %v9080_v16, %v9058_v60  ;;  %v9061_v1 = vadd.f32 %v9060_v24, %v9059_v4 }
 0x20c   : > { %v9082_v58 = vpop.f32.mrf.mxu1 }
 0x20d   : > { %v9083_v18 = vadd.f32 %v9082_v58, %v9081_v33 }
 0x20f   : > { %v2465_v39 = vadd.f32 %v9083_v18, %v9061_v1 }
 0x224   : > { %v9100_v2 = vpop.f32.mrf.mxu0 }
 0x226   : > { %v9122_v59 = vpop.f32.mrf.mxu1  ;;  %v9101_v21 = vpop.f32.mrf.mxu0 }
 0x227   : > { %v9102_v11 = vadd.f32 %v9101_v21, %v9100_v2 }
 0x228   : > { %v9123_v12 = vpop.f32.mrf.mxu1  ;;  %v9103_v30 = vpop.f32.mrf.mxu0 }
 0x229   : > { %v2503_v49 = vadd.f32 %v9102_v11, %v2462_v0  ;;  %v9124_v55 = vadd.f32 %v9123_v12, %v9122_v59 }
 0x22a   : > { %v9125_v7 = vpop.f32.mrf.mxu1  ;;  %v9104_v13 = vpop.f32.mrf.mxu0 }
 0x22b   : > { %v9105_v20 = vadd.f32 %v9104_v13, %v9103_v30  ;;  %v2544_v52 = vadd.f32 %v9124_v55, %v2503_v49 }
 0x22c   : > { %v9126_v3 = vpop.f32.mrf.mxu1 }
 0x22d   : > { %v2506_v51 = vadd.f32 %v9105_v20, %v2465_v39  ;;  %v9127_v56 = vadd.f32 %v9126_v3, %v9125_v7 }
 0x22f   : > { %v2547_v60 = vadd.f32 %v9127_v56, %v2506_v51 }
 0x244   : > { %v9144_v23 = vpop.f32.mrf.mxu0 }
 0x246   : > { %v9166_v14 = vpop.f32.mrf.mxu1  ;;  %v9145_v22 = vpop.f32.mrf.mxu0 }
 0x247   : > { %v9146_v54 = vadd.f32 %v9145_v22, %v9144_v23 }
 0x248   : > { %v9167_v45 = vpop.f32.mrf.mxu1  ;;  %v9147_v5 = vpop.f32.mrf.mxu0 }
 0x249   : > { %v2969_v57 = vadd.f32 %v9146_v54, %v2544_v52  ;;  %v9168_v4 = vadd.f32 %v9167_v45, %v9166_v14 }
 0x24a   : > { %v9169_v46 = vpop.f32.mrf.mxu1  ;;  %v9148_v53 = vpop.f32.mrf.mxu0 }
 0x24b   : > { %v9149_v63 = vadd.f32 %v9148_v53, %v9147_v5  ;;  %v3010_v30 = vadd.f32 %v9168_v4, %v2969_v57  ;;  %v8402_v57 = vld [vmem:[%s12338_s1 + $0x198] sm:$0xff] }
 0x24c   : > { %v9170_v29 = vpop.f32.mrf.mxu1 }
 0x24d   : > { %v2972_v13 = vadd.f32 %v9149_v63, %v2547_v60  ;;  %v9171_v0 = vadd.f32 %v9170_v29, %v9169_v46  ;;  %v8406_v63 = vld [vmem:[%s12338_s1 + $0x1b8] sm:$0xff] }
 0x24e   : > { %v8438_v4 = vcombine.high %v8402_v57, %v8406_v63 }
 0x24f   : > { %v3013_v53 = vadd.f32 %v9171_v0, %v2972_v13  ;;  %v3904_v0 = vld [vmem:[%s12338_s1 + $0xe0] sm:$0xff] }
 0x264   : > { %v9188_v62 = vpop.f32.mrf.mxu0 }
 0x266   : > { %v9210_v47 = vpop.f32.mrf.mxu1  ;;  %v9189_v6 = vpop.f32.mrf.mxu0 }
 0x267   : > { %v9190_v33 = vadd.f32 %v9189_v6, %v9188_v62 }
 0x268   : > { %v9211_v9 = vpop.f32.mrf.mxu1  ;;  %v9191_v42 = vpop.f32.mrf.mxu0 }
 0x269   : > { %v3051_v7 = vadd.f32 %v9190_v33, %v3010_v30  ;;  %v9212_v51 = vadd.f32 %v9211_v9, %v9210_v47  ;;  %v8393_v33 = vld [vmem:[%s12338_s1 + $0x150] sm:$0xff]  ;;  %v8398_v30 = vld [vmem:[%s12338_s1 + $0x178] sm:$0xff] }
 0x26a   : > { %v9213_v10 = vpop.f32.mrf.mxu1  ;;  %v9192_v36 = vpop.f32.mrf.mxu0 }
 0x26b   : > { %v9193_v52 = vadd.f32 %v9192_v36, %v9191_v42 }
 0x26c   : > { %v9214_v37 = vpop.f32.mrf.mxu1 }
 0x26d   : > { %v3054_v1 = vadd.f32 %v9193_v52, %v3013_v53  ;;  %v9215_v29 = vadd.f32 %v9214_v37, %v9213_v10  ;;  %v8401_v10 = vld [vmem:[%s12338_s1 + $0x190] sm:$0xff]  ;;  %v3905_v52 = vld [vmem:[%s12338_s1 + $0xe8] sm:$0xff] }
 0x26e   : > { %v8405_v37 = vld [vmem:[%s12338_s1 + $0x1b0] sm:$0xff] }
 0x26f   : > { %v8436_v60 = vcombine.high %v8401_v10, %v8405_v37  ;;  %v8435_v13 = vcombine.low %v8401_v10, %v8405_v37  ;;  %v3902_v10 = vld [vmem:[%s12338_s1 + $0xd0] sm:$0xff] }
 0x270   : > { %v3906_v37 = vld [vmem:[%s12338_s1 + $0xf0] sm:$0xff] }
 0x284   : > { %v9232_v41 = vpop.f32.mrf.mxu0 }
 0x286   : > { %v9254_v44 = vpop.f32.mrf.mxu1  ;;  %v9233_v19 = vpop.f32.mrf.mxu0 }
 0x287   : > { %v9234_v2 = vadd.f32 %v9233_v19, %v9232_v41  ;;  %v3095_v19 = vadd.f32 %v9215_v29, %v3054_v1 }
 0x288   : > { %v9255_v28 = vpop.f32.mrf.mxu1  ;;  %v9235_v50 = vpop.f32.mrf.mxu0 }
 0x289   : > { %v9256_v21 = vadd.f32 %v9255_v28, %v9254_v44  ;;  %v3092_v44 = vadd.f32 %v9212_v51, %v3051_v7  ;;  %v3901_v7 = vld [vmem:[%s12338_s1 + $0xc8] sm:$0xff]  ;;  %v3892_v51 = vld [vmem:[%s12338_s1 + $0x80] sm:$0xff] }
 0x28a   : > { %v9257_v35 = vpop.f32.mrf.mxu1  ;;  %v9236_v15 = vpop.f32.mrf.mxu0  ;;  %v8478_v53 = vcombine.high %v3901_v7, %v3905_v52 }
 0x28b   : > { %v3768_v59 = vadd.f32 %v9256_v21, %v9234_v2  ;;  %v9237_v12 = vadd.f32 %v9236_v15, %v9235_v50 }
 0x28c   : > { %v9258_v24 = vpop.f32.mrf.mxu1 }
 0x28d   : > { %v9259_v23 = vadd.f32 %v9258_v24, %v9257_v35  ;;  %v8382_v35 = vld [vmem:[%s12341_s4] ss:$0 sm:$0xff]  ;;  %v8397_v24 = vld [vmem:[%s12338_s1 + $0x170] sm:$0xff] }
 0x28f   : > { %v3771_v62 = vadd.f32 %v9259_v23, %v9237_v12  ;;  %v8385_v23 = vld [vmem:[%s12338_s1 + $0x110] sm:$0xff] }
 0x2a4   : > { %v9276_v58 = vpop.f32.mrf.mxu0 }
 0x2a6   : > { %v9277_v16 = vpop.f32.mrf.mxu0  ;;  %v9298_v22 = vpop.f32.mrf.mxu1 }
 0x2a7   : > { %v9278_v11 = vadd.f32 %v9277_v16, %v9276_v58  ;;  %v8394_v58 = vld [vmem:[%s12338_s1 + $0x158] sm:$0xff]  ;;  %v8437_v16 = vcombine.low %v8402_v57, %v8406_v63 }
 0x2a8   : > { %v9279_v54 = vpop.f32.mrf.mxu0  ;;  %v9299_v5 = vpop.f32.mrf.mxu1  ;;  %v8430_v12 = vcombine.high %v8394_v58, %v8398_v30  ;;  %v8429_v17 = vcombine.low %v8394_v58, %v8398_v30  ;;  %v3903_v57 = vld [vmem:[%s12338_s1 + $0xd8] sm:$0xff] }
 0x2a9   : > { %v3809_v3 = vadd.f32 %v9278_v11, %v3768_v59  ;;  %v9300_v14 = vadd.f32 %v9299_v5, %v9298_v22  ;;  %v8428_v59 = vcombine.high %v8393_v33, %v8397_v24  ;;  %v8389_v22 = vld [vmem:[%s12338_s1 + $0x130] sm:$0xff]  ;;  %v3900_v11 = vld [vmem:[%s12338_s1 + $0xc0] sm:$0xff]  ;;  %v3907_v63 = vld [vmem:[%s12338_s1 + $0xf8] sm:$0xff] }
 0x2aa   : > { %v9280_v45 = vpop.f32.mrf.mxu0  ;;  %v9301_v6 = vpop.f32.mrf.mxu1  ;;  %v8420_v43 = vcombine.high %v8385_v23, %v8389_v22  ;;  %v8476_v5 = vcombine.high %v3900_v11, %v3904_v0  ;;  %v3895_v58 = vld [vmem:[%s12338_s1 + $0x98] sm:$0xff] }
 0x2ab   : > { %v9281_v41 = vadd.f32 %v9280_v45, %v9279_v54  ;;  %v3850_v18 = vadd.f32 %v9300_v14, %v3809_v3  ;;  %v8419_v54 = vcombine.low %v8385_v23, %v8389_v22  ;;  %v8421_v3 = vcombine.low %v8386_v61, %v8390_v40  ;;  %v3896_v14 = vld [vmem:[%s12338_s1 + $0xa0] sm:$0xff]  ;;  %v3893_v45 = vld [vmem:[%s12338_s1 + $0x88] sm:$0xff]  ;;  %v3899_v30 = vld [vmem:[%s12338_s1 + $0xb8] sm:$0xff] }
 0x2ac   : > { %v9302_v46 = vpop.f32.mrf.mxu1  ;;  %v8467_v29 = vcombine.low %v3892_v51, %v3896_v14  ;;  %v8474_v22 = vcombine.high %v3895_v58, %v3899_v30 }
 0x2ad   : > { %v3812_v50 = vadd.f32 %v9281_v41, %v3771_v62  ;;  %v3856_v42 = vadd.f32 %v3850_v18, %v3092_v44  ;;  %v9303_v36 = vadd.f32 %v9302_v46, %v9301_v6  ;;  %v3897_v62 = vld [vmem:[%s12338_s1 + $0xa8] sm:$0xff]  ;;  %v8475_v6 = vcombine.low %v3900_v11, %v3904_v0  ;;  %v3884_v18 = vld [vmem:[%s12338_s1 + $0x40] sm:$0xff] }
 0x2ae   : > { %v8477_v41 = vcombine.low %v3901_v7, %v3905_v52  ;;  %v8468_v44 = vcombine.high %v3892_v51, %v3896_v14  ;;  %v8470_v1 = vcombine.high %v3893_v45, %v3897_v62  ;;  %v3889_v46 = vld [vmem:[%s12338_s1 + $0x68] sm:$0xff]  ;;  %v3878_v7 = vld [vmem:[%s12338_s1 + $0x10] sm:$0xff] }
 0x2af   : > { %v3865_v49 = vadd.f32 %v8382_v35, %v3856_v42  ;;  %v3853_v47 = vadd.f32 %v9303_v36, %v3812_v50  ;;  %v3885_v50 = vld [vmem:[%s12338_s1 + $0x48] sm:$0xff]  ;;  %v8469_v42 = vcombine.low %v3893_v45, %v3897_v62  ;;  %v3882_v52 = vld [vmem:[%s12338_s1 + $0x30] sm:$0xff]  ;;  %v8511_v45 = vld [vmem:[%s12338_s1 + $0x2c0] sm:$0xff] }
 0x2b0   : > { %v8456_v51 = vcombine.high %v3878_v7, %v3882_v52  ;;  %v8515_v62 = vld [vmem:[%s12338_s1 + $0x2e0] sm:$0xff] }
 0x2b1   : > { %v3867_v9 = vmax.f32 %v3865_v49, 0.0  ;;  %v3857_v20 = vadd.f32 %v3853_v47, %v3095_v19  ;;  %v8462_v19 = vcombine.high %v3885_v50, %v3889_v46  ;;  %v3876_v49 = vld [vmem:[%s12338_s1] sm:$0xff] }
 0x2b2   : > { %v3880_v47 = vld [vmem:[%s12338_s1 + $0x20] sm:$0xff] }
 0x2b3   : > { %v3869_v28 = vadd.f32 %v3867_v9, %v10149_v26  ;;  %v3866_v39 = vadd.f32 %v8382_v35, %v3857_v20  ;;  %v3888_v35 = vld [vmem:[%s12338_s1 + $0x60] sm:$0xff]  ;;  %v3877_v9 = vld [vmem:[%s12338_s1 + $0x8] sm:$0xff] }
 0x2b4   : > { %v8460_v36 = vcombine.high %v3884_v18, %v3888_v35  ;;  %v3881_v20 = vld [vmem:[%s12338_s1 + $0x28] sm:$0xff] }
 0x2b5   : > { %3871 = vst.msk [vmem:[#allocation2 + $0x1] sm:$0xff] %vm290_vm1, %v3869_v28  ;;  %v3868_v55 = vmax.f32 %v3866_v39, 0.0  ;;  %v8459_v28 = vcombine.low %v3884_v18, %v3888_v35  ;;  %v8461_v39 = vcombine.low %v3885_v50, %v3889_v46  ;;  %v8544_v18 = vcombine.high %v8511_v45, %v8515_v62  ;;  %v8503_v50 = vld [vmem:[%s12338_s1 + $0x280] sm:$0xff] }
 0x2b6   : > { %v8507_v46 = vld [vmem:[%s12338_s1 + $0x2a0] sm:$0xff] }
 0x2b7   : > { %v3870_v56 = vadd.f32 %v3868_v55, %v10151_v27  ;;  %v8452_v55 = vcombine.high %v3876_v49, %v3880_v47 }
 0x2b9   : > { %3872 = vst.msk [vmem:[#allocation2 + $0x9] sm:$0xff] %vm290_vm1, %v3870_v56  ;;  %v8454_v56 = vcombine.high %v3877_v9, %v3881_v20 }
 0x2bc   : > { %v3908_v15 = vld [vmem:[#allocation2 + $0x1] sm:$0xff] }
 0x2c0   : > { %v3909_v2 = vld [vmem:[#allocation2 + $0x9] sm:$0xff] }
 0x2c1   : > { %v3910_v21 = vpack.c.bf16 %v3909_v2, %v3908_v15  ;;  %v8451_v15 = vcombine.low %v3876_v49, %v3880_v47  ;;  %v8453_v2 = vcombine.low %v3877_v9, %v3881_v20  ;;  %v8536_v49 = vcombine.high %v8503_v50, %v8507_v46  ;;  %v8495_v9 = vld [vmem:[%s12338_s1 + $0x240] sm:$0xff] }
 0x2c2   : > { %v8499_v20 = vld [vmem:[%s12338_s1 + $0x260] sm:$0xff] }
 0x2c3   : > { %8447 = vmatmul.mubr.msk.bf16.vlgmr.msra.gmra.mxu0 %vm290_vm1, %v3910_v21  ;;  %8448 = vmatmul.mubr.msk.bf16.vlgmr.msra.gmra.mxu1 %vm290_vm1, %v3910_v21 }
 0x2c4   : > { %4201 = vmatpush1.bf16.msra.mxu0 %v8443_v38  ;;  %4244 = vmatpush1.bf16.msra.mxu1 %v8445_v48  ;;  %v8427_v38 = vcombine.low %v8393_v33, %v8397_v24  ;;  %v8422_v48 = vcombine.high %v8386_v61, %v8390_v40  ;;  %v3898_v33 = vld [vmem:[%s12338_s1 + $0xb0] sm:$0xff]  ;;  %v3874_v24 = vld [vmem:[#allocation2 + $0x8] sm:$0xff] }
 0x2c5   : > { %4202 = vmatprep.subr.bf16.mxu0 %v8436_v60  ;;  %4245 = vmatprep.subr.bf16.mxu1 %v8438_v4  ;;  %v8482_v60 = vcombine.high %v3903_v57, %v3907_v63  ;;  %v3894_v4 = vld [vmem:[%s12338_s1 + $0x90] sm:$0xff] }
 0x2c6   : > { %4224 = vmatprep.mubr.bf16.mxu0 %v10034_v8  ;;  %4267 = vmatprep.mubr.bf16.mxu1 %v10034_v8  ;;  %v8472_v23 = vcombine.high %v3894_v4, %v3898_v33  ;;  %v3886_v61 = vld [vmem:[%s12338_s1 + $0x50] sm:$0xff] }
 0x2c7   : > { %v3890_v40 = vld [vmem:[%s12338_s1 + $0x70] sm:$0xff] }
 0x2c8   : > { %4203 = vmatpush1.bf16.msra.mxu0 %v8435_v13  ;;  %4246 = vmatpush1.bf16.msra.mxu1 %v8437_v16  ;;  %v3873_v13 = vld [vmem:[#allocation2] sm:$0xff]  ;;  %v8479_v16 = vcombine.low %v3902_v10, %v3906_v37  ;;  %v8464_v11 = vcombine.high %v3886_v61, %v3890_v40 }
 0x2c9   : > { %4204 = vmatprep.subr.bf16.mxu0 %v8428_v59  ;;  %4247 = vmatprep.subr.bf16.mxu1 %v8430_v12  ;;  %v8481_v59 = vcombine.low %v3903_v57, %v3907_v63  ;;  %v3875_v12 = vpack.c.bf16 %v3874_v24, %v3873_v13  ;;  %v8487_v57 = vld [vmem:[%s12338_s1 + $0x200] sm:$0xff]  ;;  %v8513_v24 = vld [vmem:[%s12338_s1 + $0x2d0] sm:$0xff]  ;;  %v8518_v13 = vld [vmem:[%s12338_s1 + $0x2f8] sm:$0xff] }
 0x2ca   : > { %v8491_v63 = vld [vmem:[%s12338_s1 + $0x220] sm:$0xff] }
 0x2cc   : > { %4205 = vmatpush1.bf16.msra.mxu0 %v8427_v38  ;;  %4248 = vmatpush1.bf16.msra.mxu1 %v8429_v17  ;;  %v3887_v38 = vld [vmem:[%s12338_s1 + $0x58] sm:$0xff] }
 0x2cd   : > { %4206 = vmatprep.subr.bf16.mxu0 %v8420_v43  ;;  %4249 = vmatprep.subr.bf16.mxu1 %v8422_v48  ;;  %v3891_v17 = vld [vmem:[%s12338_s1 + $0x78] sm:$0xff]  ;;  %v8471_v43 = vcombine.low %v3894_v4, %v3898_v33  ;;  %v8473_v48 = vcombine.low %v3895_v58, %v3899_v30  ;;  %v8520_v4 = vcombine.high %v8487_v57, %v8491_v63  ;;  %v8517_v58 = vld [vmem:[%s12338_s1 + $0x2f0] sm:$0xff] }
 0x2ce   : > { %v8466_v0 = vcombine.high %v3887_v38, %v3891_v17  ;;  %v8514_v30 = vld [vmem:[%s12338_s1 + $0x2d8] sm:$0xff] }
 0x2d0   : > { %4207 = vmatpush1.bf16.msra.mxu0 %v8419_v54  ;;  %4250 = vmatpush1.bf16.msra.mxu1 %v8421_v3  ;;  %v3879_v54 = vld [vmem:[%s12338_s1 + $0x18] sm:$0xff] }
 0x2d1   : > { %4449 = vmatprep.subr.bf16.mxu0 %v8476_v5  ;;  %4492 = vmatprep.subr.bf16.mxu1 %v8478_v53  ;;  %v3883_v3 = vld [vmem:[%s12338_s1 + $0x38] sm:$0xff]  ;;  %v8463_v5 = vcombine.low %v3886_v61, %v3890_v40  ;;  %v8465_v53 = vcombine.low %v3887_v38, %v3891_v17  ;;  %v8509_v61 = vld [vmem:[%s12338_s1 + $0x2b0] sm:$0xff]  ;;  %v4613_v38 = vld [vmem:[#allocation2 + $0x2] sm:$0xff] }
 0x2d2   : > { %v8458_v14 = vcombine.high %v3879_v54, %v3883_v3  ;;  %v8506_v40 = vld [vmem:[%s12338_s1 + $0x298] sm:$0xff]  ;;  %v4614_v17 = vld [vmem:[#allocation2 + $0xa] sm:$0xff] }
 0x2d3   : > { %8449 = vmatmul.mubr.msk.bf16.vlgmr.msra.gmra.mxu0 %vm290_vm1, %v3910_v21  ;;  %8450 = vmatmul.mubr.msk.bf16.vlgmr.msra.gmra.mxu1 %vm290_vm1, %v3910_v21  ;;  %v8480_v21 = vcombine.high %v3902_v10, %v3906_v37  ;;  %v8528_v10 = vcombine.high %v8495_v9, %v8499_v20 }
 0x2d4   : > { %4450 = vmatpush1.bf16.msra.mxu0 %v8475_v6  ;;  %4493 = vmatpush1.bf16.msra.mxu1 %v8477_v41  ;;  %v8512_v6 = vld [vmem:[%s12338_s1 + $0x2c8] sm:$0xff] }
 0x2d5   : > { %4451 = vmatprep.subr.bf16.mxu0 %v8468_v44  ;;  %4494 = vmatprep.subr.bf16.mxu1 %v8470_v1  ;;  %v8516_v41 = vld [vmem:[%s12338_s1 + $0x2e8] sm:$0xff]  ;;  %v8455_v44 = vcombine.low %v3878_v7, %v3882_v52  ;;  %v8457_v1 = vcombine.low %v3879_v54, %v3883_v3  ;;  %v8497_v54 = vld [vmem:[%s12338_s1 + $0x250] sm:$0xff] }
 0x2d6   : > { %4473 = vmatprep.mubr.bf16.mxu0 %v10034_v8  ;;  %4516 = vmatprep.mubr.bf16.mxu1 %v10034_v8  ;;  %v8546_v35 = vcombine.high %v8512_v6, %v8516_v41  ;;  %v8501_v3 = vld [vmem:[%s12338_s1 + $0x270] sm:$0xff] }
 0x2d8   : > { %4452 = vmatpush1.bf16.msra.mxu0 %v8467_v29  ;;  %4495 = vmatpush1.bf16.msra.mxu1 %v8469_v42  ;;  %v8504_v29 = vld [vmem:[%s12338_s1 + $0x288] sm:$0xff] }
 0x2d9   : > { %4453 = vmatprep.subr.bf16.mxu0 %v8460_v36  ;;  %4496 = vmatprep.subr.bf16.mxu1 %v8462_v19  ;;  %v8508_v42 = vld [vmem:[%s12338_s1 + $0x2a8] sm:$0xff]  ;;  %v8543_v36 = vcombine.low %v8511_v45, %v8515_v62  ;;  %v8545_v19 = vcombine.low %v8512_v6, %v8516_v41  ;;  %v8532_v45 = vcombine.high %v8497_v54, %v8501_v3  ;;  %v8489_v6 = vld [vmem:[%s12338_s1 + $0x210] sm:$0xff] }
 0x2da   : > { %v8538_v47 = vcombine.high %v8504_v29, %v8508_v42  ;;  %v8493_v41 = vld [vmem:[%s12338_s1 + $0x230] sm:$0xff] }
 0x2dc   : > { %4454 = vmatpush1.bf16.msra.mxu0 %v8459_v28  ;;  %4497 = vmatpush1.bf16.msra.mxu1 %v8461_v39  ;;  %v8496_v28 = vld [vmem:[%s12338_s1 + $0x248] sm:$0xff] }
 0x2dd   : > { %4455 = vmatprep.subr.bf16.mxu0 %v8452_v55  ;;  %4498 = vmatprep.subr.bf16.mxu1 %v8454_v56  ;;  %v8500_v39 = vld [vmem:[%s12338_s1 + $0x268] sm:$0xff]  ;;  %v8535_v55 = vcombine.low %v8503_v50, %v8507_v46  ;;  %v8537_v56 = vcombine.low %v8504_v29, %v8508_v42  ;;  %v8524_v50 = vcombine.high %v8489_v6, %v8493_v41 }
 0x2de   : > { %v8530_v37 = vcombine.high %v8496_v28, %v8500_v39  ;;  %v8523_v29 = vcombine.low %v8489_v6, %v8493_v41 }
 0x2e0   : > { %4456 = vmatpush1.bf16.msra.mxu0 %v8451_v15  ;;  %4499 = vmatpush1.bf16.msra.mxu1 %v8453_v2  ;;  %v8488_v15 = vld [vmem:[%s12338_s1 + $0x208] sm:$0xff] }
 0x2e1   : > { %4535 = vmatprep.subr.bf16.mxu0 %v8480_v21  ;;  %4578 = vmatprep.subr.bf16.mxu1 %v8482_v60  ;;  %v8492_v2 = vld [vmem:[%s12338_s1 + $0x228] sm:$0xff]  ;;  %v8527_v21 = vcombine.low %v8495_v9, %v8499_v20  ;;  %v8529_v60 = vcombine.low %v8496_v28, %v8500_v39  ;;  %v9827_v9 = vld [vmem:[%s12340_s3 + $0x2f0] sm:$0xff]  }
 0x2e2   : > { %v8522_v33 = vcombine.high %v8488_v15, %v8492_v2  ;;  %v9828_v20 = vld [vmem:[%s12340_s3 + $0x230] sm:$0xff]   ;;  %v9830_v39 = vld [vmem:[%s12340_s3 + $0x268] sm:$0xff]  }
 0x2e3   : > { %8483 = vmatmul.mubr.msk.bf16.vlgmr.msra.gmra.mxu0 %vm290_vm1, %v3875_v12  ;;  %8484 = vmatmul.mubr.msk.bf16.vlgmr.msra.gmra.mxu1 %vm290_vm1, %v3875_v12  ;;  %v9829_v28 = vld [vmem:[%s12340_s3 + $0x2b0] sm:$0xff]  }
 0x2e4   : > { %4536 = vmatpush1.bf16.msra.mxu0 %v8479_v16  ;;  %4579 = vmatpush1.bf16.msra.mxu1 %v8481_v59  ;;  %v8519_v16 = vcombine.low %v8487_v57, %v8491_v63  ;;  %v8521_v59 = vcombine.low %v8488_v15, %v8492_v2  ;;  %v9835_v57 = vld [vmem:[%s12340_s3 + $0x2e0] sm:$0xff]   ;;  %v9838_v2 = vld [vmem:[%s12340_s3 + $0x258] sm:$0xff]  }
 0x2e5   : > { %4537 = vmatprep.subr.bf16.mxu0 %v8472_v23  ;;  %4580 = vmatprep.subr.bf16.mxu1 %v8474_v22  ;;  %v8550_v23 = vcombine.high %v8514_v30, %v8518_v13  ;;  %v8505_v22 = vld [vmem:[%s12338_s1 + $0x290] sm:$0xff]  ;;  %v9836_v63 = vld [vmem:[%s12340_s3 + $0x220] sm:$0xff]  }
 0x2e6   : > { %4559 = vmatprep.mubr.bf16.mxu0 %v10034_v8  ;;  %4602 = vmatprep.mubr.bf16.mxu1 %v10034_v8  ;;  %v8540_v7 = vcombine.high %v8505_v22, %v8509_v61  ;;  %v9837_v15 = vld [vmem:[%s12340_s3 + $0x2a0] sm:$0xff]  }
 0x2e8   : > { %4538 = vmatpush1.bf16.msra.mxu0 %v8471_v43  ;;  %4581 = vmatpush1.bf16.msra.mxu1 %v8473_v48  ;;  %v8510_v43 = vld [vmem:[%s12338_s1 + $0x2b8] sm:$0xff]  ;;  %v8547_v48 = vcombine.low %v8513_v24, %v8517_v58 }
 0x2e9   : > { %4539 = vmatprep.subr.bf16.mxu0 %v8464_v11  ;;  %4582 = vmatprep.subr.bf16.mxu1 %v8466_v0  ;;  %v8549_v11 = vcombine.low %v8514_v30, %v8518_v13  ;;  %v4615_v0 = vpack.c.bf16 %v4614_v17, %v4613_v38  ;;  %v8542_v52 = vcombine.high %v8506_v40, %v8510_v43  ;;  %v9845_v30 = vld [vmem:[%s12340_s3 + $0x290] sm:$0xff]   ;;  %v9846_v13 = vld [vmem:[%s12340_s3 + $0x248] sm:$0xff]   ;;  %v9854_v38 = vld [vmem:[%s12340_s3 + $0x378] sm:$0xff]  }
 0x2ea   : > { %v9855_v17 = vld [vmem:[%s12340_s3 + $0x3f8] sm:$0xff]  }
 0x2ec   : > { %4540 = vmatpush1.bf16.msra.mxu0 %v8463_v5  ;;  %4583 = vmatpush1.bf16.msra.mxu1 %v8465_v53  ;;  %v8498_v5 = vld [vmem:[%s12338_s1 + $0x258] sm:$0xff] }
 0x2ed   : > { %4541 = vmatprep.subr.bf16.mxu0 %v8456_v51  ;;  %4584 = vmatprep.subr.bf16.mxu1 %v8458_v14  ;;  %v8502_v53 = vld [vmem:[%s12338_s1 + $0x278] sm:$0xff]  ;;  %v8539_v51 = vcombine.low %v8505_v22, %v8509_v61  ;;  %v8541_v14 = vcombine.low %v8506_v40, %v8510_v43  ;;  %v9851_v22 = vld [vmem:[%s12340_s3 + $0x2c0] sm:$0xff]  }
 0x2ee   : > { %v8534_v62 = vcombine.high %v8498_v5, %v8502_v53  ;;  %v9852_v61 = vld [vmem:[%s12340_s3 + $0x200] sm:$0xff]  }
 0x2ef   : > { %v9853_v40 = vld [vmem:[%s12340_s3 + $0x280] sm:$0xff]  }
 0x2f0   : > { %4542 = vmatpush1.bf16.msra.mxu0 %v8455_v44  ;;  %4585 = vmatpush1.bf16.msra.mxu1 %v8457_v1  ;;  %v8490_v44 = vld [vmem:[%s12338_s1 + $0x218] sm:$0xff] }
 0x2f1   : > { %4819 = vmatprep.subr.bf16.mxu0 %v8544_v18  ;;  %4862 = vmatprep.subr.bf16.mxu1 %v8546_v35  ;;  %v8494_v1 = vld [vmem:[%s12338_s1 + $0x238] sm:$0xff]  ;;  %v8531_v18 = vcombine.low %v8497_v54, %v8501_v3  ;;  %v8533_v35 = vcombine.low %v8498_v5, %v8502_v53 }
 0x2f2   : > { %v8526_v46 = vcombine.high %v8490_v44, %v8494_v1  ;;  %v8525_v42 = vcombine.low %v8490_v44, %v8494_v1 }
 0x2f3   : > { %8485 = vmatmul.mubr.msk.bf16.vlgmr.msra.gmra.mxu0 %vm290_vm1, %v3875_v12  ;;  %8486 = vmatmul.mubr.msk.bf16.vlgmr.msra.gmra.mxu1 %vm290_vm1, %v3875_v12  ;;  %v8548_v12 = vcombine.high %v8513_v24, %v8517_v58  ;;  %v9843_v24 = vld [vmem:[%s12340_s3 + $0x2d0] sm:$0xff]  }
 0x2f4   : > { %4820 = vmatpush1.bf16.msra.mxu0 %v8543_v36  ;;  %4863 = vmatpush1.bf16.msra.mxu1 %v8545_v19  ;;  %v9823_v36 = vld [vmem:[%s12340_s3 + $0x2f8] sm:$0xff]   ;;  %v9844_v58 = vld [vmem:[%s12340_s3 + $0x210] sm:$0xff]  }
 0x2f5   : > { %4821 = vmatprep.subr.bf16.mxu0 %v8536_v49  ;;  %4864 = vmatprep.subr.bf16.mxu1 %v8538_v47  ;;  %v9824_v19 = vld [vmem:[%s12340_s3 + $0x238] sm:$0xff]   ;;  %v9826_v47 = vld [vmem:[%s12340_s3 + $0x270] sm:$0xff]  }
 0x2f6   : > { %4843 = vmatprep.mubr.bf16.mxu0 %v10034_v8  ;;  %4886 = vmatprep.mubr.bf16.mxu1 %v10034_v8  ;;  %v9825_v49 = vld [vmem:[%s12340_s3 + $0x2b8] sm:$0xff]  }
 0x2f8   : > { %4822 = vmatpush1.bf16.msra.mxu0 %v8535_v55  ;;  %4865 = vmatpush1.bf16.msra.mxu1 %v8537_v56  ;;  %v9831_v55 = vld [vmem:[%s12340_s3 + $0x2e8] sm:$0xff]  }
 0x2f9   : > { %4823 = vmatprep.subr.bf16.mxu0 %v8528_v10  ;;  %4866 = vmatprep.subr.bf16.mxu1 %v8530_v37  ;;  %v9832_v56 = vld [vmem:[%s12340_s3 + $0x228] sm:$0xff]   ;;  %v9834_v37 = vld [vmem:[%s12340_s3 + $0x260] sm:$0xff]  }
 0x2fa   : > { %v9833_v10 = vld [vmem:[%s12340_s3 + $0x2a8] sm:$0xff]  }
 0x2fc   : > { %4824 = vmatpush1.bf16.msra.mxu0 %v8527_v21  ;;  %4867 = vmatpush1.bf16.msra.mxu1 %v8529_v60  ;;  %v9839_v21 = vld [vmem:[%s12340_s3 + $0x2d8] sm:$0xff]  }
 0x2fd   : > { %4825 = vmatprep.subr.bf16.mxu0 %v8520_v4  ;;  %4868 = vmatprep.subr.bf16.mxu1 %v8522_v33  ;;  %v9840_v60 = vld [vmem:[%s12340_s3 + $0x218] sm:$0xff]   ;;  %v9842_v33 = vld [vmem:[%s12340_s3 + $0x250] sm:$0xff]  }
 0x2fe   : > { %v9841_v4 = vld [vmem:[%s12340_s3 + $0x298] sm:$0xff]  }
 0x300   : > { %4826 = vmatpush1.bf16.msra.mxu0 %v8519_v16  ;;  %4869 = vmatpush1.bf16.msra.mxu1 %v8521_v59  ;;  %v9847_v16 = vld [vmem:[%s12340_s3 + $0x2c8] sm:$0xff]  }
 0x301   : > { %4905 = vmatprep.subr.bf16.mxu0 %v8548_v12  ;;  %4948 = vmatprep.subr.bf16.mxu1 %v8550_v23  ;;  %v9848_v59 = vld [vmem:[%s12340_s3 + $0x208] sm:$0xff]   ;;  %v9850_v23 = vld [vmem:[%s12340_s3 + $0x240] sm:$0xff]  }
 0x302   : > { %v9849_v12 = vld [vmem:[%s12340_s3 + $0x288] sm:$0xff]  }
 0x303   : > { %8551 = vmatmul.mubr.msk.bf16.vlgmr.msra.gmra.mxu0 %vm290_vm1, %v4615_v0  ;;  %8552 = vmatmul.mubr.msk.bf16.vlgmr.msra.gmra.mxu1 %vm290_vm1, %v4615_v0 }
 0x304   : > { %4906 = vmatpush1.bf16.msra.mxu0 %v8547_v48  ;;  %4949 = vmatpush1.bf16.msra.mxu1 %v8549_v11 }
 0x305   : > { %4907 = vmatprep.subr.bf16.mxu0 %v8540_v7  ;;  %4950 = vmatprep.subr.bf16.mxu1 %v8542_v52 }
 0x306   : > { %4929 = vmatprep.mubr.bf16.mxu0 %v10034_v8  ;;  %4972 = vmatprep.mubr.bf16.mxu1 %v10034_v8  ;;  %v9822_v8 = vld [vmem:[%s12340_s3 + $0x278] sm:$0xff]  }
 0x308   : > { %4908 = vmatpush1.bf16.msra.mxu0 %v8539_v51  ;;  %4951 = vmatpush1.bf16.msra.mxu1 %v8541_v14 }
 0x309   : > { %4909 = vmatprep.subr.bf16.mxu0 %v8532_v45  ;;  %4952 = vmatprep.subr.bf16.mxu1 %v8534_v62 }
 0x30c   : > { %4910 = vmatpush1.bf16.msra.mxu0 %v8531_v18  ;;  %4953 = vmatpush1.bf16.msra.mxu1 %v8533_v35 }
 0x30d   : > { %4911 = vmatprep.subr.bf16.mxu0 %v8524_v50  ;;  %4954 = vmatprep.subr.bf16.mxu1 %v8526_v46 }
 0x310   : > { %4912 = vmatpush1.bf16.msra.mxu0 %v8523_v29  ;;  %4955 = vmatpush1.bf16.msra.mxu1 %v8525_v42 }
 0x311   : > { %9304 = vmatprep.subr.bf16.mxu0 %v9822_v8  ;;  %9326 = vmatprep.subr.bf16.mxu1 %v9823_v36 }
 0x313   : > { %8553 = vmatmul.mubr.msk.bf16.vlgmr.msra.gmra.mxu0 %vm290_vm1, %v4615_v0  ;;  %8554 = vmatmul.mubr.msk.bf16.vlgmr.msra.gmra.mxu1 %vm290_vm1, %v4615_v0 }
 0x314   : > { %9305 = vmatpush3.bf16.msra.mxu0 %v9824_v19  ;;  %9327 = vmatpush3.bf16.msra.mxu1 %v9825_v49 }
 0x315   : > { %9306 = vmatprep.subr.bf16.mxu0 %v9826_v47  ;;  %9328 = vmatprep.subr.bf16.mxu1 %v9827_v9 }
 0x318   : > { %9307 = vmatpush3.bf16.msra.mxu0 %v9828_v20  ;;  %9329 = vmatpush3.bf16.msra.mxu1 %v9829_v28  ;;  %v11662_v20 = vld [vmem:[%s12339_s2] sm:$0xff] }
 0x319   : > { %9308 = vmatprep.subr.bf16.mxu0 %v9830_v39  ;;  %9330 = vmatprep.subr.bf16.mxu1 %v9831_v55 }
 0x31c   : > { %9309 = vmatpush3.bf16.msra.mxu0 %v9832_v56  ;;  %9331 = vmatpush3.bf16.msra.mxu1 %v9833_v10  ;;  %v5004_v10 = vrot.slane %v11662_v20, %v1425_v31 }
 0x31d   : > { %9310 = vmatprep.subr.bf16.mxu0 %v9834_v37  ;;  %9332 = vmatprep.subr.bf16.mxu1 %v9835_v57  ;;  %v5012_v37 = vrot.slane %v11662_v20, %v1433_v32 }
 0x320   : > { %9311 = vmatpush3.bf16.msra.mxu0 %v9836_v63  ;;  %9333 = vmatpush3.bf16.msra.mxu1 %v9837_v15  ;;  %v5008_v15 = vrot.slane %v11662_v20, %v1429_v34 }
 0x321   : > { %9312 = vmatprep.subr.bf16.mxu0 %v9838_v2  ;;  %9334 = vmatprep.subr.bf16.mxu1 %v9839_v21  ;;  %v12353_v2 = vsub.s32 3, %v10561_v25 }
 0x323   : > { %v5016_v21 = vrot.slane %v11662_v20, %v12353_v2 }
 0x324   : > { %9313 = vmatpush3.bf16.msra.mxu0 %v9840_v60  ;;  %9335 = vmatpush3.bf16.msra.mxu1 %v9841_v4 }
 0x325   : > { %9314 = vmatprep.subr.bf16.mxu0 %v9842_v33  ;;  %9336 = vmatprep.subr.bf16.mxu1 %v9843_v24 }
 0x328   : > { %9315 = vmatpush3.bf16.msra.mxu0 %v9844_v58  ;;  %9337 = vmatpush3.bf16.msra.mxu1 %v9845_v30 }
 0x329   : > { %9316 = vmatprep.subr.bf16.mxu0 %v9846_v13  ;;  %9338 = vmatprep.subr.bf16.mxu1 %v9847_v16 }
 0x32c   : > { %9317 = vmatpush3.bf16.msra.mxu0 %v9848_v59  ;;  %9339 = vmatpush3.bf16.msra.mxu1 %v9849_v12 }
 0x32d   : > { %9318 = vmatprep.subr.bf16.mxu0 %v9850_v23  ;;  %9340 = vmatprep.subr.bf16.mxu1 %v9851_v22 }
 0x330   : > { %9319 = vmatpush3.bf16.msra.mxu0 %v9852_v61  ;;  %9341 = vmatpush3.bf16.msra.mxu1 %v9853_v40 }
 0x331   : > { %9348 = vmatprep.subr.bf16.mxu0 %v9854_v38  ;;  %9370 = vmatprep.subr.bf16.mxu1 %v9855_v17 }
 0x383   : > { %v4140_v43 = vpop.f32.mrf.mxu0  ;;  %v4183_v48 = vpop.f32.mrf.mxu1 }
 0x385   : > { %v4142_v11 = vpop.f32.mrf.mxu0  ;;  %v4185_v0 = vpop.f32.mrf.mxu1 }
 0x387   : > { %v4144_v7 = vpop.f32.mrf.mxu0  ;;  %v4187_v52 = vpop.f32.mrf.mxu1 }
 0x389   : > { %v4146_v54 = vpop.f32.mrf.mxu0  ;;  %v4189_v3 = vpop.f32.mrf.mxu1 }
 0x393   : > { %v11631_v5 = vpop.f32.mrf.mxu0  ;;  %v11633_v53 = vpop.f32.mrf.mxu1 }
 0x395   : > { %v11635_v51 = vpop.f32.mrf.mxu0  ;;  %v11637_v14 = vpop.f32.mrf.mxu1 }
 0x397   : > { %v11639_v45 = vpop.f32.mrf.mxu0  ;;  %v11641_v62 = vpop.f32.mrf.mxu1 }
 0x399   : > { %v11643_v6 = vpop.f32.mrf.mxu0  ;;  %v11645_v41 = vpop.f32.mrf.mxu1 }
 0x3a3   : > { %v4475_v44 = vpop.f32.mrf.mxu0  ;;  %v4518_v1 = vpop.f32.mrf.mxu1 }
 0x3a4   : > { %v4476_v55 = vadd.f32 %v4475_v44, %v4140_v43  ;;  %v4519_v56 = vadd.f32 %v4518_v1, %v4183_v48 }
 0x3a5   : > { %v4477_v18 = vpop.f32.mrf.mxu0  ;;  %v4520_v35 = vpop.f32.mrf.mxu1 }
 0x3a6   : > { %v4478_v60 = vadd.f32 %v4477_v18, %v4142_v11  ;;  %v4521_v4 = vadd.f32 %v4520_v35, %v4185_v0 }
 0x3a7   : > { %v4479_v50 = vpop.f32.mrf.mxu0  ;;  %v4522_v46 = vpop.f32.mrf.mxu1 }
 0x3a8   : > { %v4480_v59 = vadd.f32 %v4479_v50, %v4144_v7  ;;  %v4523_v12 = vadd.f32 %v4522_v46, %v4187_v52 }
 0x3a9   : > { %v4481_v29 = vpop.f32.mrf.mxu0  ;;  %v4524_v42 = vpop.f32.mrf.mxu1 }
 0x3aa   : > { %v4482_v17 = vadd.f32 %v4481_v29, %v4146_v54  ;;  %v4525_v43 = vadd.f32 %v4524_v42, %v4189_v3 }
 0x3b3   : > { %v11647_v8 = vpop.f32.mrf.mxu0  ;;  %v11649_v36 = vpop.f32.mrf.mxu1 }
 0x3b5   : > { %v11651_v19 = vpop.f32.mrf.mxu0  ;;  %v11653_v49 = vpop.f32.mrf.mxu1 }
 0x3b7   : > { %v11655_v47 = vpop.f32.mrf.mxu0  ;;  %v11657_v9 = vpop.f32.mrf.mxu1 }
 0x3b9   : > { %v11664_v28 = vpop.f32.mrf.mxu0  ;;  %v11666_v39 = vpop.f32.mrf.mxu1 }
 0x3c3   : > { %v4845_v57 = vpop.f32.mrf.mxu0  ;;  %v4888_v63 = vpop.f32.mrf.mxu1 }
 0x3c4   : > { %v4983_v33 = vadd.f32 %v4845_v57, %v4476_v55  ;;  %v4985_v24 = vadd.f32 %v4888_v63, %v4519_v56 }
 0x3c5   : > { %v4847_v58 = vpop.f32.mrf.mxu0  ;;  %v4890_v31 = vpop.f32.mrf.mxu1 }
 0x3c6   : > { %v5041_v30 = vadd.f32 %v5004_v10, %v4983_v33  ;;  %v5043_v13 = vadd.f32 %v5012_v37, %v4985_v24  ;;  %v4984_v16 = vadd.f32 %v4847_v58, %v4478_v60  ;;  %v4986_v32 = vadd.f32 %v4890_v31, %v4521_v4 }
 0x3c7   : > { %v4849_v23 = vpop.f32.mrf.mxu0  ;;  %v4892_v22 = vpop.f32.mrf.mxu1  ;;  %v12354_v33 = vsub.s32 4, %v10561_v25 }
 0x3c8   : > { %v5057_v61 = vmax.f32 %v5041_v30, 0.0  ;;  %v5059_v34 = vmax.f32 %v5043_v13, 0.0  ;;  %v5042_v40 = vadd.f32 %v5008_v15, %v4984_v16  ;;  %v5044_v38 = vadd.f32 %v5016_v21, %v4986_v32 }
 0x3c9   : > { %v4991_v48 = vadd.f32 %v4849_v23, %v4480_v59  ;;  %v4993_v11 = vadd.f32 %v4892_v22, %v4523_v12  ;;  %v4851_v0 = vpop.f32.mrf.mxu0  ;;  %v4894_v44 = vpop.f32.mrf.mxu1  ;;  %v4562_v30 = vadd.f32 %v11647_v8, %v11631_v5  ;;  %v4605_v13 = vadd.f32 %v11649_v36, %v11633_v53 }
 0x3ca   : > { %v5089_v1 = vrot.slane %v5057_v61, 7  ;;  %v5091_v18 = vrot.slane %v5059_v34, 7  ;;  %v5058_v35 = vmax.f32 %v5042_v40, 0.0  ;;  %v5060_v55 = vmax.f32 %v5044_v38, 0.0 }
 0x3cb   : > { %v5049_v56 = vadd.f32 %v5004_v10, %v4991_v48  ;;  %v5051_v57 = vadd.f32 %v5012_v37, %v4993_v11  ;;  %v4992_v7 = vadd.f32 %v4851_v0, %v4482_v17  ;;  %v4994_v52 = vadd.f32 %v4894_v44, %v4525_v43 }
 0x3cc   : > { %5137 = vst [vmem:[#allocation3] sm:$0xfe] %v5089_v1  ;;  %5139 = vst [vmem:[#allocation3 + $0x10] sm:$0xfe] %v5091_v18  ;;  %v5090_v50 = vrot.slane %v5058_v35, 7  ;;  %v5092_v46 = vrot.slane %v5060_v55, 7  ;;  %v5020_v10 = vrot.slane %v11662_v20, %v12354_v33  ;;  %v4564_v23 = vadd.f32 %v11651_v19, %v11635_v51 }
 0x3cd   : > { %v5065_v63 = vmax.f32 %v5049_v56, 0.0  ;;  %v5067_v2 = vmax.f32 %v5051_v57, 0.0  ;;  %v5050_v54 = vadd.f32 %v5008_v15, %v4992_v7  ;;  %v5052_v3 = vadd.f32 %v5016_v21, %v4994_v52 }
 0x3ce   : > { %5138 = vst [vmem:[#allocation3 + $0x8] sm:$0xfe] %v5090_v50  ;;  %5140 = vst [vmem:[#allocation3 + $0x18] sm:$0xfe] %v5092_v46  ;;  %v12355_v37 = vsub.s32 6, %v10561_v25  ;;  %v12356_v16 = vsub.s32 5, %v10561_v25  ;;  %v4607_v22 = vadd.f32 %v11653_v49, %v11637_v14  ;;  %v4609_v14 = vadd.f32 %v11657_v9, %v11641_v62 }
 0x3cf   : > { %v5097_v29 = vrot.slane %v5065_v63, 7  ;;  %v5101_v42 = vrot.slane %v5067_v2, 7  ;;  %v5066_v60 = vmax.f32 %v5050_v54, 0.0  ;;  %v5068_v4 = vmax.f32 %v5052_v3, 0.0 }
 0x3d0   : > { %v5028_v24 = vrot.slane %v11662_v20, %v12355_v37  ;;  %v5024_v32 = vrot.slane %v11662_v20, %v12356_v16  ;;  %v12357_v59 = vsub.s32 7, %v10561_v25  ;;  %v4568_v49 = vadd.f32 %v11664_v28, %v11643_v6 }
 0x3d1   : > { %v11687_v58 = vsel %vm1511_vm2, %v5089_v1, %v5097_v29  ;;  %5153 = vst [vmem:[#allocation3 + $0x80] sm:$0x1] %v5097_v29  ;;  %v11690_v15 = vsel %vm1511_vm2, %v5091_v18, %v5101_v42  ;;  %5155 = vst [vmem:[#allocation3 + $0x90] sm:$0x1] %v5101_v42  ;;  %v5099_v21 = vrot.slane %v5066_v60, 7  ;;  %v5103_v31 = vrot.slane %v5068_v4, 7 }
 0x3d2   : > { %v5032_v12 = vrot.slane %v11662_v20, %v12357_v59  ;;  %v4566_v20 = vadd.f32 %v11655_v47, %v11639_v45  ;;  %v4611_v40 = vadd.f32 %v11666_v39, %v11645_v41 }
 0x3d3   : > { %v11707_v61 = vsel %vm1511_vm2, %v5090_v50, %v5099_v21  ;;  %5154 = vst [vmem:[#allocation3 + $0x88] sm:$0x1] %v5099_v21  ;;  %v11710_v5 = vsel %vm1511_vm2, %v5092_v46, %v5103_v31  ;;  %5156 = vst [vmem:[#allocation3 + $0x98] sm:$0x1] %v5103_v31  ;;  %v4931_v53 = vpop.f32.mrf.mxu0  ;;  %v4974_v8 = vpop.f32.mrf.mxu1  ;;  %v5313_v36 = vld [vmem:[#allocation3] sm:$0xfe] }
 0x3d4   : > { %v5315_v25 = vld [vmem:[#allocation3 + $0x10] sm:$0xfe]  ;;  %v4987_v34 = vadd.f32 %v4931_v53, %v4562_v30  ;;  %v4989_v51 = vadd.f32 %v4974_v8, %v4605_v13  ;;  %v11715_v19 = vpack.c.bf16 %v11687_v58, %v5313_v36 }
 0x3d5   : > { %v4933_v38 = vpop.f32.mrf.mxu0  ;;  %v4976_v17 = vpop.f32.mrf.mxu1  ;;  %v5314_v43 = vld [vmem:[#allocation3 + $0x8] sm:$0xfe]  ;;  %v5316_v48 = vld [vmem:[#allocation3 + $0x18] sm:$0xfe]  ;;  %v11724_v45 = vpack.c.bf16 %v11690_v15, %v5315_v25 }
 0x3d6   : > { %v5045_v47 = vadd.f32 %v5020_v10, %v4987_v34  ;;  %v5047_v11 = vadd.f32 %v5028_v24, %v4989_v51  ;;  %v4988_v0 = vadd.f32 %v4933_v38, %v4564_v23  ;;  %v4990_v44 = vadd.f32 %v4976_v17, %v4607_v22 }
 0x3d7   : > { %v4935_v1 = vpop.f32.mrf.mxu0  ;;  %v4978_v18 = vpop.f32.mrf.mxu1  ;;  %v5330_v62 = vpack.c.bf16 %v11707_v61, %v5314_v43  ;;  %v11728_v6 = vpack.c.bf16 %v11710_v5, %v5316_v48  ;;  %v5474_v41 = vshrl.u32 %v11715_v19, 16  ;;  %v5476_v9 = vshll.u32 %v11715_v19, 16 }
 0x3d8   : > { %v5061_v28 = vmax.f32 %v5045_v47, 0.0  ;;  %v5063_v39 = vmax.f32 %v5047_v11, 0.0  ;;  %v5046_v35 = vadd.f32 %v5024_v32, %v4988_v0  ;;  %v5048_v55 = vadd.f32 %v5032_v12, %v4990_v44  ;;  %v5321_v53 = vld [vmem:[#allocation3 + $0x80] sm:$0x1]  ;;  %v5323_v17 = vld [vmem:[#allocation3 + $0x90] sm:$0x1] }
 0x3d9   : > { %v4995_v56 = vadd.f32 %v4935_v1, %v4566_v20  ;;  %v4997_v57 = vadd.f32 %v4978_v18, %v4609_v14  ;;  %v4937_v7 = vpop.f32.mrf.mxu0  ;;  %v4980_v52 = vpop.f32.mrf.mxu1  ;;  %v5486_v50 = vshrl.u32 %v5330_v62, 16  ;;  %v5488_v46 = vshll.u32 %v5330_v62, 16 }
 0x3da   : > { %v5093_v63 = vrot.slane %v5061_v28, 7  ;;  %v5095_v2 = vrot.slane %v5063_v39, 7  ;;  %v5062_v54 = vmax.f32 %v5046_v35, 0.0  ;;  %v5064_v3 = vmax.f32 %v5048_v55, 0.0  ;;  %v5322_v29 = vld [vmem:[#allocation3 + $0x88] sm:$0x1] }
 0x3db   : > { %v5053_v42 = vadd.f32 %v5020_v10, %v4995_v56  ;;  %v5055_v60 = vadd.f32 %v5028_v24, %v4997_v57  ;;  %v4996_v4 = vadd.f32 %v4937_v7, %v4568_v49  ;;  %v4998_v33 = vadd.f32 %v4980_v52, %v4611_v40  ;;  %v5324_v37 = vld [vmem:[#allocation3 + $0x98] sm:$0x1] }
 0x3dc   : > { %5141 = vst [vmem:[#allocation3 + $0x20] sm:$0xfe] %v5093_v63  ;;  %5143 = vst [vmem:[#allocation3 + $0x30] sm:$0xfe] %v5095_v2  ;;  %v5094_v21 = vrot.slane %v5062_v54, 7  ;;  %v5096_v31 = vrot.slane %v5064_v3, 7  ;;  %v5338_v30 = vpack.c.bf16 %v5322_v29, %v5322_v29  ;;  %v5340_v10 = vpack.c.bf16 %v5324_v37, %v5324_v37 }
 0x3dd   : > { %v5490_v13 = vrot.slane %v5488_v46, 1  ;;  %v5069_v16 = vmax.f32 %v5053_v42, 0.0  ;;  %v5071_v59 = vmax.f32 %v5055_v60, 0.0  ;;  %v5054_v23 = vadd.f32 %v5024_v32, %v4996_v4  ;;  %v9857_v3 = vld [vmem:[%s12340_s3 + $0x3b8] sm:$0xff]   ;;  %v9859_v42 = vld [vmem:[%s12340_s3 + $0x3f0] sm:$0xff]   ;;  %v9862_v37 = vld [vmem:[%s12340_s3 + $0x368] sm:$0xff]  }
 0x3de   : > { %v5056_v22 = vadd.f32 %v5032_v12, %v4998_v33  ;;  %5142 = vst [vmem:[#allocation3 + $0x28] sm:$0xfe] %v5094_v21  ;;  %5144 = vst [vmem:[#allocation3 + $0x38] sm:$0xfe] %v5096_v31  ;;  %v5493_v36 = vshll.u32 %v5338_v30, 16  ;;  %v5510_v24 = vshrl.u32 %v11728_v6, 16  ;;  %v5337_v38 = vpack.c.bf16 %v5321_v53, %v5321_v53 }
 0x3df   : > { %v5491_v8 = vor.u32 %v5490_v13, %v5486_v50  ;;  %v5105_v25 = vrot.slane %v5069_v16, 7  ;;  %v5109_v20 = vrot.slane %v5071_v59, 7  ;;  %v5070_v34 = vmax.f32 %v5054_v23, 0.0  ;;  %v9860_v60 = vld [vmem:[%s12340_s3 + $0x330] sm:$0xff]   ;;  %v9864_v53 = vld [vmem:[%s12340_s3 + $0x328] sm:$0xff]  }
 0x3e0   : > { %v5072_v51 = vmax.f32 %v5056_v22, 0.0  ;;  %v5495_v14 = vrot.slane %v5493_v36, 1  ;;  %v5512_v49 = vshll.u32 %v11728_v6, 16  ;;  %v5517_v40 = vshll.u32 %v5340_v10, 16  ;;  %v9861_v23 = vld [vmem:[%s12340_s3 + $0x3b0] sm:$0xff]   ;;  %v9863_v22 = vld [vmem:[%s12340_s3 + $0x3e8] sm:$0xff]  }
 0x3e1   : > { %v11735_v32 = vsel %vm1511_vm2, %v5093_v63, %v5105_v25  ;;  %5157 = vst [vmem:[#allocation3 + $0xa0] sm:$0x1] %v5105_v25  ;;  %v11738_v12 = vsel %vm1511_vm2, %v5095_v2, %v5109_v20  ;;  %5159 = vst [vmem:[#allocation3 + $0xb0] sm:$0x1] %v5109_v20  ;;  %v5107_v43 = vrot.slane %v5070_v34, 7  ;;  %v5478_v44 = vrot.slane %v5476_v9, 1 }
 0x3e2   : > { %v5111_v48 = vrot.slane %v5072_v51, 7  ;;  %v5496_v47 = vsel %vm1897_vm3, %v5491_v8, %v5495_v14  ;;  %v5514_v11 = vrot.slane %v5512_v49, 1  ;;  %v5519_v0 = vrot.slane %v5517_v40, 1  ;;  %v9856_v9 = vld [vmem:[%s12340_s3 + $0x338] sm:$0xff]   ;;  %v9858_v63 = vld [vmem:[%s12340_s3 + $0x370] sm:$0xff]   ;;  %v9866_v25 = vld [vmem:[%s12340_s3 + $0x360] sm:$0xff]  }
 0x3e3   : > { %v11742_v1 = vsel %vm1511_vm2, %v5094_v21, %v5107_v43  ;;  %5158 = vst [vmem:[#allocation3 + $0xa8] sm:$0x1] %v5107_v43  ;;  %5993 = vmatprep.mubr.bf16.mxu0 %v5496_v47  ;;  %v5481_v62 = vshll.u32 %v5337_v38, 16  ;;  %v5339_v6 = vpack.c.bf16 %v5323_v17, %v5323_v17  ;;  %v5498_v39 = vshrl.u32 %v11724_v45, 16  ;;  %v9865_v49 = vld [vmem:[%s12340_s3 + $0x3a8] sm:$0xff]   ;;  %v9867_v40 = vld [vmem:[%s12340_s3 + $0x3e0] sm:$0xff]  }
 0x3e4   : > { %v11745_v18 = vsel %vm1511_vm2, %v5096_v31, %v5111_v48  ;;  %5160 = vst [vmem:[#allocation3 + $0xb8] sm:$0x1] %v5111_v48  ;;  %v5515_v28 = vor.u32 %v5514_v11, %v5510_v24  ;;  %v5500_v35 = vshll.u32 %v11724_v45, 16  ;;  %v5479_v55 = vor.u32 %v5478_v44, %v5474_v41  ;;  %v9868_v38 = vld [vmem:[%s12340_s3 + $0x320] sm:$0xff]   ;;  %v9870_v48 = vld [vmem:[%s12340_s3 + $0x358] sm:$0xff]   ;;  %v9874_v44 = vld [vmem:[%s12340_s3 + $0x350] sm:$0xff]  }
 0x3e5   : > { %v5483_v56 = vrot.slane %v5481_v62, 1  ;;  %v5505_v57 = vshll.u32 %v5339_v6, 16  ;;  %v5318_v7 = vld [vmem:[#allocation3 + $0x28] sm:$0xfe]  ;;  %v5320_v52 = vld [vmem:[#allocation3 + $0x38] sm:$0xfe] }
 0x3e6   : > { %v5520_v50 = vsel %vm1897_vm3, %v5515_v28, %v5519_v0  ;;  %v5502_v46 = vrot.slane %v5500_v35, 1  ;;  %v5334_v45 = vpack.c.bf16 %v11742_v1, %v5318_v7  ;;  %v5336_v2 = vpack.c.bf16 %v11745_v18, %v5320_v52  ;;  %v9869_v47 = vld [vmem:[%s12340_s3 + $0x3a0] sm:$0xff]   ;;  %v9871_v11 = vld [vmem:[%s12340_s3 + $0x3d8] sm:$0xff]   ;;  %v9876_v35 = vld [vmem:[%s12340_s3 + $0x310] sm:$0xff]  }
 0x3e7   : > { %6034 = vmatprep.mubr.bf16.mxu1 %v5520_v50  ;;  %v5484_v54 = vsel %vm1897_vm3, %v5479_v55, %v5483_v56  ;;  %v5507_v19 = vrot.slane %v5505_v57, 1  ;;  %v9872_v0 = vld [vmem:[%s12340_s3 + $0x318] sm:$0xff]   ;;  %v5319_v55 = vld [vmem:[#allocation3 + $0x30] sm:$0xfe]  ;;  %v9877_v52 = vld [vmem:[%s12340_s3 + $0x390] sm:$0xff]  }
 0x3e8   : > { %5994 = vmatmul.mubr.bf16.vlgmr.msra.gmra.mxu0 %v5484_v54  ;;  %v5503_v41 = vor.u32 %v5502_v46, %v5498_v39  ;;  %v5536_v29 = vshll.u32 %v5334_v45, 16  ;;  %v5560_v4 = vshll.u32 %v5336_v2, 16  ;;  %v5534_v8 = vshrl.u32 %v5334_v45, 16  ;;  %v5317_v62 = vld [vmem:[#allocation3 + $0x20] sm:$0xfe]  ;;  %v9875_v39 = vld [vmem:[%s12340_s3 + $0x3d0] sm:$0xff]  }
 0x3e9   : > { %9349 = vmatpush3.bf16.msra.mxu0 %v9856_v9  ;;  %v5558_v10 = vshrl.u32 %v5336_v2, 16  ;;  %v9873_v6 = vld [vmem:[%s12340_s3 + $0x398] sm:$0xff]   ;;  %v5333_v9 = vpack.c.bf16 %v11735_v32, %v5317_v62  ;;  %v9878_v56 = vld [vmem:[%s12340_s3 + $0x348] sm:$0xff]   ;;  %v5335_v50 = vpack.c.bf16 %v11738_v12, %v5319_v55  ;;  %v9882_v2 = vld [vmem:[%s12340_s3 + $0x340] sm:$0xff]  }
 0x3ea   : > { %v5508_v33 = vsel %vm1897_vm3, %v5503_v41, %v5507_v19  ;;  %9350 = vmatprep.subr.bf16.mxu0 %v9858_v63  ;;  %v5326_v21 = vld [vmem:[#allocation3 + $0xa8] sm:$0x1]  ;;  %v5538_v13 = vrot.slane %v5536_v29, 1  ;;  %v5562_v59 = vrot.slane %v5560_v4, 1  ;;  %v5325_v28 = vld [vmem:[#allocation3 + $0xa0] sm:$0x1] }
 0x3eb   : > { %v5328_v31 = vld [vmem:[#allocation3 + $0xb8] sm:$0x1]  ;;  %6035 = vmatmul.mubr.bf16.vlgmr.msra.gmra.mxu1 %v5508_v33  ;;  %v5342_v30 = vpack.c.bf16 %v5326_v21, %v5326_v21  ;;  %v5341_v57 = vpack.c.bf16 %v5325_v28, %v5325_v28  ;;  %v5327_v7 = vld [vmem:[#allocation3 + $0xb0] sm:$0x1]  ;;  %v5524_v45 = vshll.u32 %v5333_v9, 16  ;;  %v9883_v29 = vld [vmem:[%s12340_s3 + $0x3c0] sm:$0xff]  }
 0x3ec   : > { %v5344_v16 = vpack.c.bf16 %v5328_v31, %v5328_v31  ;;  %9371 = vmatpush3.bf16.msra.mxu1 %v9857_v3  ;;  %v5539_v20 = vor.u32 %v5538_v13, %v5534_v8  ;;  %v5563_v51 = vor.u32 %v5562_v59, %v5558_v10  ;;  %v9879_v46 = vld [vmem:[%s12340_s3 + $0x3c8] sm:$0xff]   ;;  %v5343_v54 = vpack.c.bf16 %v5327_v7, %v5327_v7  ;;  %v9886_v33 = vld [vmem:[%s12340_s3 + $0x78] sm:$0xff]   ;;  %v9885_v31 = vld [vmem:[%s12340_s3 + $0x380] sm:$0xff]  }
 0x3ed   : > { %9372 = vmatprep.subr.bf16.mxu1 %v9859_v42  ;;  %9351 = vmatpush3.bf16.msra.mxu0 %v9860_v60  ;;  %v5541_v36 = vshll.u32 %v5342_v30, 16  ;;  %v9880_v63 = vld [vmem:[%s12340_s3 + $0x308] sm:$0xff]   ;;  %v5529_v19 = vshll.u32 %v5341_v57, 16  ;;  %v5548_v3 = vshll.u32 %v5335_v50, 16  ;;  %v9884_v42 = vld [vmem:[%s12340_s3 + $0x300] sm:$0xff]   ;;  %v5526_v60 = vrot.slane %v5524_v45, 1 }
 0x3ee   : > { %v5565_v24 = vshll.u32 %v5344_v16, 16  ;;  %9352 = vmatprep.subr.bf16.mxu0 %v9862_v37  ;;  %v9881_v41 = vld [vmem:[%s12340_s3 + $0x388] sm:$0xff]   ;;  %v5553_v4 = vshll.u32 %v5343_v54, 16  ;;  %v5522_v37 = vshrl.u32 %v5333_v9, 16  ;;  %v9887_v16 = vld [vmem:[%s12340_s3 + $0xf8] sm:$0xff]   ;;  %v9890_v8 = vld [vmem:[%s12340_s3 + $0x70] sm:$0xff]  }
 0x3ef   : > { %v5543_v34 = vrot.slane %v5541_v36, 1  ;;  %v5531_v21 = vrot.slane %v5529_v19, 1  ;;  %v5550_v30 = vrot.slane %v5548_v3, 1  ;;  %v9888_v59 = vld [vmem:[%s12340_s3 + $0x38] sm:$0xff]   ;;  %v5164_v10 = vld [vmem:[#allocation3 + $0x18] sm:$0xff]  ;;  %v9901_v62 = vld [vmem:[%s12340_s3 + $0xa0] sm:$0xff]  }
 0x3f0   : > { %v5567_v14 = vrot.slane %v5565_v24, 1  ;;  %9373 = vmatpush3.bf16.msra.mxu1 %v9861_v23  ;;  %v5527_v13 = vor.u32 %v5526_v60, %v5522_v37  ;;  %v5162_v23 = vld [vmem:[#allocation3 + $0x8] sm:$0xff]  ;;  %v9904_v28 = vld [vmem:[%s12340_s3 + $0x18] sm:$0xff]   ;;  %v9907_v9 = vld [vmem:[%s12340_s3 + $0xd0] sm:$0xff]  }
 0x3f1   : > { %9374 = vmatprep.subr.bf16.mxu1 %v9863_v22  ;;  %9353 = vmatpush3.bf16.msra.mxu0 %v9864_v53  ;;  %v5544_v17 = vsel %vm1897_vm3, %v5539_v20, %v5543_v34  ;;  %v5546_v22 = vshrl.u32 %v5335_v50, 16  ;;  %v5555_v53 = vrot.slane %v5553_v4, 1  ;;  %v9889_v20 = vld [vmem:[%s12340_s3 + $0xb8] sm:$0xff]   ;;  %v9891_v34 = vld [vmem:[%s12340_s3 + $0xf0] sm:$0xff]   ;;  %v9911_v7 = vld [vmem:[%s12340_s3 + $0xc8] sm:$0xff]  }
 0x3f2   : > { %v5568_v43 = vsel %vm1897_vm3, %v5563_v51, %v5567_v14  ;;  %9354 = vmatprep.subr.bf16.mxu0 %v9866_v25  ;;  %6075 = vmatprep.mubr.bf16.mxu0 %v5544_v17  ;;  %v5532_v36 = vsel %vm1897_vm3, %v5527_v13, %v5531_v21  ;;  %v5178_v25 = vpack.c.bf16 %v11707_v61, %v5162_v23  ;;  %v9892_v51 = vld [vmem:[%s12340_s3 + $0x30] sm:$0xff]   ;;  %v9895_v17 = vld [vmem:[%s12340_s3 + $0xe8] sm:$0xff]   ;;  %v9914_v50 = vld [vmem:[%s12340_s3 + $0x40] sm:$0xff]  }
 0x3f3   : > { %6116 = vmatprep.mubr.bf16.mxu1 %v5568_v43  ;;  %v5551_v24 = vor.u32 %v5550_v30, %v5546_v22  ;;  %v9896_v43 = vld [vmem:[%s12340_s3 + $0x28] sm:$0xff]   ;;  %v9908_v55 = vld [vmem:[%s12340_s3 + $0x10] sm:$0xff]   ;;  %v9916_v45 = vld [vmem:[%s12340_s3] sm:$0xff]  }
 0x3f4   : > { %9375 = vmatpush3.bf16.msra.mxu1 %v9865_v49  ;;  %v5180_v49 = vpack.c.bf16 %v11710_v5, %v5164_v10  ;;  %v9909_v57 = vld [vmem:[%s12340_s3 + $0x90] sm:$0xff]   ;;  %v5161_v54 = vld [vmem:[#allocation3] sm:$0xff]  ;;  %v9917_v19 = vld [vmem:[%s12340_s3 + $0x80] sm:$0xff]  }
 0x3f5   : > { %9376 = vmatprep.subr.bf16.mxu1 %v9867_v40  ;;  %9355 = vmatpush3.bf16.msra.mxu0 %v9868_v38  ;;  %v5556_v14 = vsel %vm1897_vm3, %v5551_v24, %v5555_v53  ;;  %v9894_v40 = vld [vmem:[%s12340_s3 + $0x68] sm:$0xff]   ;;  %v9893_v38 = vld [vmem:[%s12340_s3 + $0xb0] sm:$0xff]   ;;  %v9920_v3 = vld [vmem:[%s12340_s3 + $0x138] sm:$0xff]  }
 0x3f6   : > { %9356 = vmatprep.subr.bf16.mxu0 %v9870_v48  ;;  %v9898_v48 = vld [vmem:[%s12340_s3 + $0x60] sm:$0xff]   ;;  %v5163_v60 = vld [vmem:[#allocation3 + $0x10] sm:$0xff]  ;;  %v9922_v4 = vld [vmem:[%s12340_s3 + $0x170] sm:$0xff]  }
 0x3f7   : > { %v9921_v21 = vld [vmem:[%s12340_s3 + $0x1b8] sm:$0xff]   ;;  %v9923_v30 = vld [vmem:[%s12340_s3 + $0x1f0] sm:$0xff]   ;;  %v9927_v22 = vld [vmem:[%s12340_s3 + $0x1e8] sm:$0xff]  }
 0x3f8   : > { %9377 = vmatpush3.bf16.msra.mxu1 %v9869_v47  ;;  %v9897_v47 = vld [vmem:[%s12340_s3 + $0xa8] sm:$0xff]   ;;  %v9924_v13 = vld [vmem:[%s12340_s3 + $0x130] sm:$0xff]   ;;  %v9931_v10 = vld [vmem:[%s12340_s3 + $0x1e0] sm:$0xff]  }
 0x3f9   : > { %9378 = vmatprep.subr.bf16.mxu1 %v9871_v11  ;;  %9357 = vmatpush3.bf16.msra.mxu0 %v9872_v0  ;;  %v9899_v11 = vld [vmem:[%s12340_s3 + $0xe0] sm:$0xff]   ;;  %v9925_v23 = vld [vmem:[%s12340_s3 + $0x1b0] sm:$0xff]   ;;  %v9928_v53 = vld [vmem:[%s12340_s3 + $0x128] sm:$0xff]  }
 0x3fa   : > { %9358 = vmatprep.subr.bf16.mxu0 %v9874_v44  ;;  %v9900_v0 = vld [vmem:[%s12340_s3 + $0x20] sm:$0xff]   ;;  %v9902_v44 = vld [vmem:[%s12340_s3 + $0x58] sm:$0xff]  }
 0x3fb   : > { %v9932_v24 = vld [vmem:[%s12340_s3 + $0x120] sm:$0xff]  }
 0x3fc   : > { %9379 = vmatpush3.bf16.msra.mxu1 %v9873_v6  ;;  %v9903_v6 = vld [vmem:[%s12340_s3 + $0xd8] sm:$0xff]  }
 0x3fd   : > { %9380 = vmatprep.subr.bf16.mxu1 %v9875_v39  ;;  %9359 = vmatpush3.bf16.msra.mxu0 %v9876_v35  ;;  %v9906_v39 = vld [vmem:[%s12340_s3 + $0x50] sm:$0xff]   ;;  %v9905_v35 = vld [vmem:[%s12340_s3 + $0x98] sm:$0xff]  }
 0x3fe   : > { %9360 = vmatprep.subr.bf16.mxu0 %v9878_v56  ;;  %v9910_v56 = vld [vmem:[%s12340_s3 + $0x48] sm:$0xff]  }
 0x400   : > { %9381 = vmatpush3.bf16.msra.mxu1 %v9877_v52  ;;  %v9912_v52 = vld [vmem:[%s12340_s3 + $0x8] sm:$0xff]  }
 0x401   : > { %9382 = vmatprep.subr.bf16.mxu1 %v9879_v46  ;;  %9361 = vmatpush3.bf16.msra.mxu0 %v9880_v63  ;;  %v9913_v46 = vld [vmem:[%s12340_s3 + $0x88] sm:$0xff]   ;;  %v9915_v63 = vld [vmem:[%s12340_s3 + $0xc0] sm:$0xff]  }
 0x402   : > { %9362 = vmatprep.subr.bf16.mxu0 %v9882_v2  ;;  %v9918_v2 = vld [vmem:[%s12340_s3 + $0x178] sm:$0xff]  }
 0x404   : > { %9383 = vmatpush3.bf16.msra.mxu1 %v9881_v41  ;;  %v9919_v41 = vld [vmem:[%s12340_s3 + $0x1f8] sm:$0xff]  }
 0x405   : > { %9384 = vmatprep.subr.bf16.mxu1 %v9883_v29  ;;  %9363 = vmatpush3.bf16.msra.mxu0 %v9884_v42  ;;  %v5166_v29 = vld [vmem:[#allocation3 + $0x28] sm:$0xff]  ;;  %v5177_v42 = vpack.c.bf16 %v11687_v58, %v5161_v54  ;;  %v9954_v54 = vld [vmem:[%s12340_s3 + $0x470] sm:$0xff]  }
 0x406   : > { %9392 = vmatprep.subr.bf16.mxu0 %v9886_v33  ;;  %v5168_v33 = vld [vmem:[#allocation3 + $0x38] sm:$0xff]  ;;  %v5182_v37 = vpack.c.bf16 %v11742_v1, %v5166_v29 }
 0x408   : > { %9385 = vmatpush3.bf16.msra.mxu1 %v9885_v31  ;;  %6076 = vmatmul.mubr.bf16.vlgmr.msra.gmra.mxu0 %v5532_v36  ;;  %v5179_v31 = vpack.c.bf16 %v11690_v15, %v5163_v60  ;;  %v9929_v36 = vld [vmem:[%s12340_s3 + $0x1a8] sm:$0xff]   ;;  %v9955_v60 = vld [vmem:[%s12340_s3 + $0x4f0] sm:$0xff]  }
 0x409   : > { %9414 = vmatprep.subr.bf16.mxu1 %v9887_v16  ;;  %9393 = vmatpush3.bf16.msra.mxu0 %v9888_v59  ;;  %v5184_v16 = vpack.c.bf16 %v11745_v18, %v5168_v33  ;;  %v9926_v59 = vld [vmem:[%s12340_s3 + $0x168] sm:$0xff]  }
 0x40a   : > { %6541 = vmatprep.mubr.bf16.mxu0 %v5178_v25  ;;  %9394 = vmatprep.subr.bf16.mxu0 %v9890_v8  ;;  %v9930_v8 = vld [vmem:[%s12340_s3 + $0x160] sm:$0xff]   ;;  %v9934_v25 = vld [vmem:[%s12340_s3 + $0x158] sm:$0xff]   ;;  %v9958_v33 = vld [vmem:[%s12340_s3 + $0x468] sm:$0xff]  }
 0x40b   : > { %6117 = vmatmul.mubr.bf16.vlgmr.msra.gmra.mxu1 %v5556_v14  ;;  %v9938_v14 = vld [vmem:[%s12340_s3 + $0x150] sm:$0xff]  }
 0x40c   : > { %9415 = vmatpush3.bf16.msra.mxu1 %v9889_v20  ;;  %6582 = vmatprep.mubr.bf16.mxu1 %v5180_v49  ;;  %v9933_v20 = vld [vmem:[%s12340_s3 + $0x1a0] sm:$0xff]   ;;  %v9937_v49 = vld [vmem:[%s12340_s3 + $0x198] sm:$0xff]  }
 0x40d   : > { %9416 = vmatprep.subr.bf16.mxu1 %v9891_v34  ;;  %9395 = vmatpush3.bf16.msra.mxu0 %v9892_v51  ;;  %v9935_v34 = vld [vmem:[%s12340_s3 + $0x1d8] sm:$0xff]  }
 0x40e   : > { %9396 = vmatprep.subr.bf16.mxu0 %v9894_v40  ;;  %v9936_v51 = vld [vmem:[%s12340_s3 + $0x118] sm:$0xff]   ;;  %v9939_v40 = vld [vmem:[%s12340_s3 + $0x1d0] sm:$0xff]  }
 0x410   : > { %9417 = vmatpush3.bf16.msra.mxu1 %v9893_v38  ;;  %v9940_v38 = vld [vmem:[%s12340_s3 + $0x110] sm:$0xff]  }
 0x411   : > { %9418 = vmatprep.subr.bf16.mxu1 %v9895_v17  ;;  %9397 = vmatpush3.bf16.msra.mxu0 %v9896_v43  ;;  %v9942_v17 = vld [vmem:[%s12340_s3 + $0x148] sm:$0xff]   ;;  %v9941_v43 = vld [vmem:[%s12340_s3 + $0x190] sm:$0xff]  }
 0x412   : > { %9398 = vmatprep.subr.bf16.mxu0 %v9898_v48  ;;  %v9943_v48 = vld [vmem:[%s12340_s3 + $0x1c8] sm:$0xff]  }
 0x414   : > { %9419 = vmatpush3.bf16.msra.mxu1 %v9897_v47  ;;  %v9944_v47 = vld [vmem:[%s12340_s3 + $0x108] sm:$0xff]  }
 0x415   : > { %9420 = vmatprep.subr.bf16.mxu1 %v9899_v11  ;;  %9399 = vmatpush3.bf16.msra.mxu0 %v9900_v0  ;;  %v9946_v11 = vld [vmem:[%s12340_s3 + $0x140] sm:$0xff]  }
 0x416   : > { %9400 = vmatprep.subr.bf16.mxu0 %v9902_v44  ;;  %v6682_v0 = vld [vmem:[#allocation3 + $0x88] sm:$0x3]  ;;  %v9945_v44 = vld [vmem:[%s12340_s3 + $0x188] sm:$0xff]  }
 0x418   : > { %9421 = vmatpush3.bf16.msra.mxu1 %v9901_v62  ;;  %v6674_v62 = vld [vmem:[#allocation3 + $0x8] sm:$0xfc] }
 0x419   : > { %9422 = vmatprep.subr.bf16.mxu1 %v9903_v6  ;;  %9401 = vmatpush3.bf16.msra.mxu0 %v9904_v28  ;;  %v6684_v6 = vld [vmem:[#allocation3 + $0x98] sm:$0x3]  ;;  %v9947_v28 = vld [vmem:[%s12340_s3 + $0x1c0] sm:$0xff]  }
 0x41a   : > { %9402 = vmatprep.subr.bf16.mxu0 %v9906_v39  ;;  %v9948_v39 = vld [vmem:[%s12340_s3 + $0x100] sm:$0xff]  }
 0x41c   : > { %9423 = vmatpush3.bf16.msra.mxu1 %v9905_v35  ;;  %v6698_v35 = vpack.c.bf16 %v6682_v0, %v6682_v0  ;;  %v6678_v0 = vld [vmem:[#allocation3 + $0x28] sm:$0xfc] }
 0x41d   : > { %9424 = vmatprep.subr.bf16.mxu1 %v9907_v9  ;;  %9403 = vmatpush3.bf16.msra.mxu0 %v9908_v55  ;;  %v9950_v9 = vld [vmem:[%s12340_s3 + $0x478] sm:$0xff]   ;;  %v6676_v55 = vld [vmem:[#allocation3 + $0x18] sm:$0xfc] }
 0x41e   : > { %9404 = vmatprep.subr.bf16.mxu0 %v9910_v56  ;;  %v5165_v56 = vld [vmem:[#allocation3 + $0x20] sm:$0xff] }
 0x420   : > { %9425 = vmatpush3.bf16.msra.mxu1 %v9909_v57  ;;  %v6690_v57 = vpack.c.bf16 %v11707_v61, %v6674_v62  ;;  %v5181_v61 = vpack.c.bf16 %v11735_v32, %v5165_v56  ;;  %v9979_v62 = vld [vmem:[%s12340_s3 + $0x4c0] sm:$0xff]   ;;  %v6680_v56 = vld [vmem:[#allocation3 + $0x38] sm:$0xfc] }
 0x421   : > { %9426 = vmatprep.subr.bf16.mxu1 %v9911_v7  ;;  %9405 = vmatpush3.bf16.msra.mxu0 %v9912_v52  ;;  %v6700_v7 = vpack.c.bf16 %v6684_v6, %v6684_v6  ;;  %v9949_v52 = vld [vmem:[%s12340_s3 + $0x180] sm:$0xff]  }
 0x422   : > { %9406 = vmatprep.subr.bf16.mxu0 %v9914_v50  ;;  %v9951_v50 = vld [vmem:[%s12340_s3 + $0x4f8] sm:$0xff]   ;;  %v9980_v6 = vld [vmem:[%s12340_s3 + $0x400] sm:$0xff]  }
 0x424   : > { %9427 = vmatpush3.bf16.msra.mxu1 %v9913_v46  ;;  %v9952_v46 = vld [vmem:[%s12340_s3 + $0x438] sm:$0xff]  }
 0x425   : > { %9428 = vmatprep.subr.bf16.mxu1 %v9915_v63  ;;  %9407 = vmatpush3.bf16.msra.mxu0 %v9916_v45  ;;  %v6853_v63 = vrot.slane %v6698_v35, 1  ;;  %v6692_v45 = vpack.c.bf16 %v11710_v5, %v6676_v55  ;;  %v9982_v55 = vld [vmem:[%s12340_s3 + $0x578] sm:$0xff]  }
 0x426   : > { %9436 = vmatprep.subr.bf16.mxu0 %v9918_v2  ;;  %v5167_v2 = vld [vmem:[#allocation3 + $0x30] sm:$0xff] }
 0x427   : > { %v5183_v29 = vpack.c.bf16 %v11738_v12, %v5167_v2 }
 0x428   : > { %9429 = vmatpush3.bf16.msra.mxu1 %v9917_v19  ;;  %6542 = vmatmul.mubr.bf16.vlgmr.msra.gmra.mxu0 %v5177_v42  ;;  %v6852_v19 = vrot.slane %v6690_v57, 1  ;;  %v6858_v42 = vrot.slane %v6692_v45, 1  ;;  %v9984_v45 = vld [vmem:[%s12340_s3 + $0x538] sm:$0xff]  }
 0x429   : > { %9458 = vmatprep.subr.bf16.mxu1 %v9919_v41  ;;  %9437 = vmatpush3.bf16.msra.mxu0 %v9920_v3  ;;  %v6859_v41 = vrot.slane %v6700_v7, 1  ;;  %v9953_v3 = vld [vmem:[%s12340_s3 + $0x4b8] sm:$0xff]   ;;  %v6694_v7 = vpack.c.bf16 %v11742_v1, %v6678_v0  ;;  %v10012_v0 = vld [vmem:[%s12340_s3 + $0x500] sm:$0xff]  }
 0x42a   : > { %6623 = vmatprep.mubr.bf16.mxu0 %v5182_v37  ;;  %9438 = vmatprep.subr.bf16.mxu0 %v9922_v4  ;;  %v6854_v5 = vsel %vm3275_vm4, %v6852_v19, %v6853_v63  ;;  %v9956_v4 = vld [vmem:[%s12340_s3 + $0x430] sm:$0xff]   ;;  %v9983_v63 = vld [vmem:[%s12340_s3 + $0x5f8] sm:$0xff]  }
 0x42b   : > { %6583 = vmatmul.mubr.bf16.vlgmr.msra.gmra.mxu1 %v5179_v31  ;;  %v6860_v37 = vsel %vm3275_vm4, %v6858_v42, %v6859_v41  ;;  %v9959_v31 = vld [vmem:[%s12340_s3 + $0x4e8] sm:$0xff]   ;;  %v6864_v19 = vrot.slane %v6694_v7, 1  ;;  %v9987_v42 = vld [vmem:[%s12340_s3 + $0x5f0] sm:$0xff]  }
 0x42c   : > { %9459 = vmatpush3.bf16.msra.mxu1 %v9921_v21  ;;  %6664 = vmatprep.mubr.bf16.mxu1 %v5184_v16  ;;  %v9957_v21 = vld [vmem:[%s12340_s3 + $0x4b0] sm:$0xff]   ;;  %v9961_v16 = vld [vmem:[%s12340_s3 + $0x4a8] sm:$0xff]  }
 0x42d   : > { %9460 = vmatprep.subr.bf16.mxu1 %v9923_v30  ;;  %9439 = vmatpush3.bf16.msra.mxu0 %v9924_v13  ;;  %v9960_v30 = vld [vmem:[%s12340_s3 + $0x428] sm:$0xff]   ;;  %v9962_v13 = vld [vmem:[%s12340_s3 + $0x460] sm:$0xff]  }
 0x42e   : > { %9440 = vmatprep.subr.bf16.mxu0 %v9926_v59  ;;  %v9963_v59 = vld [vmem:[%s12340_s3 + $0x4e0] sm:$0xff]  }
 0x430   : > { %9461 = vmatpush3.bf16.msra.mxu1 %v9925_v23  ;;  %v9964_v23 = vld [vmem:[%s12340_s3 + $0x420] sm:$0xff]  }
 0x431   : > { %9462 = vmatprep.subr.bf16.mxu1 %v9927_v22  ;;  %9441 = vmatpush3.bf16.msra.mxu0 %v9928_v53  ;;  %v9966_v22 = vld [vmem:[%s12340_s3 + $0x458] sm:$0xff]   ;;  %v9965_v53 = vld [vmem:[%s12340_s3 + $0x4a0] sm:$0xff]  }
 0x432   : > { %9442 = vmatprep.subr.bf16.mxu0 %v9930_v8  ;;  %v9967_v8 = vld [vmem:[%s12340_s3 + $0x4d8] sm:$0xff]  }
 0x434   : > { %9463 = vmatpush3.bf16.msra.mxu1 %v9929_v36  ;;  %v9968_v36 = vld [vmem:[%s12340_s3 + $0x418] sm:$0xff]  }
 0x435   : > { %9464 = vmatprep.subr.bf16.mxu1 %v9931_v10  ;;  %9443 = vmatpush3.bf16.msra.mxu0 %v9932_v24  ;;  %v9970_v10 = vld [vmem:[%s12340_s3 + $0x450] sm:$0xff]   ;;  %v9969_v24 = vld [vmem:[%s12340_s3 + $0x498] sm:$0xff]  }
 0x436   : > { %9444 = vmatprep.subr.bf16.mxu0 %v9934_v25  ;;  %v9971_v25 = vld [vmem:[%s12340_s3 + $0x4d0] sm:$0xff]  }
 0x438   : > { %9465 = vmatpush3.bf16.msra.mxu1 %v9933_v20  ;;  %v9972_v20 = vld [vmem:[%s12340_s3 + $0x410] sm:$0xff]  }
 0x439   : > { %9466 = vmatprep.subr.bf16.mxu1 %v9935_v34  ;;  %9445 = vmatpush3.bf16.msra.mxu0 %v9936_v51  ;;  %v9974_v34 = vld [vmem:[%s12340_s3 + $0x448] sm:$0xff]   ;;  %v9973_v51 = vld [vmem:[%s12340_s3 + $0x490] sm:$0xff]  }
 0x43a   : > { %9446 = vmatprep.subr.bf16.mxu0 %v9938_v14  ;;  %v6681_v14 = vld [vmem:[#allocation3 + $0x80] sm:$0x3] }
 0x43c   : > { %9467 = vmatpush3.bf16.msra.mxu1 %v9937_v49  ;;  %v9975_v49 = vld [vmem:[%s12340_s3 + $0x4c8] sm:$0xff]  }
 0x43d   : > { %9468 = vmatprep.subr.bf16.mxu1 %v9939_v40  ;;  %9447 = vmatpush3.bf16.msra.mxu0 %v9940_v38  ;;  %v9976_v40 = vld [vmem:[%s12340_s3 + $0x408] sm:$0xff]   ;;  %v9978_v38 = vld [vmem:[%s12340_s3 + $0x440] sm:$0xff]  }
 0x43e   : > { %9448 = vmatprep.subr.bf16.mxu0 %v9942_v17  ;;  %v6673_v17 = vld [vmem:[#allocation3] sm:$0xfc] }
 0x440   : > { %9469 = vmatpush3.bf16.msra.mxu1 %v9941_v43  ;;  %v6686_v43 = vld [vmem:[#allocation3 + $0xa8] sm:$0x3] }
 0x441   : > { %9470 = vmatprep.subr.bf16.mxu1 %v9943_v48  ;;  %9449 = vmatpush3.bf16.msra.mxu0 %v9944_v47  ;;  %v6697_v48 = vpack.c.bf16 %v6681_v14, %v6681_v14  ;;  %v6683_v47 = vld [vmem:[#allocation3 + $0x90] sm:$0x3]  ;;  %v6702_v35 = vpack.c.bf16 %v6686_v43, %v6686_v43  ;;  %v6685_v14 = vld [vmem:[#allocation3 + $0xa0] sm:$0x3] }
 0x442   : > { %9450 = vmatprep.subr.bf16.mxu0 %v9946_v11  ;;  %v9977_v11 = vld [vmem:[%s12340_s3 + $0x488] sm:$0xff]   ;;  %v6701_v43 = vpack.c.bf16 %v6685_v14, %v6685_v14 }
 0x443   : > { %v6850_v57 = vrot.slane %v6697_v48, 1  ;;  %v6865_v1 = vrot.slane %v6702_v35, 1  ;;  %v6687_v48 = vld [vmem:[#allocation3 + $0xb0] sm:$0x3] }
 0x444   : > { %9471 = vmatpush3.bf16.msra.mxu1 %v9945_v44  ;;  %v6688_v44 = vld [vmem:[#allocation3 + $0xb8] sm:$0x3] }
 0x445   : > { %9472 = vmatprep.subr.bf16.mxu1 %v9947_v28  ;;  %9451 = vmatpush3.bf16.msra.mxu0 %v9948_v39  ;;  %v6689_v28 = vpack.c.bf16 %v11687_v58, %v6673_v17  ;;  %v6675_v39 = vld [vmem:[#allocation3 + $0x10] sm:$0xfc]  ;;  %v6677_v17 = vld [vmem:[#allocation3 + $0x20] sm:$0xfc] }
 0x446   : > { %9480 = vmatprep.subr.bf16.mxu0 %v9950_v9  ;;  %v6699_v9 = vpack.c.bf16 %v6683_v47, %v6683_v47  ;;  %v6691_v58 = vpack.c.bf16 %v11690_v15, %v6675_v39  ;;  %v9986_v15 = vld [vmem:[%s12340_s3 + $0x570] sm:$0xff]   ;;  %v10009_v47 = vld [vmem:[%s12340_s3 + $0x588] sm:$0xff]   ;;  %v10013_v39 = vld [vmem:[%s12340_s3 + $0x580] sm:$0xff]  }
 0x448   : > { %9473 = vmatpush3.bf16.msra.mxu1 %v9949_v52  ;;  %6624 = vmatmul.mubr.bf16.vlgmr.msra.gmra.mxu0 %v5181_v61  ;;  %v6704_v52 = vpack.c.bf16 %v6688_v44, %v6688_v44  ;;  %v6696_v61 = vpack.c.bf16 %v11745_v18, %v6680_v56  ;;  %v6856_v2 = vrot.slane %v6699_v9, 1  ;;  %v6866_v18 = vsel %vm3275_vm4, %v6864_v19, %v6865_v1  ;;  %v10021_v1 = vld [vmem:[%s12342_s5] sm:$0xff]  }
 0x449   : > { %9502 = vmatprep.subr.bf16.mxu1 %v9951_v50  ;;  %9481 = vmatpush3.bf16.msra.mxu0 %v9952_v46  ;;  %v9981_v50 = vld [vmem:[%s12340_s3 + $0x480] sm:$0xff]   ;;  %v6849_v46 = vrot.slane %v6689_v28, 1  ;;  %v6693_v44 = vpack.c.bf16 %v11735_v32, %v6677_v17  ;;  %v6862_v28 = vrot.slane %v6701_v43, 1  ;;  %v12358_v56 = vmov 0.0  }
 0x44a   : > { %7297 = vmatprep.mubr.bf16.mxu0 %v6854_v5  ;;  %9482 = vmatprep.subr.bf16.mxu0 %v9954_v54  ;;  %v6871_v41 = vrot.slane %v6704_v52, 1  ;;  %v6870_v5 = vrot.slane %v6696_v61, 1  ;;  %v10015_v52 = vld [vmem:[%s12342_s5 + $0x18] sm:$0xff]  }
 0x44b   : > { %6665 = vmatmul.mubr.bf16.vlgmr.msra.gmra.mxu1 %v5183_v29  ;;  %v6851_v54 = vsel %vm3275_vm4, %v6849_v46, %v6850_v57  ;;  %v9985_v29 = vld [vmem:[%s12340_s3 + $0x5b8] sm:$0xff]   ;;  %v6861_v9 = vrot.slane %v6693_v44, 1  ;;  %v10018_v46 = vld [vmem:[%s12342_s5 + $0x28] sm:$0xff]  }
 0x44c   : > { %9503 = vmatpush3.bf16.msra.mxu1 %v9953_v3  ;;  %7338 = vmatprep.mubr.bf16.mxu1 %v6860_v37  ;;  %v6855_v3 = vrot.slane %v6691_v58, 1  ;;  %v6872_v37 = vsel %vm3275_vm4, %v6870_v5, %v6871_v41  ;;  %v10017_v58 = vld [vmem:[%s12342_s5 + $0x10] sm:$0xff]  }
 0x44d   : > { %9504 = vmatprep.subr.bf16.mxu1 %v9955_v60  ;;  %9483 = vmatpush3.bf16.msra.mxu0 %v9956_v4  ;;  %v9988_v60 = vld [vmem:[%s12340_s3 + $0x530] sm:$0xff]   ;;  %v6863_v57 = vsel %vm3275_vm4, %v6861_v9, %v6862_v28 }
 0x44e   : > { %9484 = vmatprep.subr.bf16.mxu0 %v9958_v33  ;;  %v6857_v4 = vsel %vm3275_vm4, %v6855_v3, %v6856_v2  ;;  %v9990_v33 = vld [vmem:[%s12340_s3 + $0x568] sm:$0xff]  }
 0x450   : > { %9505 = vmatpush3.bf16.msra.mxu1 %v9957_v21  ;;  %v9989_v21 = vld [vmem:[%s12340_s3 + $0x5b0] sm:$0xff]  }
 0x451   : > { %9506 = vmatprep.subr.bf16.mxu1 %v9959_v31  ;;  %9485 = vmatpush3.bf16.msra.mxu0 %v9960_v30  ;;  %v9991_v31 = vld [vmem:[%s12340_s3 + $0x5e8] sm:$0xff]  }
 0x452   : > { %9486 = vmatprep.subr.bf16.mxu0 %v9962_v13  ;;  %v9992_v30 = vld [vmem:[%s12340_s3 + $0x528] sm:$0xff]   ;;  %v9994_v13 = vld [vmem:[%s12340_s3 + $0x560] sm:$0xff]  }
 0x454   : > { %9507 = vmatpush3.bf16.msra.mxu1 %v9961_v16  ;;  %v9993_v16 = vld [vmem:[%s12340_s3 + $0x5a8] sm:$0xff]  }
 0x455   : > { %9508 = vmatprep.subr.bf16.mxu1 %v9963_v59  ;;  %9487 = vmatpush3.bf16.msra.mxu0 %v9964_v23  ;;  %v9995_v59 = vld [vmem:[%s12340_s3 + $0x5e0] sm:$0xff]  }
 0x456   : > { %9488 = vmatprep.subr.bf16.mxu0 %v9966_v22  ;;  %v9996_v23 = vld [vmem:[%s12340_s3 + $0x520] sm:$0xff]   ;;  %v9998_v22 = vld [vmem:[%s12340_s3 + $0x558] sm:$0xff]  }
 0x458   : > { %9509 = vmatpush3.bf16.msra.mxu1 %v9965_v53  ;;  %v9997_v53 = vld [vmem:[%s12340_s3 + $0x5a0] sm:$0xff]  }
 0x459   : > { %9510 = vmatprep.subr.bf16.mxu1 %v9967_v8  ;;  %9489 = vmatpush3.bf16.msra.mxu0 %v9968_v36  ;;  %v9999_v8 = vld [vmem:[%s12340_s3 + $0x5d8] sm:$0xff]  }
 0x45a   : > { %9490 = vmatprep.subr.bf16.mxu0 %v9970_v10  ;;  %v10000_v36 = vld [vmem:[%s12340_s3 + $0x518] sm:$0xff]   ;;  %v10002_v10 = vld [vmem:[%s12340_s3 + $0x550] sm:$0xff]  }
 0x45c   : > { %9511 = vmatpush3.bf16.msra.mxu1 %v9969_v24  ;;  %v10001_v24 = vld [vmem:[%s12340_s3 + $0x598] sm:$0xff]  }
 0x45d   : > { %9512 = vmatprep.subr.bf16.mxu1 %v9971_v25  ;;  %9491 = vmatpush3.bf16.msra.mxu0 %v9972_v20  ;;  %v10003_v25 = vld [vmem:[%s12340_s3 + $0x5d0] sm:$0xff]  }
 0x45e   : > { %9492 = vmatprep.subr.bf16.mxu0 %v9974_v34  ;;  %v10004_v20 = vld [vmem:[%s12340_s3 + $0x510] sm:$0xff]   ;;  %v10006_v34 = vld [vmem:[%s12340_s3 + $0x548] sm:$0xff]  }
 0x460   : > { %9513 = vmatpush3.bf16.msra.mxu1 %v9973_v51  ;;  %v10005_v51 = vld [vmem:[%s12340_s3 + $0x590] sm:$0xff]  }
 0x461   : > { %9514 = vmatprep.subr.bf16.mxu1 %v9975_v49  ;;  %9493 = vmatpush3.bf16.msra.mxu0 %v9976_v40  ;;  %v10007_v49 = vld [vmem:[%s12340_s3 + $0x5c8] sm:$0xff]  }
 0x462   : > { %9494 = vmatprep.subr.bf16.mxu0 %v9978_v38  ;;  %v10008_v40 = vld [vmem:[%s12340_s3 + $0x508] sm:$0xff]   ;;  %v10010_v38 = vld [vmem:[%s12340_s3 + $0x540] sm:$0xff]  }
 0x464   : > { %9515 = vmatpush3.bf16.msra.mxu1 %v9977_v11  ;;  %v10011_v11 = vld [vmem:[%s12340_s3 + $0x5c0] sm:$0xff]  }
 0x465   : > { %9516 = vmatprep.subr.bf16.mxu1 %v9979_v62  ;;  %9495 = vmatpush3.bf16.msra.mxu0 %v9980_v6  ;;  %v6679_v62 = vld [vmem:[#allocation3 + $0x30] sm:$0xfc]  ;;  %v6703_v6 = vpack.c.bf16 %v6687_v48, %v6687_v48 }
 0x466   : > { %9524 = vmatprep.subr.bf16.mxu0 %v9982_v55  ;;  %v6695_v35 = vpack.c.bf16 %v11738_v12, %v6679_v62  ;;  %v10014_v12 = vld [vmem:[%s12342_s5 + $0x38] sm:$0xff]  }
 0x467   : > { %v6868_v55 = vrot.slane %v6703_v6, 1 }
 0x468   : > { %9517 = vmatpush3.bf16.msra.mxu1 %v9981_v50  ;;  %7298 = vmatmul.mubr.bf16.vlgmr.msra.gmra.mxu0 %v6851_v54  ;;  %v6867_v32 = vrot.slane %v6695_v35, 1  ;;  %v10016_v50 = vld [vmem:[%s12342_s5 + $0x30] sm:$0xff]  }
 0x469   : > { %9546 = vmatprep.subr.bf16.mxu1 %v9983_v63  ;;  %9525 = vmatpush3.bf16.msra.mxu0 %v9984_v45  ;;  %v10019_v63 = vld [vmem:[%s12342_s5 + $0x8] sm:$0xff]   ;;  %v10020_v45 = vld [vmem:[%s12342_s5 + $0x20] sm:$0xff]  }
 0x46a   : > { %7379 = vmatprep.mubr.bf16.mxu0 %v6866_v18  ;;  %9526 = vmatprep.subr.bf16.mxu0 %v9986_v15  ;;  %v6869_v7 = vsel %vm3275_vm4, %v6867_v32, %v6868_v55 }
 0x46b   : > { %7339 = vmatmul.mubr.bf16.vlgmr.msra.gmra.mxu1 %v6857_v4 }
 0x46c   : > { %9547 = vmatpush3.bf16.msra.mxu1 %v9985_v29  ;;  %7420 = vmatprep.mubr.bf16.mxu1 %v6872_v37 }
 0x46d   : > { %9548 = vmatprep.subr.bf16.mxu1 %v9987_v42  ;;  %9527 = vmatpush3.bf16.msra.mxu0 %v9988_v60 }
 0x46e   : > { %9528 = vmatprep.subr.bf16.mxu0 %v9990_v33 }
 0x470   : > { %9549 = vmatpush3.bf16.msra.mxu1 %v9989_v21 }
 0x471   : > { %9550 = vmatprep.subr.bf16.mxu1 %v9991_v31  ;;  %9529 = vmatpush3.bf16.msra.mxu0 %v9992_v30 }
 0x472   : > { %9530 = vmatprep.subr.bf16.mxu0 %v9994_v13 }
 0x474   : > { %9551 = vmatpush3.bf16.msra.mxu1 %v9993_v16 }
 0x475   : > { %9552 = vmatprep.subr.bf16.mxu1 %v9995_v59  ;;  %9531 = vmatpush3.bf16.msra.mxu0 %v9996_v23 }
 0x476   : > { %9532 = vmatprep.subr.bf16.mxu0 %v9998_v22 }
 0x478   : > { %9553 = vmatpush3.bf16.msra.mxu1 %v9997_v53 }
 0x479   : > { %9554 = vmatprep.subr.bf16.mxu1 %v9999_v8  ;;  %9533 = vmatpush3.bf16.msra.mxu0 %v10000_v36 }
 0x47a   : > { %9534 = vmatprep.subr.bf16.mxu0 %v10002_v10 }
 0x47c   : > { %9555 = vmatpush3.bf16.msra.mxu1 %v10001_v24 }
 0x47d   : > { %9556 = vmatprep.subr.bf16.mxu1 %v10003_v25  ;;  %9535 = vmatpush3.bf16.msra.mxu0 %v10004_v20 }
 0x47e   : > { %9536 = vmatprep.subr.bf16.mxu0 %v10006_v34 }
 0x480   : > { %9557 = vmatpush3.bf16.msra.mxu1 %v10005_v51 }
 0x481   : > { %9558 = vmatprep.subr.bf16.mxu1 %v10007_v49  ;;  %9537 = vmatpush3.bf16.msra.mxu0 %v10008_v40 }
 0x482   : > { %9538 = vmatprep.subr.bf16.mxu0 %v10010_v38 }
 0x484   : > { %9559 = vmatpush3.bf16.msra.mxu1 %v10009_v47 }
 0x485   : > { %9560 = vmatprep.subr.bf16.mxu1 %v10011_v11  ;;  %9539 = vmatpush3.bf16.msra.mxu0 %v10012_v0 }
 0x486   : > { %9583 = vmatprep.subr.bf16.mxu0 %v12358_v56 }
 0x488   : > { %9561 = vmatpush3.bf16.msra.mxu1 %v10013_v39  ;;  %7380 = vmatmul.mubr.bf16.vlgmr.msra.gmra.mxu0 %v6863_v57 }
 0x489   : > { %9595 = vmatprep.subr.bf16.mxu1 %v12358_v56  ;;  %9591 = vmatprep.mubr.msk.bf16.mxu0 %vm10036_vm5, %v12358_v56 }
 0x48a   : > { %9584 = vmatpush3.bf16.msra.mxu0 %v10014_v12 }
 0x48b   : > { %7421 = vmatmul.mubr.bf16.vlgmr.msra.gmra.mxu1 %v6869_v7  ;;  %9585 = vmatprep.subr.bf16.mxu0 %v12358_v56 }
 0x48c   : > { %9603 = vmatprep.mubr.msk.bf16.mxu1 %vm10036_vm5, %v12358_v56  ;;  %9596 = vmatpush3.bf16.msra.mxu1 %v10015_v52 }
 0x48d   : > { %9597 = vmatprep.subr.bf16.mxu1 %v12358_v56 }
 0x48e   : > { %9586 = vmatpush3.bf16.msra.mxu0 %v10016_v50 }
 0x48f   : > { %9587 = vmatprep.subr.bf16.mxu0 %v12358_v56 }
 0x490   : > { %9598 = vmatpush3.bf16.msra.mxu1 %v10017_v58 }
 0x491   : > { %9599 = vmatprep.subr.bf16.mxu1 %v12358_v56 }
 0x492   : > { %9588 = vmatpush3.bf16.msra.mxu0 %v10018_v46 }
 0x493   : > { %9589 = vmatprep.subr.bf16.mxu0 %v12358_v56 }
 0x494   : > { %9600 = vmatpush3.bf16.msra.mxu1 %v10019_v63 }
 0x495   : > { %9601 = vmatprep.subr.bf16.mxu1 %v12358_v56 }
 0x496   : > { %9590 = vmatpush3.bf16.msra.mxu0 %v10020_v45 }
 0x497   : > { %9607 = vmatprep.subr.bf16.mxu0 %v12358_v56 }
 0x498   : > { %9602 = vmatpush3.bf16.msra.mxu1 %v10021_v1 }
 0x4a8   : > { %v9320_v61 = vpop.f32.mrf.mxu0 }
 0x4aa   : > { %v9321_v15 = vpop.f32.mrf.mxu0 }
 0x4ab   : > { %v9342_v2 = vpop.f32.mrf.mxu1  ;;  %v9322_v51 = vadd.f32 %v9321_v15, %v9320_v61 }
 0x4ac   : > { %v9323_v19 = vpop.f32.mrf.mxu0 }
 0x4ad   : > { %v9343_v54 = vpop.f32.mrf.mxu1 }
 0x4ae   : > { %v9324_v3 = vpop.f32.mrf.mxu0  ;;  %v9344_v14 = vadd.f32 %v9343_v54, %v9342_v2 }
 0x4af   : > { %v9345_v41 = vpop.f32.mrf.mxu1  ;;  %v9325_v48 = vadd.f32 %v9324_v3, %v9323_v19 }
 0x4b0   : > { %v6037_v43 = vadd.f32 %v9344_v14, %v9322_v51  ;;  %v9003_v14 = vld [vmem:[%s12341_s4] ss:$0 sm:$0xff] }
 0x4b1   : > { %v9346_v29 = vpop.f32.mrf.mxu1 }
 0x4b2   : > { %v9347_v47 = vadd.f32 %v9346_v29, %v9345_v41 }
 0x4b4   : > { %v6040_v6 = vadd.f32 %v9347_v47, %v9325_v48 }
 0x4c8   : > { %v9364_v18 = vpop.f32.mrf.mxu0 }
 0x4ca   : > { %v9365_v42 = vpop.f32.mrf.mxu0 }
 0x4cb   : > { %v9386_v5 = vpop.f32.mrf.mxu1  ;;  %v9366_v38 = vadd.f32 %v9365_v42, %v9364_v18 }
 0x4cc   : > { %v9367_v4 = vpop.f32.mrf.mxu0 }
 0x4cd   : > { %v9387_v60 = vpop.f32.mrf.mxu1  ;;  %v6078_v0 = vadd.f32 %v9366_v38, %v6037_v43 }
 0x4ce   : > { %v9368_v37 = vpop.f32.mrf.mxu0  ;;  %v9388_v28 = vadd.f32 %v9387_v60, %v9386_v5 }
 0x4cf   : > { %v9389_v33 = vpop.f32.mrf.mxu1  ;;  %v9369_v44 = vadd.f32 %v9368_v37, %v9367_v4 }
 0x4d0   : > { %v6119_v9 = vadd.f32 %v9388_v28, %v6078_v0 }
 0x4d1   : > { %v9390_v21 = vpop.f32.mrf.mxu1  ;;  %v6081_v55 = vadd.f32 %v9369_v44, %v6040_v6 }
 0x4d2   : > { %v9391_v32 = vadd.f32 %v9390_v21, %v9389_v33 }
 0x4d4   : > { %v6122_v46 = vadd.f32 %v9391_v32, %v6081_v55 }
 0x4e8   : > { %v9408_v31 = vpop.f32.mrf.mxu0 }
 0x4ea   : > { %v9409_v13 = vpop.f32.mrf.mxu0 }
 0x4eb   : > { %v9430_v30 = vpop.f32.mrf.mxu1  ;;  %v9410_v39 = vadd.f32 %v9409_v13, %v9408_v31 }
 0x4ec   : > { %v9411_v59 = vpop.f32.mrf.mxu0 }
 0x4ed   : > { %v9431_v16 = vpop.f32.mrf.mxu1  ;;  %v6544_v7 = vadd.f32 %v9410_v39, %v6119_v9 }
 0x4ee   : > { %v9412_v22 = vpop.f32.mrf.mxu0  ;;  %v9432_v63 = vadd.f32 %v9431_v16, %v9430_v30 }
 0x4ef   : > { %v9433_v23 = vpop.f32.mrf.mxu1  ;;  %v9413_v12 = vadd.f32 %v9412_v22, %v9411_v59 }
 0x4f0   : > { %v6585_v2 = vadd.f32 %v9432_v63, %v6544_v7 }
 0x4f1   : > { %v9434_v53 = vpop.f32.mrf.mxu1  ;;  %v6547_v15 = vadd.f32 %v9413_v12, %v6122_v46 }
 0x4f2   : > { %v9435_v5 = vadd.f32 %v9434_v53, %v9433_v23 }
 0x4f4   : > { %v6588_v21 = vadd.f32 %v9435_v5, %v6547_v15 }
 0x508   : > { %v9452_v8 = vpop.f32.mrf.mxu0 }
 0x50a   : > { %v9453_v10 = vpop.f32.mrf.mxu0 }
 0x50b   : > { %v9474_v36 = vpop.f32.mrf.mxu1  ;;  %v9454_v45 = vadd.f32 %v9453_v10, %v9452_v8 }
 0x50c   : > { %v9455_v25 = vpop.f32.mrf.mxu0 }
 0x50d   : > { %v9475_v24 = vpop.f32.mrf.mxu1  ;;  %v6626_v42 = vadd.f32 %v9454_v45, %v6585_v2 }
 0x50e   : > { %v9456_v34 = vpop.f32.mrf.mxu0  ;;  %v9476_v31 = vadd.f32 %v9475_v24, %v9474_v36 }
 0x50f   : > { %v9477_v20 = vpop.f32.mrf.mxu1  ;;  %v9457_v60 = vadd.f32 %v9456_v34, %v9455_v25 }
 0x510   : > { %v6667_v8 = vadd.f32 %v9476_v31, %v6626_v42 }
 0x511   : > { %v9478_v49 = vpop.f32.mrf.mxu1  ;;  %v6629_v10 = vadd.f32 %v9457_v60, %v6588_v21 }
 0x512   : > { %v9479_v25 = vadd.f32 %v9478_v49, %v9477_v20  ;;  %v10022_v20 = vld [vmem:[%s12342_s5 + $0x58] sm:$0xff]  }
 0x514   : > { %v6670_v38 = vadd.f32 %v9479_v25, %v6629_v10 }
 0x528   : > { %v9496_v40 = vpop.f32.mrf.mxu0 }
 0x52a   : > { %v9497_v11 = vpop.f32.mrf.mxu0 }
 0x52b   : > { %v9518_v17 = vpop.f32.mrf.mxu1  ;;  %v9498_v50 = vadd.f32 %v9497_v11, %v9496_v40 }
 0x52c   : > { %v9499_v35 = vpop.f32.mrf.mxu0 }
 0x52d   : > { %v9519_v62 = vpop.f32.mrf.mxu1 }
 0x52e   : > { %v9500_v52 = vpop.f32.mrf.mxu0  ;;  %v9520_v58 = vadd.f32 %v9519_v62, %v9518_v17 }
 0x52f   : > { %v9521_v57 = vpop.f32.mrf.mxu1  ;;  %v9501_v41 = vadd.f32 %v9500_v52, %v9499_v35  ;;  %v10025_v35 = vld [vmem:[%s12342_s5 + $0x40] sm:$0xff]  }
 0x530   : > { %v7341_v19 = vadd.f32 %v9520_v58, %v9498_v50 }
 0x531   : > { %v9522_v1 = vpop.f32.mrf.mxu1 }
 0x532   : > { %v9523_v3 = vadd.f32 %v9522_v1, %v9521_v57 }
 0x534   : > { %v7344_v16 = vadd.f32 %v9523_v3, %v9501_v41 }
 0x548   : > { %v9540_v61 = vpop.f32.mrf.mxu0 }
 0x54a   : > { %v9541_v54 = vpop.f32.mrf.mxu0 }
 0x54b   : > { %v9562_v29 = vpop.f32.mrf.mxu1  ;;  %v9542_v18 = vadd.f32 %v9541_v54, %v9540_v61 }
 0x54c   : > { %v9543_v4 = vpop.f32.mrf.mxu0 }
 0x54d   : > { %v7382_v33 = vadd.f32 %v9542_v18, %v7341_v19  ;;  %v9563_v37 = vpop.f32.mrf.mxu1 }
 0x54e   : > { %v9564_v30 = vadd.f32 %v9563_v37, %v9562_v29  ;;  %v9544_v13 = vpop.f32.mrf.mxu0 }
 0x54f   : > { %v9565_v59 = vpop.f32.mrf.mxu1  ;;  %v9545_v22 = vadd.f32 %v9544_v13, %v9543_v4 }
 0x550   : > { %v7423_v51 = vadd.f32 %v9564_v30, %v7382_v33 }
 0x551   : > { %v7385_v23 = vadd.f32 %v9545_v22, %v7344_v16  ;;  %v9566_v53 = vpop.f32.mrf.mxu1 }
 0x552   : > { %v7429_v34 = vadd.f32 %v7423_v51, %v6667_v8  ;;  %v9567_v40 = vadd.f32 %v9566_v53, %v9565_v59 }
 0x554   : > { %v7438_v17 = vadd.f32 %v9003_v14, %v7429_v34  ;;  %v7426_v36 = vadd.f32 %v9567_v40, %v7385_v23 }
 0x556   : > { %v7440_v24 = vmax.f32 %v7438_v17, 0.0  ;;  %v7430_v43 = vadd.f32 %v7426_v36, %v6670_v38 }
 0x558   : > { %v7442_v48 = vadd.f32 %v7440_v24, %v10149_v26  ;;  %v7439_v47 = vadd.f32 %v9003_v14, %v7430_v43  ;;  %v10023_v26 = vld [vmem:[%s12342_s5 + $0x50] sm:$0xff]  }
 0x55a   : > { %7444 = vst.msk [vmem:[#allocation2 + $0x1] sm:$0xff] %vm290_vm1, %v7442_v48  ;;  %v7441_v11 = vmax.f32 %v7439_v47, 0.0 }
 0x55c   : > { %v7443_v0 = vadd.f32 %v7441_v11, %v10151_v27  ;;  %v10024_v27 = vld [vmem:[%s12342_s5 + $0x48] sm:$0xff]  }
 0x55e   : > { %7445 = vst.msk [vmem:[#allocation2 + $0x9] sm:$0xff] %vm290_vm1, %v7443_v0 }
 0x561   : > { %v7457_v44 = vld [vmem:[#allocation2 + $0x1] sm:$0xff] }
 0x562   : > { %v7446_v62 = vld [vmem:[#allocation2] sm:$0xff] }
 0x565   : > { %v7458_v49 = vld [vmem:[#allocation2 + $0x9] sm:$0xff] }
 0x566   : > { %v7447_v6 = vld [vmem:[#allocation2 + $0x8] sm:$0xff]  ;;  %v7459_v28 = vpack.c.bf16 %v7458_v49, %v7457_v44 }
 0x567   : > { %v7448_v39 = vpack.c.bf16 %v7447_v6, %v7446_v62  ;;  %v7605_v9 = vld [vmem:[#allocation2 + $0x2] sm:$0xff]  ;;  %v7606_v55 = vld [vmem:[#allocation2 + $0xa] sm:$0xff] }
 0x568   : > { %9592 = vmatmul.mubr.msk.bf16.vlgmr.msra.gmra.mxu0 %vm290_vm1, %v7459_v28  ;;  %v7607_v57 = vpack.c.bf16 %v7606_v55, %v7605_v9 }
 0x569   : > { %9604 = vmatmul.mubr.msk.bf16.vlgmr.msra.gmra.mxu1 %vm290_vm1, %v7448_v39  ;;  %9608 = vmatpush3.bf16.msra.mxu0 %v10022_v20 }
 0x56a   : > { %9615 = vmatprep.mubr.msk.bf16.mxu0 %vm10036_vm5, %v12358_v56  ;;  %9609 = vmatprep.subr.bf16.mxu0 %v12358_v56 }
 0x56d   : > { %9610 = vmatpush3.bf16.msra.mxu0 %v10023_v26 }
 0x56e   : > { %9611 = vmatprep.subr.bf16.mxu0 %v12358_v56 }
 0x571   : > { %9612 = vmatpush3.bf16.msra.mxu0 %v10024_v27 }
 0x572   : > { %9613 = vmatprep.subr.bf16.mxu0 %v12358_v56  ;;  %v9035_v56 = vld [vmem:[%s12343_s6] ss:$0 sm:$0xff] }
 0x575   : > { %9614 = vmatpush3.bf16.msra.mxu0 %v10025_v35 }
 0x578   : > { %9616 = vmatmul.mubr.msk.bf16.vlgmr.msra.gmra.mxu0 %vm290_vm1, %v7607_v57 }
 0x628   : > { %v7530_v32 = vpop.f32.mrf.mxu0 }
 0x629   : > { %v7598_v7 = vpop.f32.mrf.mxu1 }
 0x62a   : > { %v9593_v12 = vpop.f32.mrf.mxu0  ;;  %v7599_v45 = vadd.f32 %v7598_v7, %v7530_v32 }
 0x62b   : > { %v9605_v52 = vpop.f32.mrf.mxu1 }
 0x62c   : > { %v7533_v50 = vpop.f32.mrf.mxu0 }
 0x62d   : > { %v7601_v58 = vpop.f32.mrf.mxu1 }
 0x62e   : > { %v9594_v46 = vpop.f32.mrf.mxu0  ;;  %v7602_v15 = vadd.f32 %v7601_v58, %v7533_v50 }
 0x62f   : > { %v9606_v63 = vpop.f32.mrf.mxu1 }
 0x638   : > { %v7678_v1 = vpop.f32.mrf.mxu0 }
 0x639   : > { %v7685_v61 = vadd.f32 %v7678_v1, %v7599_v45 }
 0x63a   : > { %v9617_v2 = vpop.f32.mrf.mxu0 }
 0x63b   : > { %v7694_v54 = vadd.f32 %v9035_v56, %v7685_v61 }
 0x63c   : > { %v7681_v19 = vpop.f32.mrf.mxu0 }
 0x63d   : > { %7696 = vst.msk [vmem:[%s278_s15] sm:$0xff] %vm290_vm1, %v7694_v54  ;;  %v7686_v41 = vadd.f32 %v7681_v19, %v7602_v15 }
 0x63e   : > { %v9618_v3 = vpop.f32.mrf.mxu0 }
 0x63f   : > { %v7695_v29 = vadd.f32 %v9035_v56, %v7686_v41 }
 0x641   : > { %7697 = vst.msk [vmem:[%s278_s15 + $0x8] sm:$0xff] %vm290_vm1, %v7695_v29 }
 0x642 PF: > { %s17_s24 = sadd.s32 1, %s10032_s24  }
 0x643   : > { %p14_p4 = scmp.ge.s32.totalorder %s17_s24, 4  }
 0x645   :  { %16 = sbr.rel (!%p14_p4) target bundleno = 1 (0x1), region = 85 }

</bundles_post_ra>
